<compile_context>
chip_gen: v7x
topology: tpu7x:2x2x1
jax: 0.10.0
libtpu: 0.0.40
codegen_flags: <defaults>
</compile_context>

<pallas_src>
import jax
import jax.numpy as jnp
from jax.experimental import pallas as pl
from jax.experimental.pallas import tpu as pltpu

# ----------------------------- hyperparameters ------------------------------
BATCH       = 2
SEQ_LEN     = 8
X_SIZE      = 4      # x_size
YF_SIZE     = 3      # y_features_size
OUT_SIZE    = 2      # y_size
HIDDEN0     = 128    # hidden_size[0]  (128 keeps gate slices lane-aligned)
HIDDEN1     = 32     # hidden_size[1]  -> fc_end has Linear/ReLU/Linear
PROJ_SIZE   = 0      # proj_size == 0 -> plain LSTM, h_0 uses hidden_size[0]
IMM_SIZE    = 5      # immutable_size
NUM_LAYERS  = 2


# --------------------------------- kernel -----------------------------------
def lecture_lstm_kernel(
    x_ref,        # (T*B, X)   bf16  time-major, row t*B+b
    y_last_ref,   # (B, Yf)    bf16  y_features[:, -1, :]
    c0_l0_ref,    # (B, H)     f32   initial cell state, layer 0
    c0_l1_ref,    # (B, H)     f32   initial cell state, layer 1
    wih0_ref,     # (X, 4H)    bf16  layer-0 input weights (T, g-cols x2)
    whh0_ref,     # (H, 4H)    bf16  layer-0 recurrent weights (g-cols x2)
    b0_ref,       # (1, 4H)    f32   b_ih + b_hh, layer 0 (g-cols x2)
    wih1_ref,     # (H, 4H)    bf16  layer-1 input weights (g-cols x2)
    whh1_ref,     # (H, 4H)    bf16  layer-1 recurrent weights (g-cols x2)
    b1_ref,       # (1, 4H)    f32   b_ih + b_hh, layer 1 (g-cols x2)
    wfc1h_ref,    # (H, H1)    bf16  fc_end input_layer, lstm-output part
    wfc1y_ref,    # (Yf, H1)   bf16  fc_end input_layer, y_features part
    bfc1_ref,     # (1, H1)    f32
    wfc2_ref,     # (H1, O)    bf16  fc_end output_layer
    bfc2_ref,     # (1, O)     f32
    out_ref,      # (B, O)     f32
):
    B = out_ref.shape[0]
    TB = x_ref.shape[0]
    T = TB // B
    H = whh0_ref.shape[0]

    # ---- hoisted layer-0 input projection over all timesteps (+ bias) ------
    # Kept as a value (no scratch round-trip); ~32 KB f32, sliced statically.
    xg0 = (jnp.dot(x_ref[...], wih0_ref[...],
                   preferred_element_type=jnp.float32) + b0_ref[...])

    # Hoist the (1, 4H) -> (B, 4H) layer-1 bias broadcast out of the loop
    # (JAX does not CSE broadcast_in_dim).
    b1_b = jnp.broadcast_to(b1_ref[...], (B, 4 * H))

    def gate_math(gates, c):
        # One WIDE sigmoid over all 4H gate lanes (g-columns were pre-scaled
        # by 2 in the wrapper, so tanh(g_pre) = 2*sigmoid(2*g_pre) - 1).
        s = jax.nn.sigmoid(gates)
        i = s[:, 0:H]
        f = s[:, H:2 * H]
        g = 2.0 * s[:, 2 * H:3 * H] - 1.0
        o = s[:, 3 * H:4 * H]
        c_new = f * c + i * g
        h_new = o * jnp.tanh(c_new)
        return h_new, c_new

    zeros = jnp.zeros((B, H), jnp.float32)        # h_0 = zeros (both layers)
    h0, c0 = zeros, c0_l0_ref[...]
    h1, c1 = zeros, c0_l1_ref[...]

    # Static unrolled recurrence (T = 8): static slices, no dynamic addressing.
    for t in range(T):
        # layer-1 recurrent product depends only on h1(t-1): issue it first so
        # it overlaps layer-0's matmul + gate math of the same step.
        g1_rec = jnp.dot(h1.astype(jnp.bfloat16), whh1_ref[...],
                         preferred_element_type=jnp.float32)
        # layer 0: input part precomputed; single recurrent matmul (bf16 MXU)
        g0 = xg0[t * B:(t + 1) * B, :] + jnp.dot(
            h0.astype(jnp.bfloat16), whh0_ref[...],
            preferred_element_type=jnp.float32)
        h0, c0 = gate_math(g0, c0)
        # layer 1: un-fused input product (K = 128) + recurrent part + bias
        g1 = jnp.dot(h0.astype(jnp.bfloat16), wih1_ref[...],
                     preferred_element_type=jnp.float32) + g1_rec + b1_b
        h1, c1 = gate_math(g1, c1)

    # fc_end: cat(out_lstm[:, -1, :], y_features[:, -1, :]) -> Linear -> ReLU
    #         -> Linear.  Concat realized as a split matmul (identical math).
    hid = (jnp.dot(h1.astype(jnp.bfloat16), wfc1h_ref[...],
                   preferred_element_type=jnp.float32)
           + jnp.dot(y_last_ref[...], wfc1y_ref[...],
                     preferred_element_type=jnp.float32)
           + bfc1_ref[...])
    hid = jnp.maximum(hid, 0.0)
    pred = (jnp.dot(hid.astype(jnp.bfloat16), wfc2_ref[...],
                    preferred_element_type=jnp.float32)
            + bfc2_ref[...])
    out_ref[...] = pred.astype(out_ref.dtype)


# -------------------------------- wrapper ------------------------------------
def make_params(key):
    H, L = HIDDEN0, NUM_LAYERS
    ks = jax.random.split(key, 16)
    n = lambda k, shape: (jax.random.normal(k, shape, jnp.float32) * 0.1)
    params = dict(
        w_init=n(ks[0], (IMM_SIZE, L * H)),
        b_init=n(ks[1], (1, L * H)),
        wih0=n(ks[2], (X_SIZE, 4 * H)),
        whh0=n(ks[3], (H, 4 * H)),
        b0=n(ks[4], (1, 4 * H)),
        wih1=n(ks[5], (H, 4 * H)),
        whh1=n(ks[6], (H, 4 * H)),
        b1=n(ks[7], (1, 4 * H)),
        wfc1h=n(ks[8], (H, HIDDEN1)),
        wfc1y=n(ks[9], (YF_SIZE, HIDDEN1)),
        bfc1=n(ks[10], (1, HIDDEN1)),
        wfc2=n(ks[11], (HIDDEN1, OUT_SIZE)),
        bfc2=n(ks[12], (1, OUT_SIZE)),
    )
    return params


def simple_lecture_lstm_forward(x, y_features, immutable, params):
    B, T, X = x.shape
    H, L = HIDDEN0, NUM_LAYERS

    # c_0 = init_nn(immutable).view(L, B, H): one-shot f32 prologue in plain
    # JAX; keeps the lane-crossing view/relayout out of the kernel.
    c0 = (immutable @ params["w_init"] + params["b_init"][0]).reshape(L, B, H)

    # Time-major, flattened to (T*B, X) so the kernel can hoist the layer-0
    # input projection over all timesteps as a single matmul.
    x_tm = jnp.transpose(x, (1, 0, 2)).reshape(T * B, X)
    y_last = y_features[:, -1, :]                    # (B, Yf)

    # Pre-scale the candidate-gate (g) columns [2H:3H] of every LSTM weight
    # matrix and bias by 2 so the kernel can apply ONE wide sigmoid over all
    # 4H gate lanes and recover tanh via g = 2*s - 1.  Applied consistently to
    # wih0/whh0/b0 and wih1/whh1/b1 (biases already represent b_ih + b_hh).
    def scale_g(a):
        return a.at[..., 2 * H:3 * H].multiply(2.0)

    bf16 = lambda a: a.astype(jnp.bfloat16)
    args = (
        bf16(x_tm), bf16(y_last), c0[0], c0[1],
        bf16(scale_g(params["wih0"])), bf16(scale_g(params["whh0"])),
        scale_g(params["b0"]),
        bf16(scale_g(params["wih1"])), bf16(scale_g(params["whh1"])),
        scale_g(params["b1"]),
        bf16(params["wfc1h"]), bf16(params["wfc1y"]), params["bfc1"],
        bf16(params["wfc2"]), params["bfc2"],
    )

    fn = pl.pallas_call(
        lecture_lstm_kernel,
        out_shape=jax.ShapeDtypeStruct((B, OUT_SIZE), jnp.float32),
        in_specs=[pl.BlockSpec(memory_space=pltpu.MemorySpace.VMEM)] * len(args),
        out_specs=pl.BlockSpec(memory_space=pltpu.MemorySpace.VMEM),
    )
    return fn(*args)


def reference_forward(x, y_features, immutable, p):
    """Pure-JAX f32 reference mirroring the PyTorch forward exactly."""
    B, T, _ = x.shape
    H, L = HIDDEN0, NUM_LAYERS
    c0_flat = immutable @ p["w_init"] + p["b_init"][0]
    c0 = c0_flat.reshape(L, B, H)                    # torch .view(L, B, H)
    h = [jnp.zeros((B, H), jnp.float32) for _ in range(L)]
    c = [c0[l] for l in range(L)]
    wihs = [p["wih0"], p["wih1"]]
    whhs = [p["whh0"], p["whh1"]]
    bs = [p["b0"][0], p["b1"][0]]
    for t in range(T):
        inp = x[:, t, :]
        for l in range(L):
            gates = inp @ wihs[l] + h[l] @ whhs[l] + bs[l]
            i = jax.nn.sigmoid(gates[:, 0:H])
            f = jax.nn.sigmoid(gates[:, H:2 * H])
            g = jnp.tanh(gates[:, 2 * H:3 * H])
            o = jax.nn.sigmoid(gates[:, 3 * H:4 * H])
            c[l] = f * c[l] + i * g
            h[l] = o * jnp.tanh(c[l])
            inp = h[l]
    y_last = y_features[:, -1, :]
    hid = jnp.maximum(h[-1] @ p["wfc1h"] + y_last @ p["wfc1y"] + p["bfc1"][0], 0.0)
    return hid @ p["wfc2"] + p["bfc2"][0]


if __name__ == "__main__":
    key = jax.random.PRNGKey(0)
    k_x, k_y, k_imm, k_p = jax.random.split(key, 4)

    x = jax.random.normal(k_x, (BATCH, SEQ_LEN, X_SIZE), jnp.float32)
    y_features = jax.random.normal(k_y, (BATCH, SEQ_LEN, YF_SIZE), jnp.float32)
    immutable = jax.random.normal(k_imm, (BATCH, IMM_SIZE), jnp.float32)
    params = make_params(k_p)

    pred = simple_lecture_lstm_forward(x, y_features, immutable, params)
    pred = jax.block_until_ready(pred)

    ref = reference_forward(x, y_features, immutable, params)
    assert pred.shape == (BATCH, OUT_SIZE)
    # Kernel uses bf16 MXU operands with f32 accumulation (perf review), so
    # compare against the pure-f32 reference with a slightly relaxed tolerance.
    assert jnp.allclose(pred, ref, rtol=2e-2, atol=2e-2), (pred, ref)

    print("KERNEL_OK")
</pallas_src>

<mosaic_0001>
module attributes {stable_mosaic.version = 11 : i64} {
  func.func @lecture_lstm_kernel(%arg0: memref<16x4xbf16, #tpu.memory_space<vmem>>, %arg1: memref<2x3xbf16, #tpu.memory_space<vmem>>, %arg2: memref<2x128xf32, #tpu.memory_space<vmem>>, %arg3: memref<2x128xf32, #tpu.memory_space<vmem>>, %arg4: memref<4x512xbf16, #tpu.memory_space<vmem>>, %arg5: memref<128x512xbf16, #tpu.memory_space<vmem>>, %arg6: memref<1x512xf32, #tpu.memory_space<vmem>>, %arg7: memref<128x512xbf16, #tpu.memory_space<vmem>>, %arg8: memref<128x512xbf16, #tpu.memory_space<vmem>>, %arg9: memref<1x512xf32, #tpu.memory_space<vmem>>, %arg10: memref<128x32xbf16, #tpu.memory_space<vmem>>, %arg11: memref<3x32xbf16, #tpu.memory_space<vmem>>, %arg12: memref<1x32xf32, #tpu.memory_space<vmem>>, %arg13: memref<32x2xbf16, #tpu.memory_space<vmem>>, %arg14: memref<1x2xf32, #tpu.memory_space<vmem>>, %arg15: memref<2x2xf32, #tpu.memory_space<vmem>>) attributes {dimension_semantics = [], scalar_prefetch = 0 : i64, scratch_operands = 0 : i64, tpu.core_type = #tpu.core_type<tc>} {
    %c0 = arith.constant 0 : index
    %c0_0 = arith.constant 0 : index
    %0 = vector.load %arg0[%c0, %c0_0] : memref<16x4xbf16, #tpu.memory_space<vmem>>, vector<16x4xbf16>
    %c0_1 = arith.constant 0 : index
    %c0_2 = arith.constant 0 : index
    %1 = vector.load %arg4[%c0_1, %c0_2] : memref<4x512xbf16, #tpu.memory_space<vmem>>, vector<4x512xbf16>
    %cst = arith.constant dense<0.000000e+00> : vector<16x512xf32>
    %2 = tpu.matmul %0, %1, %cst {dimension_numbers = #tpu.dot_dimension_numbers<[1], [0], [0], [1], [0, 0, 1, 1], [], []>} : vector<16x4xbf16>, vector<4x512xbf16>, vector<16x512xf32> -> vector<16x512xf32>
    %c0_3 = arith.constant 0 : index
    %c0_4 = arith.constant 0 : index
    %3 = vector.load %arg6[%c0_3, %c0_4] : memref<1x512xf32, #tpu.memory_space<vmem>>, vector<1x512xf32>
    %4 = vector.broadcast %3 : vector<1x512xf32> to vector<16x512xf32>
    %5 = arith.addf %2, %4 : vector<16x512xf32>
    %c0_5 = arith.constant 0 : index
    %c0_6 = arith.constant 0 : index
    %6 = vector.load %arg9[%c0_5, %c0_6] : memref<1x512xf32, #tpu.memory_space<vmem>>, vector<1x512xf32>
    %7 = vector.shape_cast %6 : vector<1x512xf32> to vector<1x512xf32>
    %8 = vector.broadcast %7 : vector<1x512xf32> to vector<2x512xf32>
    %cst_7 = arith.constant 0.000000e+00 : f32
    %9 = vector.broadcast %cst_7 : f32 to vector<2x128xf32>
    %c0_8 = arith.constant 0 : index
    %c0_9 = arith.constant 0 : index
    %10 = vector.load %arg2[%c0_8, %c0_9] : memref<2x128xf32, #tpu.memory_space<vmem>>, vector<2x128xf32>
    %c0_10 = arith.constant 0 : index
    %c0_11 = arith.constant 0 : index
    %11 = vector.load %arg3[%c0_10, %c0_11] : memref<2x128xf32, #tpu.memory_space<vmem>>, vector<2x128xf32>
    %12 = arith.truncf %9 : vector<2x128xf32> to vector<2x128xbf16>
    %c0_12 = arith.constant 0 : index
    %c0_13 = arith.constant 0 : index
    %13 = vector.load %arg8[%c0_12, %c0_13] : memref<128x512xbf16, #tpu.memory_space<vmem>>, vector<128x512xbf16>
    %cst_14 = arith.constant dense<0.000000e+00> : vector<2x512xf32>
    %14 = tpu.matmul %12, %13, %cst_14 {dimension_numbers = #tpu.dot_dimension_numbers<[1], [0], [0], [1], [0, 0, 1, 1], [], []>} : vector<2x128xbf16>, vector<128x512xbf16>, vector<2x512xf32> -> vector<2x512xf32>
    %15 = vector.extract_strided_slice %5 {offsets = [0, 0], sizes = [2, 512], strides = [1, 1]} : vector<16x512xf32> to vector<2x512xf32>
    %16 = arith.truncf %9 : vector<2x128xf32> to vector<2x128xbf16>
    %c0_15 = arith.constant 0 : index
    %c0_16 = arith.constant 0 : index
    %17 = vector.load %arg5[%c0_15, %c0_16] : memref<128x512xbf16, #tpu.memory_space<vmem>>, vector<128x512xbf16>
    %cst_17 = arith.constant dense<0.000000e+00> : vector<2x512xf32>
    %18 = tpu.matmul %16, %17, %cst_17 {dimension_numbers = #tpu.dot_dimension_numbers<[1], [0], [0], [1], [0, 0, 1, 1], [], []>} : vector<2x128xbf16>, vector<128x512xbf16>, vector<2x512xf32> -> vector<2x512xf32>
    %19 = arith.addf %15, %18 : vector<2x512xf32>
    %20 = arith.negf %19 : vector<2x512xf32>
    %21 = math.exp %20 : vector<2x512xf32>
    %cst_18 = arith.constant 1.000000e+00 : f32
    %22 = vector.broadcast %cst_18 : f32 to vector<2x512xf32>
    %23 = arith.addf %22, %21 : vector<2x512xf32>
    %24 = arith.divf %22, %23 : vector<2x512xf32>
    %25 = vector.extract_strided_slice %24 {offsets = [0, 0], sizes = [2, 128], strides = [1, 1]} : vector<2x512xf32> to vector<2x128xf32>
    %26 = vector.extract_strided_slice %24 {offsets = [0, 128], sizes = [2, 128], strides = [1, 1]} : vector<2x512xf32> to vector<2x128xf32>
    %27 = vector.extract_strided_slice %24 {offsets = [0, 256], sizes = [2, 128], strides = [1, 1]} : vector<2x512xf32> to vector<2x128xf32>
    %cst_19 = arith.constant 2.000000e+00 : f32
    %28 = vector.broadcast %cst_19 : f32 to vector<2x128xf32>
    %29 = arith.mulf %28, %27 : vector<2x128xf32>
    %cst_20 = arith.constant 1.000000e+00 : f32
    %30 = vector.broadcast %cst_20 : f32 to vector<2x128xf32>
    %31 = arith.subf %29, %30 : vector<2x128xf32>
    %32 = vector.extract_strided_slice %24 {offsets = [0, 384], sizes = [2, 128], strides = [1, 1]} : vector<2x512xf32> to vector<2x128xf32>
    %33 = arith.mulf %26, %10 : vector<2x128xf32>
    %34 = arith.mulf %25, %31 : vector<2x128xf32>
    %35 = arith.addf %33, %34 : vector<2x128xf32>
    %36 = math.tanh %35 : vector<2x128xf32>
    %37 = arith.mulf %32, %36 : vector<2x128xf32>
    %38 = arith.truncf %37 : vector<2x128xf32> to vector<2x128xbf16>
    %c0_21 = arith.constant 0 : index
    %c0_22 = arith.constant 0 : index
    %39 = vector.load %arg7[%c0_21, %c0_22] : memref<128x512xbf16, #tpu.memory_space<vmem>>, vector<128x512xbf16>
    %cst_23 = arith.constant dense<0.000000e+00> : vector<2x512xf32>
    %40 = tpu.matmul %38, %39, %cst_23 {dimension_numbers = #tpu.dot_dimension_numbers<[1], [0], [0], [1], [0, 0, 1, 1], [], []>} : vector<2x128xbf16>, vector<128x512xbf16>, vector<2x512xf32> -> vector<2x512xf32>
    %41 = arith.addf %40, %14 : vector<2x512xf32>
    %42 = arith.addf %41, %8 : vector<2x512xf32>
    %43 = arith.negf %42 : vector<2x512xf32>
    %44 = math.exp %43 : vector<2x512xf32>
    %cst_24 = arith.constant 1.000000e+00 : f32
    %45 = vector.broadcast %cst_24 : f32 to vector<2x512xf32>
    %46 = arith.addf %45, %44 : vector<2x512xf32>
    %47 = arith.divf %45, %46 : vector<2x512xf32>
    %48 = vector.extract_strided_slice %47 {offsets = [0, 0], sizes = [2, 128], strides = [1, 1]} : vector<2x512xf32> to vector<2x128xf32>
    %49 = vector.extract_strided_slice %47 {offsets = [0, 128], sizes = [2, 128], strides = [1, 1]} : vector<2x512xf32> to vector<2x128xf32>
    %50 = vector.extract_strided_slice %47 {offsets = [0, 256], sizes = [2, 128], strides = [1, 1]} : vector<2x512xf32> to vector<2x128xf32>
    %cst_25 = arith.constant 2.000000e+00 : f32
    %51 = vector.broadcast %cst_25 : f32 to vector<2x128xf32>
    %52 = arith.mulf %51, %50 : vector<2x128xf32>
    %cst_26 = arith.constant 1.000000e+00 : f32
    %53 = vector.broadcast %cst_26 : f32 to vector<2x128xf32>
    %54 = arith.subf %52, %53 : vector<2x128xf32>
    %55 = vector.extract_strided_slice %47 {offsets = [0, 384], sizes = [2, 128], strides = [1, 1]} : vector<2x512xf32> to vector<2x128xf32>
    %56 = arith.mulf %49, %11 : vector<2x128xf32>
    %57 = arith.mulf %48, %54 : vector<2x128xf32>
    %58 = arith.addf %56, %57 : vector<2x128xf32>
    %59 = math.tanh %58 : vector<2x128xf32>
    %60 = arith.mulf %55, %59 : vector<2x128xf32>
    %61 = arith.truncf %60 : vector<2x128xf32> to vector<2x128xbf16>
    %c0_27 = arith.constant 0 : index
    %c0_28 = arith.constant 0 : index
    %62 = vector.load %arg8[%c0_27, %c0_28] : memref<128x512xbf16, #tpu.memory_space<vmem>>, vector<128x512xbf16>
    %cst_29 = arith.constant dense<0.000000e+00> : vector<2x512xf32>
    %63 = tpu.matmul %61, %62, %cst_29 {dimension_numbers = #tpu.dot_dimension_numbers<[1], [0], [0], [1], [0, 0, 1, 1], [], []>} : vector<2x128xbf16>, vector<128x512xbf16>, vector<2x512xf32> -> vector<2x512xf32>
    %64 = vector.extract_strided_slice %5 {offsets = [2, 0], sizes = [2, 512], strides = [1, 1]} : vector<16x512xf32> to vector<2x512xf32>
    %65 = arith.truncf %37 : vector<2x128xf32> to vector<2x128xbf16>
    %c0_30 = arith.constant 0 : index
    %c0_31 = arith.constant 0 : index
    %66 = vector.load %arg5[%c0_30, %c0_31] : memref<128x512xbf16, #tpu.memory_space<vmem>>, vector<128x512xbf16>
    %cst_32 = arith.constant dense<0.000000e+00> : vector<2x512xf32>
    %67 = tpu.matmul %65, %66, %cst_32 {dimension_numbers = #tpu.dot_dimension_numbers<[1], [0], [0], [1], [0, 0, 1, 1], [], []>} : vector<2x128xbf16>, vector<128x512xbf16>, vector<2x512xf32> -> vector<2x512xf32>
    %68 = arith.addf %64, %67 : vector<2x512xf32>
    %69 = arith.negf %68 : vector<2x512xf32>
    %70 = math.exp %69 : vector<2x512xf32>
    %cst_33 = arith.constant 1.000000e+00 : f32
    %71 = vector.broadcast %cst_33 : f32 to vector<2x512xf32>
    %72 = arith.addf %71, %70 : vector<2x512xf32>
    %73 = arith.divf %71, %72 : vector<2x512xf32>
    %74 = vector.extract_strided_slice %73 {offsets = [0, 0], sizes = [2, 128], strides = [1, 1]} : vector<2x512xf32> to vector<2x128xf32>
    %75 = vector.extract_strided_slice %73 {offsets = [0, 128], sizes = [2, 128], strides = [1, 1]} : vector<2x512xf32> to vector<2x128xf32>
    %76 = vector.extract_strided_slice %73 {offsets = [0, 256], sizes = [2, 128], strides = [1, 1]} : vector<2x512xf32> to vector<2x128xf32>
    %cst_34 = arith.constant 2.000000e+00 : f32
    %77 = vector.broadcast %cst_34 : f32 to vector<2x128xf32>
    %78 = arith.mulf %77, %76 : vector<2x128xf32>
    %cst_35 = arith.constant 1.000000e+00 : f32
    %79 = vector.broadcast %cst_35 : f32 to vector<2x128xf32>
    %80 = arith.subf %78, %79 : vector<2x128xf32>
    %81 = vector.extract_strided_slice %73 {offsets = [0, 384], sizes = [2, 128], strides = [1, 1]} : vector<2x512xf32> to vector<2x128xf32>
    %82 = arith.mulf %75, %35 : vector<2x128xf32>
    %83 = arith.mulf %74, %80 : vector<2x128xf32>
    %84 = arith.addf %82, %83 : vector<2x128xf32>
    %85 = math.tanh %84 : vector<2x128xf32>
    %86 = arith.mulf %81, %85 : vector<2x128xf32>
    %87 = arith.truncf %86 : vector<2x128xf32> to vector<2x128xbf16>
    %c0_36 = arith.constant 0 : index
    %c0_37 = arith.constant 0 : index
    %88 = vector.load %arg7[%c0_36, %c0_37] : memref<128x512xbf16, #tpu.memory_space<vmem>>, vector<128x512xbf16>
    %cst_38 = arith.constant dense<0.000000e+00> : vector<2x512xf32>
    %89 = tpu.matmul %87, %88, %cst_38 {dimension_numbers = #tpu.dot_dimension_numbers<[1], [0], [0], [1], [0, 0, 1, 1], [], []>} : vector<2x128xbf16>, vector<128x512xbf16>, vector<2x512xf32> -> vector<2x512xf32>
    %90 = arith.addf %89, %63 : vector<2x512xf32>
    %91 = arith.addf %90, %8 : vector<2x512xf32>
    %92 = arith.negf %91 : vector<2x512xf32>
    %93 = math.exp %92 : vector<2x512xf32>
    %cst_39 = arith.constant 1.000000e+00 : f32
    %94 = vector.broadcast %cst_39 : f32 to vector<2x512xf32>
    %95 = arith.addf %94, %93 : vector<2x512xf32>
    %96 = arith.divf %94, %95 : vector<2x512xf32>
    %97 = vector.extract_strided_slice %96 {offsets = [0, 0], sizes = [2, 128], strides = [1, 1]} : vector<2x512xf32> to vector<2x128xf32>
    %98 = vector.extract_strided_slice %96 {offsets = [0, 128], sizes = [2, 128], strides = [1, 1]} : vector<2x512xf32> to vector<2x128xf32>
    %99 = vector.extract_strided_slice %96 {offsets = [0, 256], sizes = [2, 128], strides = [1, 1]} : vector<2x512xf32> to vector<2x128xf32>
    %cst_40 = arith.constant 2.000000e+00 : f32
    %100 = vector.broadcast %cst_40 : f32 to vector<2x128xf32>
    %101 = arith.mulf %100, %99 : vector<2x128xf32>
    %cst_41 = arith.constant 1.000000e+00 : f32
    %102 = vector.broadcast %cst_41 : f32 to vector<2x128xf32>
    %103 = arith.subf %101, %102 : vector<2x128xf32>
    %104 = vector.extract_strided_slice %96 {offsets = [0, 384], sizes = [2, 128], strides = [1, 1]} : vector<2x512xf32> to vector<2x128xf32>
    %105 = arith.mulf %98, %58 : vector<2x128xf32>
    %106 = arith.mulf %97, %103 : vector<2x128xf32>
    %107 = arith.addf %105, %106 : vector<2x128xf32>
    %108 = math.tanh %107 : vector<2x128xf32>
    %109 = arith.mulf %104, %108 : vector<2x128xf32>
    %110 = arith.truncf %109 : vector<2x128xf32> to vector<2x128xbf16>
    %c0_42 = arith.constant 0 : index
    %c0_43 = arith.constant 0 : index
    %111 = vector.load %arg8[%c0_42, %c0_43] : memref<128x512xbf16, #tpu.memory_space<vmem>>, vector<128x512xbf16>
    %cst_44 = arith.constant dense<0.000000e+00> : vector<2x512xf32>
    %112 = tpu.matmul %110, %111, %cst_44 {dimension_numbers = #tpu.dot_dimension_numbers<[1], [0], [0], [1], [0, 0, 1, 1], [], []>} : vector<2x128xbf16>, vector<128x512xbf16>, vector<2x512xf32> -> vector<2x512xf32>
    %113 = vector.extract_strided_slice %5 {offsets = [4, 0], sizes = [2, 512], strides = [1, 1]} : vector<16x512xf32> to vector<2x512xf32>
    %114 = arith.truncf %86 : vector<2x128xf32> to vector<2x128xbf16>
    %c0_45 = arith.constant 0 : index
    %c0_46 = arith.constant 0 : index
    %115 = vector.load %arg5[%c0_45, %c0_46] : memref<128x512xbf16, #tpu.memory_space<vmem>>, vector<128x512xbf16>
    %cst_47 = arith.constant dense<0.000000e+00> : vector<2x512xf32>
    %116 = tpu.matmul %114, %115, %cst_47 {dimension_numbers = #tpu.dot_dimension_numbers<[1], [0], [0], [1], [0, 0, 1, 1], [], []>} : vector<2x128xbf16>, vector<128x512xbf16>, vector<2x512xf32> -> vector<2x512xf32>
    %117 = arith.addf %113, %116 : vector<2x512xf32>
    %118 = arith.negf %117 : vector<2x512xf32>
    %119 = math.exp %118 : vector<2x512xf32>
    %cst_48 = arith.constant 1.000000e+00 : f32
    %120 = vector.broadcast %cst_48 : f32 to vector<2x512xf32>
    %121 = arith.addf %120, %119 : vector<2x512xf32>
    %122 = arith.divf %120, %121 : vector<2x512xf32>
    %123 = vector.extract_strided_slice %122 {offsets = [0, 0], sizes = [2, 128], strides = [1, 1]} : vector<2x512xf32> to vector<2x128xf32>
    %124 = vector.extract_strided_slice %122 {offsets = [0, 128], sizes = [2, 128], strides = [1, 1]} : vector<2x512xf32> to vector<2x128xf32>
    %125 = vector.extract_strided_slice %122 {offsets = [0, 256], sizes = [2, 128], strides = [1, 1]} : vector<2x512xf32> to vector<2x128xf32>
    %cst_49 = arith.constant 2.000000e+00 : f32
    %126 = vector.broadcast %cst_49 : f32 to vector<2x128xf32>
    %127 = arith.mulf %126, %125 : vector<2x128xf32>
    %cst_50 = arith.constant 1.000000e+00 : f32
    %128 = vector.broadcast %cst_50 : f32 to vector<2x128xf32>
    %129 = arith.subf %127, %128 : vector<2x128xf32>
    %130 = vector.extract_strided_slice %122 {offsets = [0, 384], sizes = [2, 128], strides = [1, 1]} : vector<2x512xf32> to vector<2x128xf32>
    %131 = arith.mulf %124, %84 : vector<2x128xf32>
    %132 = arith.mulf %123, %129 : vector<2x128xf32>
    %133 = arith.addf %131, %132 : vector<2x128xf32>
    %134 = math.tanh %133 : vector<2x128xf32>
    %135 = arith.mulf %130, %134 : vector<2x128xf32>
    %136 = arith.truncf %135 : vector<2x128xf32> to vector<2x128xbf16>
    %c0_51 = arith.constant 0 : index
    %c0_52 = arith.constant 0 : index
    %137 = vector.load %arg7[%c0_51, %c0_52] : memref<128x512xbf16, #tpu.memory_space<vmem>>, vector<128x512xbf16>
    %cst_53 = arith.constant dense<0.000000e+00> : vector<2x512xf32>
    %138 = tpu.matmul %136, %137, %cst_53 {dimension_numbers = #tpu.dot_dimension_numbers<[1], [0], [0], [1], [0, 0, 1, 1], [], []>} : vector<2x128xbf16>, vector<128x512xbf16>, vector<2x512xf32> -> vector<2x512xf32>
    %139 = arith.addf %138, %112 : vector<2x512xf32>
    %140 = arith.addf %139, %8 : vector<2x512xf32>
    %141 = arith.negf %140 : vector<2x512xf32>
    %142 = math.exp %141 : vector<2x512xf32>
    %cst_54 = arith.constant 1.000000e+00 : f32
    %143 = vector.broadcast %cst_54 : f32 to vector<2x512xf32>
    %144 = arith.addf %143, %142 : vector<2x512xf32>
    %145 = arith.divf %143, %144 : vector<2x512xf32>
    %146 = vector.extract_strided_slice %145 {offsets = [0, 0], sizes = [2, 128], strides = [1, 1]} : vector<2x512xf32> to vector<2x128xf32>
    %147 = vector.extract_strided_slice %145 {offsets = [0, 128], sizes = [2, 128], strides = [1, 1]} : vector<2x512xf32> to vector<2x128xf32>
    %148 = vector.extract_strided_slice %145 {offsets = [0, 256], sizes = [2, 128], strides = [1, 1]} : vector<2x512xf32> to vector<2x128xf32>
    %cst_55 = arith.constant 2.000000e+00 : f32
    %149 = vector.broadcast %cst_55 : f32 to vector<2x128xf32>
    %150 = arith.mulf %149, %148 : vector<2x128xf32>
    %cst_56 = arith.constant 1.000000e+00 : f32
    %151 = vector.broadcast %cst_56 : f32 to vector<2x128xf32>
    %152 = arith.subf %150, %151 : vector<2x128xf32>
    %153 = vector.extract_strided_slice %145 {offsets = [0, 384], sizes = [2, 128], strides = [1, 1]} : vector<2x512xf32> to vector<2x128xf32>
    %154 = arith.mulf %147, %107 : vector<2x128xf32>
    %155 = arith.mulf %146, %152 : vector<2x128xf32>
    %156 = arith.addf %154, %155 : vector<2x128xf32>
    %157 = math.tanh %156 : vector<2x128xf32>
    %158 = arith.mulf %153, %157 : vector<2x128xf32>
    %159 = arith.truncf %158 : vector<2x128xf32> to vector<2x128xbf16>
    %c0_57 = arith.constant 0 : index
    %c0_58 = arith.constant 0 : index
    %160 = vector.load %arg8[%c0_57, %c0_58] : memref<128x512xbf16, #tpu.memory_space<vmem>>, vector<128x512xbf16>
    %cst_59 = arith.constant dense<0.000000e+00> : vector<2x512xf32>
    %161 = tpu.matmul %159, %160, %cst_59 {dimension_numbers = #tpu.dot_dimension_numbers<[1], [0], [0], [1], [0, 0, 1, 1], [], []>} : vector<2x128xbf16>, vector<128x512xbf16>, vector<2x512xf32> -> vector<2x512xf32>
    %162 = vector.extract_strided_slice %5 {offsets = [6, 0], sizes = [2, 512], strides = [1, 1]} : vector<16x512xf32> to vector<2x512xf32>
    %163 = arith.truncf %135 : vector<2x128xf32> to vector<2x128xbf16>
    %c0_60 = arith.constant 0 : index
    %c0_61 = arith.constant 0 : index
    %164 = vector.load %arg5[%c0_60, %c0_61] : memref<128x512xbf16, #tpu.memory_space<vmem>>, vector<128x512xbf16>
    %cst_62 = arith.constant dense<0.000000e+00> : vector<2x512xf32>
    %165 = tpu.matmul %163, %164, %cst_62 {dimension_numbers = #tpu.dot_dimension_numbers<[1], [0], [0], [1], [0, 0, 1, 1], [], []>} : vector<2x128xbf16>, vector<128x512xbf16>, vector<2x512xf32> -> vector<2x512xf32>
    %166 = arith.addf %162, %165 : vector<2x512xf32>
    %167 = arith.negf %166 : vector<2x512xf32>
    %168 = math.exp %167 : vector<2x512xf32>
    %cst_63 = arith.constant 1.000000e+00 : f32
    %169 = vector.broadcast %cst_63 : f32 to vector<2x512xf32>
    %170 = arith.addf %169, %168 : vector<2x512xf32>
    %171 = arith.divf %169, %170 : vector<2x512xf32>
    %172 = vector.extract_strided_slice %171 {offsets = [0, 0], sizes = [2, 128], strides = [1, 1]} : vector<2x512xf32> to vector<2x128xf32>
    %173 = vector.extract_strided_slice %171 {offsets = [0, 128], sizes = [2, 128], strides = [1, 1]} : vector<2x512xf32> to vector<2x128xf32>
    %174 = vector.extract_strided_slice %171 {offsets = [0, 256], sizes = [2, 128], strides = [1, 1]} : vector<2x512xf32> to vector<2x128xf32>
    %cst_64 = arith.constant 2.000000e+00 : f32
    %175 = vector.broadcast %cst_64 : f32 to vector<2x128xf32>
    %176 = arith.mulf %175, %174 : vector<2x128xf32>
    %cst_65 = arith.constant 1.000000e+00 : f32
    %177 = vector.broadcast %cst_65 : f32 to vector<2x128xf32>
    %178 = arith.subf %176, %177 : vector<2x128xf32>
    %179 = vector.extract_strided_slice %171 {offsets = [0, 384], sizes = [2, 128], strides = [1, 1]} : vector<2x512xf32> to vector<2x128xf32>
    %180 = arith.mulf %173, %133 : vector<2x128xf32>
    %181 = arith.mulf %172, %178 : vector<2x128xf32>
    %182 = arith.addf %180, %181 : vector<2x128xf32>
    %183 = math.tanh %182 : vector<2x128xf32>
    %184 = arith.mulf %179, %183 : vector<2x128xf32>
    %185 = arith.truncf %184 : vector<2x128xf32> to vector<2x128xbf16>
    %c0_66 = arith.constant 0 : index
    %c0_67 = arith.constant 0 : index
    %186 = vector.load %arg7[%c0_66, %c0_67] : memref<128x512xbf16, #tpu.memory_space<vmem>>, vector<128x512xbf16>
    %cst_68 = arith.constant dense<0.000000e+00> : vector<2x512xf32>
    %187 = tpu.matmul %185, %186, %cst_68 {dimension_numbers = #tpu.dot_dimension_numbers<[1], [0], [0], [1], [0, 0, 1, 1], [], []>} : vector<2x128xbf16>, vector<128x512xbf16>, vector<2x512xf32> -> vector<2x512xf32>
    %188 = arith.addf %187, %161 : vector<2x512xf32>
    %189 = arith.addf %188, %8 : vector<2x512xf32>
    %190 = arith.negf %189 : vector<2x512xf32>
    %191 = math.exp %190 : vector<2x512xf32>
    %cst_69 = arith.constant 1.000000e+00 : f32
    %192 = vector.broadcast %cst_69 : f32 to vector<2x512xf32>
    %193 = arith.addf %192, %191 : vector<2x512xf32>
    %194 = arith.divf %192, %193 : vector<2x512xf32>
    %195 = vector.extract_strided_slice %194 {offsets = [0, 0], sizes = [2, 128], strides = [1, 1]} : vector<2x512xf32> to vector<2x128xf32>
    %196 = vector.extract_strided_slice %194 {offsets = [0, 128], sizes = [2, 128], strides = [1, 1]} : vector<2x512xf32> to vector<2x128xf32>
    %197 = vector.extract_strided_slice %194 {offsets = [0, 256], sizes = [2, 128], strides = [1, 1]} : vector<2x512xf32> to vector<2x128xf32>
    %cst_70 = arith.constant 2.000000e+00 : f32
    %198 = vector.broadcast %cst_70 : f32 to vector<2x128xf32>
    %199 = arith.mulf %198, %197 : vector<2x128xf32>
    %cst_71 = arith.constant 1.000000e+00 : f32
    %200 = vector.broadcast %cst_71 : f32 to vector<2x128xf32>
    %201 = arith.subf %199, %200 : vector<2x128xf32>
    %202 = vector.extract_strided_slice %194 {offsets = [0, 384], sizes = [2, 128], strides = [1, 1]} : vector<2x512xf32> to vector<2x128xf32>
    %203 = arith.mulf %196, %156 : vector<2x128xf32>
    %204 = arith.mulf %195, %201 : vector<2x128xf32>
    %205 = arith.addf %203, %204 : vector<2x128xf32>
    %206 = math.tanh %205 : vector<2x128xf32>
    %207 = arith.mulf %202, %206 : vector<2x128xf32>
    %208 = arith.truncf %207 : vector<2x128xf32> to vector<2x128xbf16>
    %c0_72 = arith.constant 0 : index
    %c0_73 = arith.constant 0 : index
    %209 = vector.load %arg8[%c0_72, %c0_73] : memref<128x512xbf16, #tpu.memory_space<vmem>>, vector<128x512xbf16>
    %cst_74 = arith.constant dense<0.000000e+00> : vector<2x512xf32>
    %210 = tpu.matmul %208, %209, %cst_74 {dimension_numbers = #tpu.dot_dimension_numbers<[1], [0], [0], [1], [0, 0, 1, 1], [], []>} : vector<2x128xbf16>, vector<128x512xbf16>, vector<2x512xf32> -> vector<2x512xf32>
    %211 = vector.extract_strided_slice %5 {offsets = [8, 0], sizes = [2, 512], strides = [1, 1]} : vector<16x512xf32> to vector<2x512xf32>
    %212 = arith.truncf %184 : vector<2x128xf32> to vector<2x128xbf16>
    %c0_75 = arith.constant 0 : index
    %c0_76 = arith.constant 0 : index
    %213 = vector.load %arg5[%c0_75, %c0_76] : memref<128x512xbf16, #tpu.memory_space<vmem>>, vector<128x512xbf16>
    %cst_77 = arith.constant dense<0.000000e+00> : vector<2x512xf32>
    %214 = tpu.matmul %212, %213, %cst_77 {dimension_numbers = #tpu.dot_dimension_numbers<[1], [0], [0], [1], [0, 0, 1, 1], [], []>} : vector<2x128xbf16>, vector<128x512xbf16>, vector<2x512xf32> -> vector<2x512xf32>
    %215 = arith.addf %211, %214 : vector<2x512xf32>
    %216 = arith.negf %215 : vector<2x512xf32>
    %217 = math.exp %216 : vector<2x512xf32>
    %cst_78 = arith.constant 1.000000e+00 : f32
    %218 = vector.broadcast %cst_78 : f32 to vector<2x512xf32>
    %219 = arith.addf %218, %217 : vector<2x512xf32>
    %220 = arith.divf %218, %219 : vector<2x512xf32>
    %221 = vector.extract_strided_slice %220 {offsets = [0, 0], sizes = [2, 128], strides = [1, 1]} : vector<2x512xf32> to vector<2x128xf32>
    %222 = vector.extract_strided_slice %220 {offsets = [0, 128], sizes = [2, 128], strides = [1, 1]} : vector<2x512xf32> to vector<2x128xf32>
    %223 = vector.extract_strided_slice %220 {offsets = [0, 256], sizes = [2, 128], strides = [1, 1]} : vector<2x512xf32> to vector<2x128xf32>
    %cst_79 = arith.constant 2.000000e+00 : f32
    %224 = vector.broadcast %cst_79 : f32 to vector<2x128xf32>
    %225 = arith.mulf %224, %223 : vector<2x128xf32>
    %cst_80 = arith.constant 1.000000e+00 : f32
    %226 = vector.broadcast %cst_80 : f32 to vector<2x128xf32>
    %227 = arith.subf %225, %226 : vector<2x128xf32>
    %228 = vector.extract_strided_slice %220 {offsets = [0, 384], sizes = [2, 128], strides = [1, 1]} : vector<2x512xf32> to vector<2x128xf32>
    %229 = arith.mulf %222, %182 : vector<2x128xf32>
    %230 = arith.mulf %221, %227 : vector<2x128xf32>
    %231 = arith.addf %229, %230 : vector<2x128xf32>
    %232 = math.tanh %231 : vector<2x128xf32>
    %233 = arith.mulf %228, %232 : vector<2x128xf32>
    %234 = arith.truncf %233 : vector<2x128xf32> to vector<2x128xbf16>
    %c0_81 = arith.constant 0 : index
    %c0_82 = arith.constant 0 : index
    %235 = vector.load %arg7[%c0_81, %c0_82] : memref<128x512xbf16, #tpu.memory_space<vmem>>, vector<128x512xbf16>
    %cst_83 = arith.constant dense<0.000000e+00> : vector<2x512xf32>
    %236 = tpu.matmul %234, %235, %cst_83 {dimension_numbers = #tpu.dot_dimension_numbers<[1], [0], [0], [1], [0, 0, 1, 1], [], []>} : vector<2x128xbf16>, vector<128x512xbf16>, vector<2x512xf32> -> vector<2x512xf32>
    %237 = arith.addf %236, %210 : vector<2x512xf32>
    %238 = arith.addf %237, %8 : vector<2x512xf32>
    %239 = arith.negf %238 : vector<2x512xf32>
    %240 = math.exp %239 : vector<2x512xf32>
    %cst_84 = arith.constant 1.000000e+00 : f32
    %241 = vector.broadcast %cst_84 : f32 to vector<2x512xf32>
    %242 = arith.addf %241, %240 : vector<2x512xf32>
    %243 = arith.divf %241, %242 : vector<2x512xf32>
    %244 = vector.extract_strided_slice %243 {offsets = [0, 0], sizes = [2, 128], strides = [1, 1]} : vector<2x512xf32> to vector<2x128xf32>
    %245 = vector.extract_strided_slice %243 {offsets = [0, 128], sizes = [2, 128], strides = [1, 1]} : vector<2x512xf32> to vector<2x128xf32>
    %246 = vector.extract_strided_slice %243 {offsets = [0, 256], sizes = [2, 128], strides = [1, 1]} : vector<2x512xf32> to vector<2x128xf32>
    %cst_85 = arith.constant 2.000000e+00 : f32
    %247 = vector.broadcast %cst_85 : f32 to vector<2x128xf32>
    %248 = arith.mulf %247, %246 : vector<2x128xf32>
    %cst_86 = arith.constant 1.000000e+00 : f32
    %249 = vector.broadcast %cst_86 : f32 to vector<2x128xf32>
    %250 = arith.subf %248, %249 : vector<2x128xf32>
    %251 = vector.extract_strided_slice %243 {offsets = [0, 384], sizes = [2, 128], strides = [1, 1]} : vector<2x512xf32> to vector<2x128xf32>
    %252 = arith.mulf %245, %205 : vector<2x128xf32>
    %253 = arith.mulf %244, %250 : vector<2x128xf32>
    %254 = arith.addf %252, %253 : vector<2x128xf32>
    %255 = math.tanh %254 : vector<2x128xf32>
    %256 = arith.mulf %251, %255 : vector<2x128xf32>
    %257 = arith.truncf %256 : vector<2x128xf32> to vector<2x128xbf16>
    %c0_87 = arith.constant 0 : index
    %c0_88 = arith.constant 0 : index
    %258 = vector.load %arg8[%c0_87, %c0_88] : memref<128x512xbf16, #tpu.memory_space<vmem>>, vector<128x512xbf16>
    %cst_89 = arith.constant dense<0.000000e+00> : vector<2x512xf32>
    %259 = tpu.matmul %257, %258, %cst_89 {dimension_numbers = #tpu.dot_dimension_numbers<[1], [0], [0], [1], [0, 0, 1, 1], [], []>} : vector<2x128xbf16>, vector<128x512xbf16>, vector<2x512xf32> -> vector<2x512xf32>
    %260 = vector.extract_strided_slice %5 {offsets = [10, 0], sizes = [2, 512], strides = [1, 1]} : vector<16x512xf32> to vector<2x512xf32>
    %261 = arith.truncf %233 : vector<2x128xf32> to vector<2x128xbf16>
    %c0_90 = arith.constant 0 : index
    %c0_91 = arith.constant 0 : index
    %262 = vector.load %arg5[%c0_90, %c0_91] : memref<128x512xbf16, #tpu.memory_space<vmem>>, vector<128x512xbf16>
    %cst_92 = arith.constant dense<0.000000e+00> : vector<2x512xf32>
    %263 = tpu.matmul %261, %262, %cst_92 {dimension_numbers = #tpu.dot_dimension_numbers<[1], [0], [0], [1], [0, 0, 1, 1], [], []>} : vector<2x128xbf16>, vector<128x512xbf16>, vector<2x512xf32> -> vector<2x512xf32>
    %264 = arith.addf %260, %263 : vector<2x512xf32>
    %265 = arith.negf %264 : vector<2x512xf32>
    %266 = math.exp %265 : vector<2x512xf32>
    %cst_93 = arith.constant 1.000000e+00 : f32
    %267 = vector.broadcast %cst_93 : f32 to vector<2x512xf32>
    %268 = arith.addf %267, %266 : vector<2x512xf32>
    %269 = arith.divf %267, %268 : vector<2x512xf32>
    %270 = vector.extract_strided_slice %269 {offsets = [0, 0], sizes = [2, 128], strides = [1, 1]} : vector<2x512xf32> to vector<2x128xf32>
    %271 = vector.extract_strided_slice %269 {offsets = [0, 128], sizes = [2, 128], strides = [1, 1]} : vector<2x512xf32> to vector<2x128xf32>
    %272 = vector.extract_strided_slice %269 {offsets = [0, 256], sizes = [2, 128], strides = [1, 1]} : vector<2x512xf32> to vector<2x128xf32>
    %cst_94 = arith.constant 2.000000e+00 : f32
    %273 = vector.broadcast %cst_94 : f32 to vector<2x128xf32>
    %274 = arith.mulf %273, %272 : vector<2x128xf32>
    %cst_95 = arith.constant 1.000000e+00 : f32
    %275 = vector.broadcast %cst_95 : f32 to vector<2x128xf32>
    %276 = arith.subf %274, %275 : vector<2x128xf32>
    %277 = vector.extract_strided_slice %269 {offsets = [0, 384], sizes = [2, 128], strides = [1, 1]} : vector<2x512xf32> to vector<2x128xf32>
    %278 = arith.mulf %271, %231 : vector<2x128xf32>
    %279 = arith.mulf %270, %276 : vector<2x128xf32>
    %280 = arith.addf %278, %279 : vector<2x128xf32>
    %281 = math.tanh %280 : vector<2x128xf32>
    %282 = arith.mulf %277, %281 : vector<2x128xf32>
    %283 = arith.truncf %282 : vector<2x128xf32> to vector<2x128xbf16>
    %c0_96 = arith.constant 0 : index
    %c0_97 = arith.constant 0 : index
    %284 = vector.load %arg7[%c0_96, %c0_97] : memref<128x512xbf16, #tpu.memory_space<vmem>>, vector<128x512xbf16>
    %cst_98 = arith.constant dense<0.000000e+00> : vector<2x512xf32>
    %285 = tpu.matmul %283, %284, %cst_98 {dimension_numbers = #tpu.dot_dimension_numbers<[1], [0], [0], [1], [0, 0, 1, 1], [], []>} : vector<2x128xbf16>, vector<128x512xbf16>, vector<2x512xf32> -> vector<2x512xf32>
    %286 = arith.addf %285, %259 : vector<2x512xf32>
    %287 = arith.addf %286, %8 : vector<2x512xf32>
    %288 = arith.negf %287 : vector<2x512xf32>
    %289 = math.exp %288 : vector<2x512xf32>
    %cst_99 = arith.constant 1.000000e+00 : f32
    %290 = vector.broadcast %cst_99 : f32 to vector<2x512xf32>
    %291 = arith.addf %290, %289 : vector<2x512xf32>
    %292 = arith.divf %290, %291 : vector<2x512xf32>
    %293 = vector.extract_strided_slice %292 {offsets = [0, 0], sizes = [2, 128], strides = [1, 1]} : vector<2x512xf32> to vector<2x128xf32>
    %294 = vector.extract_strided_slice %292 {offsets = [0, 128], sizes = [2, 128], strides = [1, 1]} : vector<2x512xf32> to vector<2x128xf32>
    %295 = vector.extract_strided_slice %292 {offsets = [0, 256], sizes = [2, 128], strides = [1, 1]} : vector<2x512xf32> to vector<2x128xf32>
    %cst_100 = arith.constant 2.000000e+00 : f32
    %296 = vector.broadcast %cst_100 : f32 to vector<2x128xf32>
    %297 = arith.mulf %296, %295 : vector<2x128xf32>
    %cst_101 = arith.constant 1.000000e+00 : f32
    %298 = vector.broadcast %cst_101 : f32 to vector<2x128xf32>
    %299 = arith.subf %297, %298 : vector<2x128xf32>
    %300 = vector.extract_strided_slice %292 {offsets = [0, 384], sizes = [2, 128], strides = [1, 1]} : vector<2x512xf32> to vector<2x128xf32>
    %301 = arith.mulf %294, %254 : vector<2x128xf32>
    %302 = arith.mulf %293, %299 : vector<2x128xf32>
    %303 = arith.addf %301, %302 : vector<2x128xf32>
    %304 = math.tanh %303 : vector<2x128xf32>
    %305 = arith.mulf %300, %304 : vector<2x128xf32>
    %306 = arith.truncf %305 : vector<2x128xf32> to vector<2x128xbf16>
    %c0_102 = arith.constant 0 : index
    %c0_103 = arith.constant 0 : index
    %307 = vector.load %arg8[%c0_102, %c0_103] : memref<128x512xbf16, #tpu.memory_space<vmem>>, vector<128x512xbf16>
    %cst_104 = arith.constant dense<0.000000e+00> : vector<2x512xf32>
    %308 = tpu.matmul %306, %307, %cst_104 {dimension_numbers = #tpu.dot_dimension_numbers<[1], [0], [0], [1], [0, 0, 1, 1], [], []>} : vector<2x128xbf16>, vector<128x512xbf16>, vector<2x512xf32> -> vector<2x512xf32>
    %309 = vector.extract_strided_slice %5 {offsets = [12, 0], sizes = [2, 512], strides = [1, 1]} : vector<16x512xf32> to vector<2x512xf32>
    %310 = arith.truncf %282 : vector<2x128xf32> to vector<2x128xbf16>
    %c0_105 = arith.constant 0 : index
    %c0_106 = arith.constant 0 : index
    %311 = vector.load %arg5[%c0_105, %c0_106] : memref<128x512xbf16, #tpu.memory_space<vmem>>, vector<128x512xbf16>
    %cst_107 = arith.constant dense<0.000000e+00> : vector<2x512xf32>
    %312 = tpu.matmul %310, %311, %cst_107 {dimension_numbers = #tpu.dot_dimension_numbers<[1], [0], [0], [1], [0, 0, 1, 1], [], []>} : vector<2x128xbf16>, vector<128x512xbf16>, vector<2x512xf32> -> vector<2x512xf32>
    %313 = arith.addf %309, %312 : vector<2x512xf32>
    %314 = arith.negf %313 : vector<2x512xf32>
    %315 = math.exp %314 : vector<2x512xf32>
    %cst_108 = arith.constant 1.000000e+00 : f32
    %316 = vector.broadcast %cst_108 : f32 to vector<2x512xf32>
    %317 = arith.addf %316, %315 : vector<2x512xf32>
    %318 = arith.divf %316, %317 : vector<2x512xf32>
    %319 = vector.extract_strided_slice %318 {offsets = [0, 0], sizes = [2, 128], strides = [1, 1]} : vector<2x512xf32> to vector<2x128xf32>
    %320 = vector.extract_strided_slice %318 {offsets = [0, 128], sizes = [2, 128], strides = [1, 1]} : vector<2x512xf32> to vector<2x128xf32>
    %321 = vector.extract_strided_slice %318 {offsets = [0, 256], sizes = [2, 128], strides = [1, 1]} : vector<2x512xf32> to vector<2x128xf32>
    %cst_109 = arith.constant 2.000000e+00 : f32
    %322 = vector.broadcast %cst_109 : f32 to vector<2x128xf32>
    %323 = arith.mulf %322, %321 : vector<2x128xf32>
    %cst_110 = arith.constant 1.000000e+00 : f32
    %324 = vector.broadcast %cst_110 : f32 to vector<2x128xf32>
    %325 = arith.subf %323, %324 : vector<2x128xf32>
    %326 = vector.extract_strided_slice %318 {offsets = [0, 384], sizes = [2, 128], strides = [1, 1]} : vector<2x512xf32> to vector<2x128xf32>
    %327 = arith.mulf %320, %280 : vector<2x128xf32>
    %328 = arith.mulf %319, %325 : vector<2x128xf32>
    %329 = arith.addf %327, %328 : vector<2x128xf32>
    %330 = math.tanh %329 : vector<2x128xf32>
    %331 = arith.mulf %326, %330 : vector<2x128xf32>
    %332 = arith.truncf %331 : vector<2x128xf32> to vector<2x128xbf16>
    %c0_111 = arith.constant 0 : index
    %c0_112 = arith.constant 0 : index
    %333 = vector.load %arg7[%c0_111, %c0_112] : memref<128x512xbf16, #tpu.memory_space<vmem>>, vector<128x512xbf16>
    %cst_113 = arith.constant dense<0.000000e+00> : vector<2x512xf32>
    %334 = tpu.matmul %332, %333, %cst_113 {dimension_numbers = #tpu.dot_dimension_numbers<[1], [0], [0], [1], [0, 0, 1, 1], [], []>} : vector<2x128xbf16>, vector<128x512xbf16>, vector<2x512xf32> -> vector<2x512xf32>
    %335 = arith.addf %334, %308 : vector<2x512xf32>
    %336 = arith.addf %335, %8 : vector<2x512xf32>
    %337 = arith.negf %336 : vector<2x512xf32>
    %338 = math.exp %337 : vector<2x512xf32>
    %cst_114 = arith.constant 1.000000e+00 : f32
    %339 = vector.broadcast %cst_114 : f32 to vector<2x512xf32>
    %340 = arith.addf %339, %338 : vector<2x512xf32>
    %341 = arith.divf %339, %340 : vector<2x512xf32>
    %342 = vector.extract_strided_slice %341 {offsets = [0, 0], sizes = [2, 128], strides = [1, 1]} : vector<2x512xf32> to vector<2x128xf32>
    %343 = vector.extract_strided_slice %341 {offsets = [0, 128], sizes = [2, 128], strides = [1, 1]} : vector<2x512xf32> to vector<2x128xf32>
    %344 = vector.extract_strided_slice %341 {offsets = [0, 256], sizes = [2, 128], strides = [1, 1]} : vector<2x512xf32> to vector<2x128xf32>
    %cst_115 = arith.constant 2.000000e+00 : f32
    %345 = vector.broadcast %cst_115 : f32 to vector<2x128xf32>
    %346 = arith.mulf %345, %344 : vector<2x128xf32>
    %cst_116 = arith.constant 1.000000e+00 : f32
    %347 = vector.broadcast %cst_116 : f32 to vector<2x128xf32>
    %348 = arith.subf %346, %347 : vector<2x128xf32>
    %349 = vector.extract_strided_slice %341 {offsets = [0, 384], sizes = [2, 128], strides = [1, 1]} : vector<2x512xf32> to vector<2x128xf32>
    %350 = arith.mulf %343, %303 : vector<2x128xf32>
    %351 = arith.mulf %342, %348 : vector<2x128xf32>
    %352 = arith.addf %350, %351 : vector<2x128xf32>
    %353 = math.tanh %352 : vector<2x128xf32>
    %354 = arith.mulf %349, %353 : vector<2x128xf32>
    %355 = arith.truncf %354 : vector<2x128xf32> to vector<2x128xbf16>
    %c0_117 = arith.constant 0 : index
    %c0_118 = arith.constant 0 : index
    %356 = vector.load %arg8[%c0_117, %c0_118] : memref<128x512xbf16, #tpu.memory_space<vmem>>, vector<128x512xbf16>
    %cst_119 = arith.constant dense<0.000000e+00> : vector<2x512xf32>
    %357 = tpu.matmul %355, %356, %cst_119 {dimension_numbers = #tpu.dot_dimension_numbers<[1], [0], [0], [1], [0, 0, 1, 1], [], []>} : vector<2x128xbf16>, vector<128x512xbf16>, vector<2x512xf32> -> vector<2x512xf32>
    %358 = vector.extract_strided_slice %5 {offsets = [14, 0], sizes = [2, 512], strides = [1, 1]} : vector<16x512xf32> to vector<2x512xf32>
    %359 = arith.truncf %331 : vector<2x128xf32> to vector<2x128xbf16>
    %c0_120 = arith.constant 0 : index
    %c0_121 = arith.constant 0 : index
    %360 = vector.load %arg5[%c0_120, %c0_121] : memref<128x512xbf16, #tpu.memory_space<vmem>>, vector<128x512xbf16>
    %cst_122 = arith.constant dense<0.000000e+00> : vector<2x512xf32>
    %361 = tpu.matmul %359, %360, %cst_122 {dimension_numbers = #tpu.dot_dimension_numbers<[1], [0], [0], [1], [0, 0, 1, 1], [], []>} : vector<2x128xbf16>, vector<128x512xbf16>, vector<2x512xf32> -> vector<2x512xf32>
    %362 = arith.addf %358, %361 : vector<2x512xf32>
    %363 = arith.negf %362 : vector<2x512xf32>
    %364 = math.exp %363 : vector<2x512xf32>
    %cst_123 = arith.constant 1.000000e+00 : f32
    %365 = vector.broadcast %cst_123 : f32 to vector<2x512xf32>
    %366 = arith.addf %365, %364 : vector<2x512xf32>
    %367 = arith.divf %365, %366 : vector<2x512xf32>
    %368 = vector.extract_strided_slice %367 {offsets = [0, 0], sizes = [2, 128], strides = [1, 1]} : vector<2x512xf32> to vector<2x128xf32>
    %369 = vector.extract_strided_slice %367 {offsets = [0, 128], sizes = [2, 128], strides = [1, 1]} : vector<2x512xf32> to vector<2x128xf32>
    %370 = vector.extract_strided_slice %367 {offsets = [0, 256], sizes = [2, 128], strides = [1, 1]} : vector<2x512xf32> to vector<2x128xf32>
    %cst_124 = arith.constant 2.000000e+00 : f32
    %371 = vector.broadcast %cst_124 : f32 to vector<2x128xf32>
    %372 = arith.mulf %371, %370 : vector<2x128xf32>
    %cst_125 = arith.constant 1.000000e+00 : f32
    %373 = vector.broadcast %cst_125 : f32 to vector<2x128xf32>
    %374 = arith.subf %372, %373 : vector<2x128xf32>
    %375 = vector.extract_strided_slice %367 {offsets = [0, 384], sizes = [2, 128], strides = [1, 1]} : vector<2x512xf32> to vector<2x128xf32>
    %376 = arith.mulf %369, %329 : vector<2x128xf32>
    %377 = arith.mulf %368, %374 : vector<2x128xf32>
    %378 = arith.addf %376, %377 : vector<2x128xf32>
    %379 = math.tanh %378 : vector<2x128xf32>
    %380 = arith.mulf %375, %379 : vector<2x128xf32>
    %381 = arith.truncf %380 : vector<2x128xf32> to vector<2x128xbf16>
    %c0_126 = arith.constant 0 : index
    %c0_127 = arith.constant 0 : index
    %382 = vector.load %arg7[%c0_126, %c0_127] : memref<128x512xbf16, #tpu.memory_space<vmem>>, vector<128x512xbf16>
    %cst_128 = arith.constant dense<0.000000e+00> : vector<2x512xf32>
    %383 = tpu.matmul %381, %382, %cst_128 {dimension_numbers = #tpu.dot_dimension_numbers<[1], [0], [0], [1], [0, 0, 1, 1], [], []>} : vector<2x128xbf16>, vector<128x512xbf16>, vector<2x512xf32> -> vector<2x512xf32>
    %384 = arith.addf %383, %357 : vector<2x512xf32>
    %385 = arith.addf %384, %8 : vector<2x512xf32>
    %386 = arith.negf %385 : vector<2x512xf32>
    %387 = math.exp %386 : vector<2x512xf32>
    %cst_129 = arith.constant 1.000000e+00 : f32
    %388 = vector.broadcast %cst_129 : f32 to vector<2x512xf32>
    %389 = arith.addf %388, %387 : vector<2x512xf32>
    %390 = arith.divf %388, %389 : vector<2x512xf32>
    %391 = vector.extract_strided_slice %390 {offsets = [0, 0], sizes = [2, 128], strides = [1, 1]} : vector<2x512xf32> to vector<2x128xf32>
    %392 = vector.extract_strided_slice %390 {offsets = [0, 128], sizes = [2, 128], strides = [1, 1]} : vector<2x512xf32> to vector<2x128xf32>
    %393 = vector.extract_strided_slice %390 {offsets = [0, 256], sizes = [2, 128], strides = [1, 1]} : vector<2x512xf32> to vector<2x128xf32>
    %cst_130 = arith.constant 2.000000e+00 : f32
    %394 = vector.broadcast %cst_130 : f32 to vector<2x128xf32>
    %395 = arith.mulf %394, %393 : vector<2x128xf32>
    %cst_131 = arith.constant 1.000000e+00 : f32
    %396 = vector.broadcast %cst_131 : f32 to vector<2x128xf32>
    %397 = arith.subf %395, %396 : vector<2x128xf32>
    %398 = vector.extract_strided_slice %390 {offsets = [0, 384], sizes = [2, 128], strides = [1, 1]} : vector<2x512xf32> to vector<2x128xf32>
    %399 = arith.mulf %392, %352 : vector<2x128xf32>
    %400 = arith.mulf %391, %397 : vector<2x128xf32>
    %401 = arith.addf %399, %400 : vector<2x128xf32>
    %402 = math.tanh %401 : vector<2x128xf32>
    %403 = arith.mulf %398, %402 : vector<2x128xf32>
    %404 = arith.truncf %403 : vector<2x128xf32> to vector<2x128xbf16>
    %c0_132 = arith.constant 0 : index
    %c0_133 = arith.constant 0 : index
    %405 = vector.load %arg10[%c0_132, %c0_133] : memref<128x32xbf16, #tpu.memory_space<vmem>>, vector<128x32xbf16>
    %cst_134 = arith.constant dense<0.000000e+00> : vector<2x32xf32>
    %406 = tpu.matmul %404, %405, %cst_134 {dimension_numbers = #tpu.dot_dimension_numbers<[1], [0], [0], [1], [0, 0, 1, 1], [], []>} : vector<2x128xbf16>, vector<128x32xbf16>, vector<2x32xf32> -> vector<2x32xf32>
    %c0_135 = arith.constant 0 : index
    %c0_136 = arith.constant 0 : index
    %407 = vector.load %arg1[%c0_135, %c0_136] : memref<2x3xbf16, #tpu.memory_space<vmem>>, vector<2x3xbf16>
    %c0_137 = arith.constant 0 : index
    %c0_138 = arith.constant 0 : index
    %408 = vector.load %arg11[%c0_137, %c0_138] : memref<3x32xbf16, #tpu.memory_space<vmem>>, vector<3x32xbf16>
    %cst_139 = arith.constant dense<0.000000e+00> : vector<2x32xf32>
    %409 = tpu.matmul %407, %408, %cst_139 {dimension_numbers = #tpu.dot_dimension_numbers<[1], [0], [0], [1], [0, 0, 1, 1], [], []>} : vector<2x3xbf16>, vector<3x32xbf16>, vector<2x32xf32> -> vector<2x32xf32>
    %410 = arith.addf %406, %409 : vector<2x32xf32>
    %c0_140 = arith.constant 0 : index
    %c0_141 = arith.constant 0 : index
    %411 = vector.load %arg12[%c0_140, %c0_141] : memref<1x32xf32, #tpu.memory_space<vmem>>, vector<1x32xf32>
    %412 = vector.broadcast %411 : vector<1x32xf32> to vector<2x32xf32>
    %413 = arith.addf %410, %412 : vector<2x32xf32>
    %cst_142 = arith.constant 0.000000e+00 : f32
    %414 = vector.broadcast %cst_142 : f32 to vector<2x32xf32>
    %415 = arith.maximumf %413, %414 : vector<2x32xf32>
    %416 = arith.truncf %415 : vector<2x32xf32> to vector<2x32xbf16>
    %c0_143 = arith.constant 0 : index
    %c0_144 = arith.constant 0 : index
    %417 = vector.load %arg13[%c0_143, %c0_144] : memref<32x2xbf16, #tpu.memory_space<vmem>>, vector<32x2xbf16>
    %cst_145 = arith.constant dense<0.000000e+00> : vector<2x2xf32>
    %418 = tpu.matmul %416, %417, %cst_145 {dimension_numbers = #tpu.dot_dimension_numbers<[1], [0], [0], [1], [0, 0, 1, 1], [], []>} : vector<2x32xbf16>, vector<32x2xbf16>, vector<2x2xf32> -> vector<2x2xf32>
    %c0_146 = arith.constant 0 : index
    %c0_147 = arith.constant 0 : index
    %419 = vector.load %arg14[%c0_146, %c0_147] : memref<1x2xf32, #tpu.memory_space<vmem>>, vector<1x2xf32>
    %420 = vector.broadcast %419 : vector<1x2xf32> to vector<2x2xf32>
    %421 = arith.addf %418, %420 : vector<2x2xf32>
    %c0_148 = arith.constant 0 : index
    %c0_149 = arith.constant 0 : index
    %422 = vector.load %arg15[%c0_148, %c0_149] : memref<2x2xf32, #tpu.memory_space<vmem>>, vector<2x2xf32>
    tpu.vector_store %arg15[%c0_148, %c0_149], %421 {strides = array<i32>} : memref<2x2xf32, #tpu.memory_space<vmem>>, vector<2x2xf32>,
    return
  }
}

</mosaic_0001>

<bundles_post_ra>
// kernel: tpu_custom_call.1
= control target key start
LH: loop header
LB: loop body
LE: loop exit
PB: predicated region body
PF: predicated region fallthrough
CT: control target
= control target key end

     0   :  { %20 = vsyncpa [#allocation3], 0  ;;  %s6673_s0 = inlined_call_operand.vmem [shape: bf16[16,4], index: 0, kind: input, shape index: {}]   ;;  %s6674_s1 = inlined_call_operand.vmem [shape: bf16[2,3], index: 1, kind: input, shape index: {}]   ;;  %s6675_s2 = inlined_call_operand.vmem [shape: f32[2,128], index: 2, kind: input, shape index: {}]   ;;  %s6676_s3 = inlined_call_operand.vmem [shape: f32[2,128], index: 3, kind: input, shape index: {}]   ;;  %s6677_s4 = inlined_call_operand.vmem [shape: bf16[4,512], index: 4, kind: input, shape index: {}]   ;;  %s6678_s5 = inlined_call_operand.hbm [shape: bf16[128,512], index: 5, kind: input, shape index: {}]   ;;  %s6679_s6 = inlined_call_operand.vmem [shape: f32[1,512], index: 6, kind: input, shape index: {}]   ;;  %s6680_s7 = inlined_call_operand.hbm [shape: bf16[128,512], index: 7, kind: input, shape index: {}]   ;;  %s6681_s8 = inlined_call_operand.hbm [shape: bf16[128,512], index: 8, kind: input, shape index: {}]   ;;  %s6682_s9 = inlined_call_operand.vmem [shape: f32[1,512], index: 9, kind: input, shape index: {}]   ;;  %s6683_s10 = inlined_call_operand.vmem [shape: bf16[128,32], index: 10, kind: input, shape index: {}]   ;;  %s6684_s11 = inlined_call_operand.vmem [shape: bf16[3,32], index: 11, kind: input, shape index: {}]   ;;  %s6685_s12 = inlined_call_operand.vmem [shape: f32[1,32], index: 12, kind: input, shape index: {}]   ;;  %s6686_s13 = inlined_call_operand.vmem [shape: bf16[32,2], index: 13, kind: input, shape index: {}]   ;;  %s6687_s14 = inlined_call_operand.vmem [shape: f32[1,2], index: 14, kind: input, shape index: {}]   ;;  %s6688_s15 = inlined_call_operand.hbm [shape: f32[2,2], index: 15, kind: output, shape index: {}]  }
   0x1   :  { %21 = vsyncpa [#allocation6], 0 }
   0x2   :  { %22 = vsyncpa [#allocation4], 0  ;;  %s4734_s18 = smov [#allocation5]   ;;  %s4735_s20 = smov [#allocation2]  }
   0x3   :  { %s52_s19 = sshll.u32 %s4734_s18, 4  ;;  %s38_s21 = sshll.u32 %s4735_s20, 4  ;;  %s53_s19 = int_to_ptr.vmem [resolvable:$true] %s52_s19  ;;  %s4825_s21 = int_to_ptr.vmem [resolvable:$true] %s38_s21 }
   0x4   :  { %s4640_s24 = scalar_lea.hbm %s6680_s7, 4096 }
   0x5   :  { %p4641_p0 = scmp.ne.s32.totalorder %s6680_s7, %s4640_s24  ;;  %p4644_p1 = scmp.lt.u32.totalorder %s4640_s24, %s6680_s7 }
   0x7   :  { %p4646_p2 = pnand %p4644_p1, %p4641_p0 }
   0x9   :  { %4649 = shalt.err (!%p4646_p2)
}
   0xa   :  { %s4650_s29 = scalar_lea.vmem %s53_s19, 4096  ;;  %p4655_p4 = scmp.lt.s32.totalorder %s53_s19, %s53_s19 }
   0xb   :  { %p4651_p3 = scmp.ne.s32.totalorder %s53_s19, %s4650_s29  ;;  %p4656_p5 = scmp.lt.s32.totalorder %s4650_s29, %s4650_s29 }
   0xd   :  { %p4657_p6 = por %p4656_p5, %p4655_p4 }
   0xf   :  { %p4658_p7 = pnand %p4657_p6, %p4651_p3 }
  0x11   :  { %4661 = shalt.err (!%p4658_p7)
}
  0x12   :  { %s4736_s30 = smov 256   ;;  %s4737_s16 = smov 16  }
  0x13   :  { %58 = dma.hbm_to_vmem [thread:$0]  %s6680_s7, 4096, %s53_s19, [#allocation6], %s4736_s30, %s4736_s30, %s4737_s16  }
  0x14   :  { %s4662_s23 = scalar_lea.hbm %s6678_s5, 4096 }
  0x15   :  { %p4663_p8 = scmp.ne.s32.totalorder %s6678_s5, %s4662_s23  ;;  %p4666_p9 = scmp.lt.u32.totalorder %s4662_s23, %s6678_s5 }
  0x17   :  { %p4668_p10 = pnand %p4666_p9, %p4663_p8 }
  0x19   :  { %4671 = shalt.err (!%p4668_p10)
}
  0x1a   :  { %s4672_s28 = scalar_lea.vmem %s4825_s21, 4096  ;;  %p4677_p12 = scmp.lt.s32.totalorder %s4825_s21, %s4825_s21 }
  0x1b   :  { %p4673_p11 = scmp.ne.s32.totalorder %s4825_s21, %s4672_s28  ;;  %p4678_p13 = scmp.lt.s32.totalorder %s4672_s28, %s4672_s28 }
  0x1d   :  { %p4679_p0 = por %p4678_p13, %p4677_p12 }
  0x1f   :  { %p4680_p1 = pnand %p4679_p0, %p4673_p11 }
  0x21   :  { %4683 = shalt.err (!%p4680_p1)
}
  0x22   :  { %44 = dma.hbm_to_vmem [thread:$0]  %s6678_s5, 4096, %s4825_s21, [#allocation3], %s4736_s30, %s4736_s30, %s4737_s16  }
  0x23   :  { %s4738_s29 = smov [#allocation7]   ;;  %s4684_s22 = scalar_lea.hbm %s6681_s8, 4096 }
  0x24   :  { %s64_s17 = sshll.u32 %s4738_s29, 4  ;;  %p4685_p2 = scmp.ne.s32.totalorder %s6681_s8, %s4684_s22  ;;  %s65_s17 = int_to_ptr.vmem [resolvable:$true] %s64_s17 }
  0x25   :  { %p4688_p3 = scmp.lt.u32.totalorder %s4684_s22, %s6681_s8 }
  0x27   :  { %p4690_p4 = pnand %p4688_p3, %p4685_p2 }
  0x29   :  { %4693 = shalt.err (!%p4690_p4)
}
  0x2a   :  { %s4694_s27 = scalar_lea.vmem %s65_s17, 4096  ;;  %p4699_p6 = scmp.lt.s32.totalorder %s65_s17, %s65_s17 }
  0x2b   :  { %p4695_p5 = scmp.ne.s32.totalorder %s65_s17, %s4694_s27  ;;  %p4700_p7 = scmp.lt.s32.totalorder %s4694_s27, %s4694_s27 }
  0x2d   :  { %p4701_p8 = por %p4700_p7, %p4699_p6 }
  0x2f   :  { %p4702_p9 = pnand %p4701_p8, %p4695_p5 }
  0x31   :  { %4705 = shalt.err (!%p4702_p9)
}
  0x32   :  { %70 = dma.hbm_to_vmem [thread:$0]  %s6681_s8, 4096, %s65_s17, [#allocation6], %s4736_s30, %s4736_s30, %s4737_s16  }
  0x33   :  { %4728 = dma.done.wait [#allocation3], 4096  }
  0x34   :  { %4729 = vsyncadd [#allocation3], 4294963200 }
  0x35   :  { %4730 = dma.done.wait [#allocation6], 8192  }
  0x36   :  { %4731 = vsyncadd [#allocation6], 4294959104  ;;  %v98_v0 = vlaneseq  ;;  %v4739_v1 = vmov 1983009808   ;;  %v6700_v3 = vmov 0   ;;  %v95_v9 = vld [vmem:[%s6677_s4] sm:$0xff] }
  0x37   :  { %v126_v2 = vunpack.c.l.s4 %v4739_v1  ;;  %190 = vmatprep.mubr.bf16.mxu0 %v6700_v3  ;;  %533 = vmatprep.mubr.bf16.mxu1 %v6700_v3  ;;  %v4882_v7 = vld [vmem:[#allocation7 + $0xc] ss:$16 sps:$4 sm:$0xff]   ;;  %v4884_v8 = vld [vmem:[#allocation7 + $0x8] ss:$16 sps:$4 sm:$0xff]   ;;  %vm145_vm0 = vcmask 1041408   ;;  %v124_v10 = vcombine.high %v95_v9, %v95_v9  ;;  %vm141_vm1 = vcmask 31744  }
  0x38   :  { %v4879_v4 = vshrl.u32 %v98_v0, 7  ;;  %501 = vmatprep.subr.bf16.mxu1 %v4882_v7  ;;  %v4890_v12 = vld [vmem:[#allocation7 + $0x2c] ss:$16 sps:$4 sm:$0xff]   ;;  %v4893_v13 = vld [vmem:[#allocation7 + $0x28] ss:$16 sps:$4 sm:$0xff]   ;;  %vm3521_vm2 = vcmask 1040384  }
  0x39   :  { %v127_v5 = vunpack.c.0.s8 %v126_v2  ;;  %502 = vmatpush1.bf16.msra.mxu1 %v4884_v8  ;;  %v4897_v17 = vld [vmem:[#allocation7 + $0x4c] ss:$16 sps:$4 sm:$0xff]   ;;  %v4904_v20 = vld [vmem:[#allocation7 + $0x48] ss:$16 sps:$4 sm:$0xff]   ;;  %v4911_v23 = vld [vmem:[#allocation7 + $0x4] ss:$16 sps:$4 sm:$0xff]  }
  0x3a   :  { %503 = vmatprep.subr.bf16.mxu1 %v4890_v12  ;;  %v4011_v18 = vld [vmem:[%s6673_s0] sm:$0xff]   ;;  %v4923_v26 = vld [vmem:[#allocation7] ss:$16 sps:$4 sm:$0xff]   ;;  %v4925_v27 = vld [vmem:[#allocation7 + $0x24] ss:$16 sps:$4 sm:$0xff]   ;;  %vm4743_vm3 = vmmov 0  }
  0x3b   :  { %v130_v6 = vsub.s32 %v127_v5, %v4879_v4  ;;  %v4909_v22 = vld [vmem:[#allocation7 + $0x6c] ss:$16 sps:$4 sm:$0xff]   ;;  %v4915_v24 = vld [vmem:[#allocation7 + $0x68] ss:$16 sps:$4 sm:$0xff]   ;;  %v4933_v30 = vld [vmem:[#allocation7 + $0x20] ss:$16 sps:$4 sm:$0xff]  }
  0x3c   :  { %v4919_v25 = vld [vmem:[#allocation7 + $0x8c] ss:$16 sps:$4 sm:$0xff]   ;;  %v4927_v28 = vld [vmem:[#allocation7 + $0x88] ss:$16 sps:$4 sm:$0xff]   ;;  %v4941_v32 = vld [vmem:[#allocation7 + $0x44] ss:$16 sps:$4 sm:$0xff]  }
  0x3d   :  { %v131_v11 = vrot.slane %v95_v9, %v130_v6  ;;  %v138_v14 = vrot.slane %v124_v10, %v130_v6  ;;  %504 = vmatpush1.bf16.msra.mxu1 %v4893_v13  ;;  %v4930_v29 = vld [vmem:[#allocation7 + $0xac] ss:$16 sps:$4 sm:$0xff]   ;;  %v4937_v31 = vld [vmem:[#allocation7 + $0xa8] ss:$16 sps:$4 sm:$0xff]   ;;  %v4948_v34 = vld [vmem:[#allocation7 + $0x40] ss:$16 sps:$4 sm:$0xff]  }
  0x3e   :  { %505 = vmatprep.subr.bf16.mxu1 %v4897_v17  ;;  %v4943_v33 = vld [vmem:[#allocation7 + $0xcc] ss:$16 sps:$4 sm:$0xff]   ;;  %v4950_v35 = vld [vmem:[#allocation7 + $0x64] ss:$16 sps:$4 sm:$0xff]   ;;  %v4952_v36 = vld [vmem:[#allocation7 + $0xc8] ss:$16 sps:$4 sm:$0xff]  }
  0x3f   :  { %v139_v15 = vcombine.high %v131_v11, %v131_v11  ;;  %v147_v16 = vsel %vm145_vm0, %v131_v11, 0  ;;  %v140_v19 = vcombine.high %v138_v14, %v138_v14  ;;  %v153_v21 = vsel %vm145_vm0, %v138_v14, 0  ;;  %v4956_v37 = vld [vmem:[#allocation7 + $0xec] ss:$16 sps:$4 sm:$0xff]   ;;  %v4958_v38 = vld [vmem:[#allocation7 + $0x60] ss:$16 sps:$4 sm:$0xff]  }
  0x40   :  { %v4962_v39 = vld [vmem:[#allocation7 + $0xe8] ss:$16 sps:$4 sm:$0xff]   ;;  %v4966_v40 = vld [vmem:[#allocation7 + $0x84] ss:$16 sps:$4 sm:$0xff]   ;;  %v4968_v41 = vld [vmem:[#allocation2 + $0xc] ss:$16 sps:$4 sm:$0xff]  }
  0x41   :  { %3751 = vmatprep.subr.msk.bf16.mxu0 %vm145_vm0, %v139_v15  ;;  %506 = vmatpush1.bf16.msra.mxu1 %v4904_v20  ;;  %v4972_v42 = vld [vmem:[#allocation7 + $0x80] ss:$16 sps:$4 sm:$0xff]   ;;  %v4974_v43 = vld [vmem:[#allocation7 + $0xa4] ss:$16 sps:$4 sm:$0xff]   ;;  %v4976_v44 = vld [vmem:[#allocation2 + $0x8] ss:$16 sps:$4 sm:$0xff]  }
  0x42   :  { %159 = vmatpush1.bf16.msra.mxu0 %v147_v16  ;;  %507 = vmatprep.subr.bf16.mxu1 %v4909_v22  ;;  %v4980_v45 = vld [vmem:[#allocation2 + $0x2c] ss:$16 sps:$4 sm:$0xff]   ;;  %v4983_v46 = vld [vmem:[#allocation7 + $0xa0] ss:$16 sps:$4 sm:$0xff]   ;;  %v4987_v47 = vld [vmem:[#allocation2 + $0x28] ss:$16 sps:$4 sm:$0xff]  }
  0x43   :  { %3753 = vmatprep.subr.msk.bf16.mxu0 %vm145_vm0, %v140_v19  ;;  %7045 = vst [vmem:[#allocation12_spill] sm:$0xff] %v4987_v47  ;;  %v4991_v48 = vld [vmem:[#allocation7 + $0xc4] ss:$16 sps:$4 sm:$0xff]   ;;  %v4993_v49 = vld [vmem:[#allocation2 + $0x4c] ss:$16 sps:$4 sm:$0xff]   ;;  %vm3517_vm4 = vcmask 23552  }
  0x44   :  { %7046 = vst [vmem:[#allocation13_spill] sm:$0xff] %v4993_v49  ;;  %v4998_v50 = vld [vmem:[#allocation7 + $0xc0] ss:$16 sps:$4 sm:$0xff]   ;;  %v5000_v51 = vld [vmem:[#allocation7 + $0xe4] ss:$16 sps:$4 sm:$0xff]   ;;  %vm3688_vm5 = vcmask 261120  }
  0x45   :  { %3752 = vmatmul.mubr.msk.bf16.vlgmr.msra.gmra.mrb[0].mxu0 %vm141_vm1, %v4011_v18  ;;  %508 = vmatpush1.bf16.msra.mxu1 %v4915_v24  ;;  %v5002_v52 = vld [vmem:[#allocation2 + $0x48] ss:$16 sps:$4 sm:$0xff]   ;;  %v5006_v53 = vld [vmem:[#allocation2 + $0x6c] ss:$16 sps:$4 sm:$0xff]   ;;  %v5008_v54 = vld [vmem:[#allocation7 + $0xe0] ss:$16 sps:$4 sm:$0xff]  }
  0x46   :  { %202 = vmatpush1.bf16.msra.mxu0 %v153_v21  ;;  %233 = vmatprep.mubr.bf16.mxu0 %v6700_v3  ;;  %7047 = vst [vmem:[#allocation14_spill] sm:$0xff] %v5002_v52  ;;  %7048 = vst [vmem:[#allocation15_spill] sm:$0xff] %v5006_v53  ;;  %v5012_v55 = vld [vmem:[#allocation2 + $0x4] ss:$16 sps:$4 sm:$0xff]   ;;  %v5014_v56 = vld [vmem:[#allocation2 + $0x68] ss:$16 sps:$4 sm:$0xff]  }
  0x47   :  { %460 = vmatprep.subr.bf16.mxu0 %v4911_v23  ;;  %509 = vmatprep.subr.bf16.mxu1 %v4919_v25  ;;  %7049 = vst [vmem:[#allocation16_spill] sm:$0xff] %v5014_v56  ;;  %v5018_v57 = vld [vmem:[#allocation2 + $0x8c] ss:$16 sps:$4 sm:$0xff]   ;;  %v5020_v58 = vld [vmem:[#allocation2] ss:$16 sps:$4 sm:$0xff]   ;;  %vm3732_vm6 = vcmask 9216  }
  0x48   :  { %7050 = vst [vmem:[#allocation17_spill] sm:$0xff] %v5018_v57  ;;  %v5022_v59 = vld [vmem:[#allocation2 + $0x88] ss:$16 sps:$4 sm:$0xff]   ;;  %v5024_v60 = vld [vmem:[#allocation2 + $0x24] ss:$16 sps:$4 sm:$0xff]  }
  0x49   :  { %510 = vmatpush1.bf16.msra.mxu1 %v4927_v28  ;;  %7051 = vst [vmem:[#allocation18_spill] sm:$0xff] %v5022_v59  ;;  %v5026_v61 = vld [vmem:[#allocation2 + $0xac] ss:$16 sps:$4 sm:$0xff]   ;;  %v5032_v62 = vld [vmem:[#allocation2 + $0x20] ss:$16 sps:$4 sm:$0xff]  }
  0x4a   :  { %511 = vmatprep.subr.bf16.mxu1 %v4930_v29  ;;  %7052 = vst [vmem:[#allocation19_spill] sm:$0xff] %v5026_v61  ;;  %7053 = vst [vmem:[#allocation20_spill] sm:$0xff] %v5032_v62  ;;  %v5034_v63 = vld [vmem:[#allocation2 + $0xa8] ss:$16 sps:$4 sm:$0xff]   ;;  %v5037_v0 = vld [vmem:[#allocation2 + $0x44] ss:$16 sps:$4 sm:$0xff]  }
  0x4b   :  { %7054 = vst [vmem:[#allocation21_spill] sm:$0xff] %v5034_v63  ;;  %7055 = vst [vmem:[#allocation22_spill] sm:$0xff] %v5037_v0  ;;  %v5039_v1 = vld [vmem:[#allocation2 + $0xcc] ss:$16 sps:$4 sm:$0xff]   ;;  %v5045_v2 = vld [vmem:[#allocation2 + $0x40] ss:$16 sps:$4 sm:$0xff]  }
  0x4c   :  { %7056 = vst [vmem:[#allocation23_spill] sm:$0xff] %v5039_v1  ;;  %7057 = vst [vmem:[#allocation24_spill] sm:$0xff] %v5045_v2  ;;  %v5047_v5 = vld [vmem:[#allocation2 + $0xc8] ss:$16 sps:$4 sm:$0xff]   ;;  %v5050_v6 = vld [vmem:[#allocation2 + $0x64] ss:$16 sps:$4 sm:$0xff]  }
  0x4d   :  { %3754 = vmatmul.mubr.msk.bf16.vlgmr.msra.gmra.mrb[4].mxu0 %vm141_vm1, %v4011_v18  ;;  %512 = vmatpush1.bf16.msra.mxu1 %v4937_v31  ;;  %7058 = vst [vmem:[#allocation25_spill] sm:$0xff] %v5047_v5  ;;  %7059 = vst [vmem:[#allocation26_spill] sm:$0xff] %v5050_v6  ;;  %v5052_v9 = vld [vmem:[#allocation2 + $0xec] ss:$16 sps:$4 sm:$0xff]   ;;  %v5058_v10 = vld [vmem:[#allocation2 + $0x60] ss:$16 sps:$4 sm:$0xff]  }
  0x4e   :  { %461 = vmatpush1.bf16.msra.mxu0 %v4923_v26  ;;  %492 = vmatprep.mubr.bf16.mxu0 %v6700_v3  ;;  %7060 = vst [vmem:[#allocation27_spill] sm:$0xff] %v5052_v9  ;;  %7061 = vst [vmem:[#allocation28_spill] sm:$0xff] %v5058_v10  ;;  %v5060_v11 = vld [vmem:[#allocation2 + $0xe8] ss:$16 sps:$4 sm:$0xff]   ;;  %v5062_v14 = vld [vmem:[#allocation2 + $0x84] ss:$16 sps:$4 sm:$0xff]  }
  0x4f   :  { %462 = vmatprep.subr.bf16.mxu0 %v4925_v27  ;;  %513 = vmatprep.subr.bf16.mxu1 %v4943_v33  ;;  %7062 = vst [vmem:[#allocation29_spill] sm:$0xff] %v5060_v11  ;;  %7063 = vst [vmem:[#allocation30_spill] sm:$0xff] %v5062_v14  ;;  %v5070_v15 = vld [vmem:[#allocation2 + $0x80] ss:$16 sps:$4 sm:$0xff]   ;;  %v5073_v16 = vld [vmem:[#allocation2 + $0xa4] ss:$16 sps:$4 sm:$0xff]  }
  0x50   :  { %7064 = vst [vmem:[#allocation31_spill] sm:$0xff] %v5070_v15  ;;  %7065 = vst [vmem:[#allocation32_spill] sm:$0xff] %v5073_v16  ;;  %v5077_v18 = vld [vmem:[#allocation2 + $0xa0] ss:$16 sps:$4 sm:$0xff]   ;;  %v5081_v19 = vld [vmem:[#allocation2 + $0xc4] ss:$16 sps:$4 sm:$0xff]  }
  0x51   :  { %514 = vmatpush1.bf16.msra.mxu1 %v4952_v36  ;;  %7066 = vst [vmem:[#allocation33_spill] sm:$0xff] %v5077_v18  ;;  %7067 = vst [vmem:[#allocation34_spill] sm:$0xff] %v5081_v19  ;;  %v5084_v21 = vld [vmem:[#allocation2 + $0xc0] ss:$16 sps:$4 sm:$0xff]  }
  0x52   :  { %463 = vmatpush1.bf16.msra.mxu0 %v4933_v30  ;;  %515 = vmatprep.subr.bf16.mxu1 %v4956_v37  ;;  %7068 = vst [vmem:[#allocation35_spill] sm:$0xff] %v5084_v21 }
  0x53   :  { %464 = vmatprep.subr.bf16.mxu0 %v4941_v32 }
  0x55   :  { %516 = vmatpush1.bf16.msra.mxu1 %v4962_v39 }
  0x56   :  { %465 = vmatpush1.bf16.msra.mxu0 %v4948_v34  ;;  %775 = vmatprep.subr.bf16.mxu1 %v4968_v41 }
  0x57   :  { %466 = vmatprep.subr.bf16.mxu0 %v4950_v35 }
  0x58   :  { %534 = vmatmul.mubr.bf16.vlgmr.msra.gmra.mrb[0].mxu1 %v6700_v3 }
  0x59   :  { %776 = vmatpush1.bf16.msra.mxu1 %v4976_v44  ;;  %807 = vmatprep.mubr.bf16.mxu1 %v6700_v3 }
  0x5a   :  { %467 = vmatpush1.bf16.msra.mxu0 %v4958_v38  ;;  %777 = vmatprep.subr.bf16.mxu1 %v4980_v45 }
  0x5b   :  { %468 = vmatprep.subr.bf16.mxu0 %v4966_v40 }
  0x5d   :  { %778 = vmatpush1.bf16.msra.mxu1 %v4987_v47 }
  0x5e   :  { %469 = vmatpush1.bf16.msra.mxu0 %v4972_v42  ;;  %779 = vmatprep.subr.bf16.mxu1 %v4993_v49 }
  0x5f   :  { %470 = vmatprep.subr.bf16.mxu0 %v4974_v43 }
  0x61   :  { %780 = vmatpush1.bf16.msra.mxu1 %v5002_v52 }
  0x62   :  { %471 = vmatpush1.bf16.msra.mxu0 %v4983_v46  ;;  %781 = vmatprep.subr.bf16.mxu1 %v5006_v53 }
  0x63   :  { %472 = vmatprep.subr.bf16.mxu0 %v4991_v48 }
  0x65   :  { %782 = vmatpush1.bf16.msra.mxu1 %v5014_v56 }
  0x66   :  { %473 = vmatpush1.bf16.msra.mxu0 %v4998_v50  ;;  %783 = vmatprep.subr.bf16.mxu1 %v5018_v57 }
  0x67   :  { %474 = vmatprep.subr.bf16.mxu0 %v5000_v51 }
  0x69   :  { %784 = vmatpush1.bf16.msra.mxu1 %v5022_v59 }
  0x6a   :  { %475 = vmatpush1.bf16.msra.mxu0 %v5008_v54  ;;  %785 = vmatprep.subr.bf16.mxu1 %v5026_v61  ;;  %v5168_v61 = vld [vmem:[#allocation5 + $0xcc] ss:$16 sps:$4 sm:$0xff]  }
  0x6b   :  { %734 = vmatprep.subr.bf16.mxu0 %v5012_v55  ;;  %7096 = vst [vmem:[#allocation63_spill] sm:$0xff] %v5168_v61 }
  0x6d   :  { %493 = vmatmul.mubr.bf16.vlgmr.msra.gmra.mrb[8].mxu0 %v6700_v3  ;;  %786 = vmatpush1.bf16.msra.mxu1 %v5034_v63  ;;  %v5100_v63 = vld [vmem:[#allocation5] ss:$16 sps:$4 sm:$0xff]  }
  0x6e   :  { %735 = vmatpush1.bf16.msra.mxu0 %v5020_v58  ;;  %766 = vmatprep.mubr.bf16.mxu0 %v6700_v3  ;;  %7073 = vst [vmem:[#allocation40_spill] sm:$0xff] %v5100_v63 }
  0x6f   :  { %736 = vmatprep.subr.bf16.mxu0 %v5024_v60  ;;  %787 = vmatprep.subr.bf16.mxu1 %v5039_v1  ;;  %v5098_v1 = vld [vmem:[#allocation5 + $0xc] ss:$16 sps:$4 sm:$0xff]  }
  0x70   :  { %7072 = vst [vmem:[#allocation39_spill] sm:$0xff] %v5098_v1 }
  0x71   :  { %788 = vmatpush1.bf16.msra.mxu1 %v5047_v5  ;;  %v5096_v5 = vld [vmem:[#allocation5 + $0x4] ss:$16 sps:$4 sm:$0xff]  }
  0x72   :  { %737 = vmatpush1.bf16.msra.mxu0 %v5032_v62  ;;  %789 = vmatprep.subr.bf16.mxu1 %v5052_v9  ;;  %v5090_v9 = vld [vmem:[#allocation2 + $0xe0] ss:$16 sps:$4 sm:$0xff]   ;;  %7071 = vst [vmem:[#allocation38_spill] sm:$0xff] %v5096_v5 }
  0x73   :  { %738 = vmatprep.subr.bf16.mxu0 %v5037_v0  ;;  %7070 = vst [vmem:[#allocation37_spill] sm:$0xff] %v5090_v9 }
  0x75   :  { %790 = vmatpush1.bf16.msra.mxu1 %v5060_v11  ;;  %v5087_v11 = vld [vmem:[#allocation2 + $0xe4] ss:$16 sps:$4 sm:$0xff]  }
  0x76   :  { %739 = vmatpush1.bf16.msra.mxu0 %v5045_v2  ;;  %7069 = vst [vmem:[#allocation36_spill] sm:$0xff] %v5087_v11  ;;  %1085 = vmatprep.subr.bf16.mxu1 %v5098_v1  ;;  %v5120_v1 = vld [vmem:[#allocation5 + $0x44] ss:$16 sps:$4 sm:$0xff]  }
  0x77   :  { %740 = vmatprep.subr.bf16.mxu0 %v5050_v6  ;;  %7079 = vst [vmem:[#allocation46_spill] sm:$0xff] %v5120_v1 }
  0x78   :  { %808 = vmatmul.mubr.bf16.vlgmr.msra.gmra.mrb[4].mxu1 %v6700_v3 }
  0x79   :  { %1117 = vmatprep.mubr.bf16.mxu1 %v6700_v3 }
  0x7a   :  { %741 = vmatpush1.bf16.msra.mxu0 %v5058_v10 }
  0x7b   :  { %742 = vmatprep.subr.bf16.mxu0 %v5062_v14 }
  0x7e   :  { %743 = vmatpush1.bf16.msra.mxu0 %v5070_v15 }
  0x7f   :  { %744 = vmatprep.subr.bf16.mxu0 %v5073_v16  ;;  %v6791_v16 = vsub.s32 3, %v4879_v4 }
  0x82   :  { %745 = vmatpush1.bf16.msra.mxu0 %v5077_v18  ;;  %v5152_v18 = vld [vmem:[#allocation5 + $0xa4] ss:$16 sps:$4 sm:$0xff]  }
  0x83   :  { %746 = vmatprep.subr.bf16.mxu0 %v5081_v19  ;;  %v5102_v19 = vld [vmem:[#allocation5 + $0x8] ss:$16 sps:$4 sm:$0xff]   ;;  %7091 = vst [vmem:[#allocation58_spill] sm:$0xff] %v5152_v18 }
  0x84   :  { %7074 = vst [vmem:[#allocation41_spill] sm:$0xff] %v5102_v19  ;;  %1086 = vmatpush1.bf16.msra.mxu1 %v5102_v19  ;;  %v5124_v19 = vld [vmem:[#allocation5 + $0x40] ss:$16 sps:$4 sm:$0xff]  }
  0x85   :  { %7081 = vst [vmem:[#allocation48_spill] sm:$0xff] %v5124_v19 }
  0x86   :  { %747 = vmatpush1.bf16.msra.mxu0 %v5084_v21  ;;  %v5114_v21 = vld [vmem:[#allocation5 + $0x28] ss:$16 sps:$4 sm:$0xff]  }
  0x87   :  { %748 = vmatprep.subr.bf16.mxu0 %v5087_v11  ;;  %v5110_v11 = vld [vmem:[#allocation5 + $0x2c] ss:$16 sps:$4 sm:$0xff]   ;;  %7078 = vst [vmem:[#allocation45_spill] sm:$0xff] %v5114_v21 }
  0x88   :  { %7076 = vst [vmem:[#allocation43_spill] sm:$0xff] %v5110_v11  ;;  %1087 = vmatprep.subr.bf16.mxu1 %v5110_v11  ;;  %v5132_v11 = vld [vmem:[#allocation5 + $0x64] ss:$16 sps:$4 sm:$0xff]  }
  0x89   :  { %1088 = vmatpush1.bf16.msra.mxu1 %v5114_v21  ;;  %7083 = vst [vmem:[#allocation50_spill] sm:$0xff] %v5132_v11  ;;  %v5136_v21 = vld [vmem:[#allocation5 + $0x60] ss:$16 sps:$4 sm:$0xff]  }
  0x8a   :  { %749 = vmatpush1.bf16.msra.mxu0 %v5090_v9  ;;  %v5108_v9 = vld [vmem:[#allocation5 + $0x24] ss:$16 sps:$4 sm:$0xff]   ;;  %7085 = vst [vmem:[#allocation52_spill] sm:$0xff] %v5136_v21 }
  0x8b   :  { %1044 = vmatprep.subr.bf16.mxu0 %v5096_v5  ;;  %7075 = vst [vmem:[#allocation42_spill] sm:$0xff] %v5108_v9  ;;  %v5126_v5 = vld [vmem:[#allocation5 + $0x48] ss:$16 sps:$4 sm:$0xff]  }
  0x8c   :  { %7082 = vst [vmem:[#allocation49_spill] sm:$0xff] %v5126_v5 }
  0x8d   :  { %767 = vmatmul.mubr.bf16.vlgmr.msra.gmra.mrb[12].mxu0 %v6700_v3 }
  0x8e   :  { %1076 = vmatprep.mubr.bf16.mxu0 %v6700_v3  ;;  %1045 = vmatpush1.bf16.msra.mxu0 %v5100_v63  ;;  %v5112_v3 = vld [vmem:[#allocation5 + $0x20] ss:$16 sps:$4 sm:$0xff]   ;;  %v5122_v63 = vld [vmem:[#allocation5 + $0x4c] ss:$16 sps:$4 sm:$0xff]  }
  0x8f   :  { %7077 = vst [vmem:[#allocation44_spill] sm:$0xff] %v5112_v3  ;;  %1046 = vmatprep.subr.bf16.mxu0 %v5108_v9  ;;  %7080 = vst [vmem:[#allocation47_spill] sm:$0xff] %v5122_v63  ;;  %1089 = vmatprep.subr.bf16.mxu1 %v5122_v63  ;;  %v5138_v9 = vld [vmem:[#allocation5 + $0x68] ss:$16 sps:$4 sm:$0xff]   ;;  %v5144_v63 = vld [vmem:[#allocation5 + $0x84] ss:$16 sps:$4 sm:$0xff]  }
  0x90   :  { %1090 = vmatpush1.bf16.msra.mxu1 %v5126_v5  ;;  %7086 = vst [vmem:[#allocation53_spill] sm:$0xff] %v5138_v9  ;;  %7087 = vst [vmem:[#allocation54_spill] sm:$0xff] %v5144_v63  ;;  %v5148_v5 = vld [vmem:[#allocation5 + $0x80] ss:$16 sps:$4 sm:$0xff]  }
  0x91   :  { %7089 = vst [vmem:[#allocation56_spill] sm:$0xff] %v5148_v5 }
  0x92   :  { %1047 = vmatpush1.bf16.msra.mxu0 %v5112_v3  ;;  %v5134_v3 = vld [vmem:[#allocation5 + $0x6c] ss:$16 sps:$4 sm:$0xff]  }
  0x93   :  { %1048 = vmatprep.subr.bf16.mxu0 %v5120_v1  ;;  %7084 = vst [vmem:[#allocation51_spill] sm:$0xff] %v5134_v3  ;;  %1091 = vmatprep.subr.bf16.mxu1 %v5134_v3  ;;  %v5150_v1 = vld [vmem:[#allocation5 + $0x88] ss:$16 sps:$4 sm:$0xff]   ;;  %v5166_v3 = vld [vmem:[#allocation5 + $0xc4] ss:$16 sps:$4 sm:$0xff]  }
  0x94   :  { %1092 = vmatpush1.bf16.msra.mxu1 %v5138_v9  ;;  %7090 = vst [vmem:[#allocation57_spill] sm:$0xff] %v5150_v1  ;;  %v5160_v9 = vld [vmem:[#allocation5 + $0xa0] ss:$16 sps:$4 sm:$0xff]   ;;  %7095 = vst [vmem:[#allocation62_spill] sm:$0xff] %v5166_v3 }
  0x95   :  { %7093 = vst [vmem:[#allocation60_spill] sm:$0xff] %v5160_v9 }
  0x96   :  { %1049 = vmatpush1.bf16.msra.mxu0 %v5124_v19  ;;  %v5146_v19 = vld [vmem:[#allocation5 + $0x8c] ss:$16 sps:$4 sm:$0xff]  }
  0x97   :  { %1050 = vmatprep.subr.bf16.mxu0 %v5132_v11  ;;  %7088 = vst [vmem:[#allocation55_spill] sm:$0xff] %v5146_v19  ;;  %1093 = vmatprep.subr.bf16.mxu1 %v5146_v19  ;;  %v5156_v11 = vld [vmem:[#allocation5 + $0xac] ss:$16 sps:$4 sm:$0xff]   ;;  %v5172_v19 = vld [vmem:[#allocation5 + $0xc0] ss:$16 sps:$4 sm:$0xff]  }
  0x98   :  { %7092 = vst [vmem:[#allocation59_spill] sm:$0xff] %v5156_v11  ;;  %1094 = vmatpush1.bf16.msra.mxu1 %v5150_v1  ;;  %7097 = vst [vmem:[#allocation64_spill] sm:$0xff] %v5172_v19  ;;  %v5178_v1 = vld [vmem:[#allocation5 + $0xe4] ss:$16 sps:$4 sm:$0xff]  }
  0x99   :  { %1095 = vmatprep.subr.bf16.mxu1 %v5156_v11  ;;  %7099 = vst [vmem:[#allocation66_spill] sm:$0xff] %v5178_v1  ;;  %v5184_v11 = vld [vmem:[#allocation5 + $0xe0] ss:$16 sps:$4 sm:$0xff]  }
  0x9a   :  { %1051 = vmatpush1.bf16.msra.mxu0 %v5136_v21  ;;  %v5162_v21 = vld [vmem:[#allocation5 + $0xa8] ss:$16 sps:$4 sm:$0xff]   ;;  %7101 = vst [vmem:[#allocation68_spill] sm:$0xff] %v5184_v11 }
  0x9b   :  { %1052 = vmatprep.subr.bf16.mxu0 %v5144_v63  ;;  %7094 = vst [vmem:[#allocation61_spill] sm:$0xff] %v5162_v21  ;;  %v6788_v63 = vsub.s32 2, %v4879_v4 }
  0x9c   :  { %1096 = vmatpush1.bf16.msra.mxu1 %v5162_v21 }
  0x9d   :  { %1097 = vmatprep.subr.bf16.mxu1 %v5168_v61  ;;  %v6780_v61 = vsub.s32 1, %v4879_v4 }
  0x9e   :  { %1053 = vmatpush1.bf16.msra.mxu0 %v5148_v5  ;;  %v5174_v5 = vld [vmem:[#allocation5 + $0xc8] ss:$16 sps:$4 sm:$0xff]  }
  0x9f   :  { %1054 = vmatprep.subr.bf16.mxu0 %v5152_v18  ;;  %7098 = vst [vmem:[#allocation65_spill] sm:$0xff] %v5174_v5  ;;  %v5180_v18 = vld [vmem:[#allocation5 + $0xec] ss:$16 sps:$4 sm:$0xff]  }
  0xa0   :  { %7100 = vst [vmem:[#allocation67_spill] sm:$0xff] %v5180_v18  ;;  %1098 = vmatpush1.bf16.msra.mxu1 %v5174_v5  ;;  %v96_v5 = vld [vmem:[%s6679_s6] sm:$0xf] }
  0xa1   :  { %1099 = vmatprep.subr.bf16.mxu1 %v5180_v18  ;;  %v109_v15 = vrot.slane %v96_v5, %v6788_v63 }
  0xa2   :  { %1055 = vmatpush1.bf16.msra.mxu0 %v5160_v9  ;;  %v5186_v9 = vld [vmem:[#allocation5 + $0xe8] ss:$16 sps:$4 sm:$0xff]  }
  0xa3   :  { %1056 = vmatprep.subr.bf16.mxu0 %v5166_v3  ;;  %7102 = vst [vmem:[#allocation69_spill] sm:$0xff] %v5186_v9 }
  0xa4   :  { %1100 = vmatpush1.bf16.msra.mxu1 %v5186_v9  ;;  %v105_v9 = vrot.slane %v96_v5, %v6780_v61 }
  0xa5   :  { %1203 = vmatprep.subr.bf16.mxu1 %v4882_v7 }
  0xa6   :  { %1057 = vmatpush1.bf16.msra.mxu0 %v5172_v19  ;;  %v6777_v19 = vsub.s32 0, %v4879_v4 }
  0xa7   :  { %1058 = vmatprep.subr.bf16.mxu0 %v5178_v1 }
  0xa8   :  { %v101_v18 = vrot.slane %v96_v5, %v6777_v19  ;;  %v113_v19 = vrot.slane %v96_v5, %v6791_v16 }
  0xaa   :  { %1059 = vmatpush1.bf16.msra.mxu0 %v5184_v11 }
  0xab   :  { %1162 = vmatprep.subr.bf16.mxu0 %v4911_v23 }
 0x118   :  { %v192_v3 = vpop.f32.mrb[0].mxu0 }
 0x119   :  { %v194_v1 = vpop.f32.mrb[1].mxu0  ;;  %v5228_v49 = vadd.f32 %v192_v3, %v101_v18 }
 0x11a   :  { %v196_v11 = vpop.f32.mrb[2].mxu0 }
 0x11b   :  { %v5203_v23 = vadd.f32 %v196_v11, %v101_v18  ;;  %v198_v7 = vpop.f32.mrb[3].mxu0  ;;  %7107 = vst [vmem:[#allocation74_spill] sm:$0xff] %v5228_v49 }
 0x11c   :  { %v5205_v21 = vadd.f32 %v198_v7, %v105_v9 }
 0x11d   :  { %7103 = vst [vmem:[#allocation70_spill] sm:$0xff] %v5203_v23 }
 0x11e   :  { %7104 = vst [vmem:[#allocation71_spill] sm:$0xff] %v5205_v21 }
 0x120   :  { %v235_v59 = vpop.f32.mrb[4].mxu0 }
 0x121   :  { %v237_v57 = vpop.f32.mrb[5].mxu0  ;;  %v5225_v2 = vadd.f32 %v235_v59, %v109_v15 }
 0x122   :  { %v239_v14 = vpop.f32.mrb[6].mxu0 }
 0x123   :  { %v5213_v61 = vadd.f32 %v239_v14, %v109_v15  ;;  %v241_v11 = vpop.f32.mrb[7].mxu0 }
 0x124   :  { %v5215_v23 = vadd.f32 %v241_v11, %v113_v19 }
 0x125   :  { %7105 = vst [vmem:[#allocation72_spill] sm:$0xff] %v5213_v61 }
 0x126   :  { %7106 = vst [vmem:[#allocation73_spill] sm:$0xff] %v5215_v23 }
 0x12b   :  { %v5217_v7 = vpop.f32.mrb[0].mxu1 }
 0x12c   :  { %v5219_v21 = vpop.f32.mrb[1].mxu1 }
 0x12d   :  { %v539_v56 = vpop.f32.mrb[2].mxu1 }
 0x12e   :  { %v540_v10 = vpop.f32.mrb[3].mxu1  ;;  %v5230_v56 = vadd.f32 %v194_v1, %v105_v9 }
 0x140   :  { %v5221_v53 = vpop.f32.mrb[8].mxu0 }
 0x141   :  { %v5223_v6 = vpop.f32.mrb[9].mxu0 }
 0x142   :  { %v498_v63 = vpop.f32.mrb[10].mxu0 }
 0x143   :  { %v499_v52 = vpop.f32.mrb[11].mxu0 }
 0x14b   :  { %v809_v5 = vpop.f32.mrb[4].mxu1 }
 0x14c   :  { %v818_v14 = vadd.f32 %v809_v5, %v5225_v2  ;;  %v811_v16 = vpop.f32.mrb[5].mxu1 }
 0x14d   :  { %v813_v11 = vpop.f32.mrb[6].mxu1 }
 0x14e   :  { %v814_v23 = vpop.f32.mrb[7].mxu1  ;;  %v3821_v61 = vmul.f32 -1.442695, %v818_v14  ;;  %v5234_v11 = vadd.f32 %v237_v57, %v113_v19  ;;  %v266_v57 = vld [vmem:[%s6675_s2] sm:$0x3] }
 0x150   :  { %4160 = vpow2.f32 %v3821_v61  ;;  %v819_v3 = vadd.f32 %v811_v16, %v5234_v11 }
 0x152   :  { %v3822_v61 = vmul.f32 -1.442695, %v819_v3 }
 0x15a   :  { %v4161_v63 = vpop.eup %4160 }
 0x15b   :  { %v834_v23 = vadd.f32 1.0, %v4161_v63 }
 0x160   :  { %v768_v10 = vpop.f32.mrb[12].mxu0 }
 0x161   :  { %v816_v0 = vadd.f32 %v768_v10, %v5228_v49  ;;  %v770_v47 = vpop.f32.mrb[13].mxu0 }
 0x162   :  { %v817_v52 = vadd.f32 %v770_v47, %v5230_v56  ;;  %v772_v59 = vpop.f32.mrb[14].mxu0 }
 0x163   :  { %v3819_v15 = vmul.f32 -1.442695, %v816_v0  ;;  %v773_v62 = vpop.f32.mrb[15].mxu0 }
 0x164   :  { %v3820_v5 = vmul.f32 -1.442695, %v817_v52 }
 0x165   :  { %4162 = vpow2.f32 %v3819_v15 }
 0x166   :  { %4164 = vpow2.f32 %v3820_v5 }
 0x167   :  { %4166 = vrcp.f32 %v834_v23 }
 0x168   :  { %4168 = vpow2.f32 %v3822_v61 }
 0x16f   :  { %v4163_v1 = vpop.eup %4162 }
 0x170   :  { %v4165_v9 = vpop.eup %4164  ;;  %v832_v18 = vadd.f32 1.0, %v4163_v1  ;;  %v7108_v1 = vmov 0  }
 0x171   :  { %v833_v14 = vadd.f32 1.0, %v4165_v9  ;;  %v4167_v47 = vpop.eup %4166 }
 0x172   :  { %4170 = vrcp.f32 %v832_v18  ;;  %v844_v0 = vmul.f32 2.0, %v4167_v47  ;;  %v4169_v62 = vpop.eup %4168 }
 0x173   :  { %4172 = vrcp.f32 %v833_v14  ;;  %v835_v16 = vadd.f32 1.0, %v4169_v62 }
 0x174   :  { %v3823_v10 = vadd.f32 -1.0, %v844_v0 }
 0x175   :  { %4174 = vrcp.f32 %v835_v16 }
 0x17c   :  { %v4171_v19 = vpop.eup %4170 }
 0x17d   :  { %v4173_v52 = vpop.eup %4172  ;;  %v847_v59 = vmul.f32 %v4171_v19, %v3823_v10 }
 0x17e   :  { %v846_v63 = vmul.f32 %v4173_v52, %v266_v57 }
 0x17f   :  { %v4175_v5 = vpop.eup %4174 }
 0x180   :  { %v5240_v15 = vadd.f32 %v847_v59, %v846_v63 }
 0x182   :  { %4176 = vtanh.f32 %v5240_v15 }
 0x18c   :  { %v4177_v23 = vpop.eup %4176 }
 0x18d   :  { %v850_v3 = vmul.f32 %v4177_v23, %v4175_v5  ;;  %v7113_v5 = vld [vmem:[#allocation20_spill] sm:$0xff] }
 0x18e   :  { %v7114_v23 = vld [vmem:[#allocation12_spill] sm:$0xff] }
 0x18f   :  { %v5243_v61 = vpack.c.bf16 %v850_v3, %v850_v3  ;;  %v7115_v3 = vld [vmem:[#allocation22_spill] sm:$0xff] }
 0x191   :  { %1077 = vmatmul.mubr.bf16.vlgmr.msra.gmra.mrb[16].mxu0 %v5243_v61  ;;  %1118 = vmatmul.mubr.bf16.vlgmr.msra.gmra.mrb[8].mxu1 %v5243_v61 }
 0x192   :  { %1163 = vmatpush1.bf16.msra.mxu0 %v4923_v26  ;;  %1204 = vmatpush1.bf16.msra.mxu1 %v4884_v8  ;;  %v244_v8 = vld [vmem:[%s6682_s9] sm:$0xf] }
 0x193   :  { %1164 = vmatprep.subr.bf16.mxu0 %v4925_v27  ;;  %1205 = vmatprep.subr.bf16.mxu1 %v4890_v12  ;;  %v7109_v12 = vsub.s32 0, %v4879_v4 }
 0x194   :  { %1194 = vmatprep.mubr.bf16.mxu0 %v7108_v1  ;;  %1235 = vmatprep.mubr.bf16.mxu1 %v7108_v1 }
 0x196   :  { %1165 = vmatpush1.bf16.msra.mxu0 %v4933_v30  ;;  %1206 = vmatpush1.bf16.msra.mxu1 %v4893_v13  ;;  %v5286_v13 = vrot.slane %v244_v8, %v7109_v12  ;;  %v7117_v12 = vld [vmem:[#allocation24_spill] sm:$0xff] }
 0x197   :  { %1166 = vmatprep.subr.bf16.mxu0 %v4941_v32  ;;  %1207 = vmatprep.subr.bf16.mxu1 %v4897_v17  ;;  %v7110_v17 = vsub.s32 2, %v4879_v4 }
 0x19a   :  { %1167 = vmatpush1.bf16.msra.mxu0 %v4948_v34  ;;  %1208 = vmatpush1.bf16.msra.mxu1 %v4904_v20  ;;  %v5290_v20 = vrot.slane %v244_v8, %v7110_v17  ;;  %v7122_v17 = vld [vmem:[#allocation16_spill] sm:$0xff] }
 0x19b   :  { %1168 = vmatprep.subr.bf16.mxu0 %v4950_v35  ;;  %1209 = vmatprep.subr.bf16.mxu1 %v4909_v22  ;;  %v7111_v22 = vsub.s32 1, %v4879_v4 }
 0x19e   :  { %1169 = vmatpush1.bf16.msra.mxu0 %v4958_v38  ;;  %1210 = vmatpush1.bf16.msra.mxu1 %v4915_v24  ;;  %v5294_v24 = vrot.slane %v244_v8, %v7111_v22  ;;  %v7123_v22 = vld [vmem:[#allocation30_spill] sm:$0xff] }
 0x19f   :  { %1170 = vmatprep.subr.bf16.mxu0 %v4966_v40  ;;  %1211 = vmatprep.subr.bf16.mxu1 %v4919_v25 }
 0x1a2   :  { %1171 = vmatpush1.bf16.msra.mxu0 %v4972_v42  ;;  %1212 = vmatpush1.bf16.msra.mxu1 %v4927_v28 }
 0x1a3   :  { %1172 = vmatprep.subr.bf16.mxu0 %v4974_v43  ;;  %1213 = vmatprep.subr.bf16.mxu1 %v4930_v29  ;;  %v7112_v43 = vsub.s32 3, %v4879_v4  ;;  %v267_v4 = vld [vmem:[%s6676_s3] sm:$0x3] }
 0x1a6   :  { %1173 = vmatpush1.bf16.msra.mxu0 %v4983_v46  ;;  %1214 = vmatpush1.bf16.msra.mxu1 %v4937_v31  ;;  %v5305_v46 = vrot.slane %v244_v8, %v7112_v43  ;;  %v7116_v8 = vld [vmem:[#allocation13_spill] sm:$0xff] }
 0x1a7   :  { %1174 = vmatprep.subr.bf16.mxu0 %v4991_v48  ;;  %1215 = vmatprep.subr.bf16.mxu1 %v4943_v33  ;;  %v7142_v43 = vld [vmem:[#allocation41_spill] sm:$0xff] }
 0x1aa   :  { %1175 = vmatpush1.bf16.msra.mxu0 %v4998_v50  ;;  %1216 = vmatpush1.bf16.msra.mxu1 %v4952_v36 }
 0x1ab   :  { %1176 = vmatprep.subr.bf16.mxu0 %v5000_v51  ;;  %1217 = vmatprep.subr.bf16.mxu1 %v4956_v37 }
 0x1ae   :  { %1177 = vmatpush1.bf16.msra.mxu0 %v5008_v54  ;;  %1218 = vmatpush1.bf16.msra.mxu1 %v4962_v39 }
 0x1af   :  { %1244 = vmatprep.subr.bf16.mxu0 %v5012_v55  ;;  %1285 = vmatprep.subr.bf16.mxu1 %v4968_v41 }
 0x264   :  { %v1078_v25 = vpop.f32.mrb[16].mxu0  ;;  %v1119_v26 = vpop.f32.mrb[8].mxu1 }
 0x265   :  { %v1079_v27 = vadd.f32 %v1078_v25, %v5221_v53  ;;  %v1120_v28 = vadd.f32 %v1119_v26, %v5217_v7  ;;  %v1080_v29 = vpop.f32.mrb[17].mxu0  ;;  %v1121_v30 = vpop.f32.mrb[9].mxu1  ;;  %v7124_v25 = vld [vmem:[#allocation17_spill] sm:$0xff]  ;;  %v7125_v26 = vld [vmem:[#allocation31_spill] sm:$0xff] }
 0x266   :  { %v1081_v31 = vadd.f32 %v1080_v29, %v5223_v6  ;;  %v1122_v32 = vadd.f32 %v1121_v30, %v5219_v21  ;;  %v1082_v33 = vpop.f32.mrb[18].mxu0  ;;  %v1123_v34 = vpop.f32.mrb[10].mxu1  ;;  %v7128_v29 = vld [vmem:[#allocation19_spill] sm:$0xff]  ;;  %v7129_v30 = vld [vmem:[#allocation33_spill] sm:$0xff] }
 0x267   :  { %v1126_v35 = vadd.f32 %v1079_v27, %v5286_v13  ;;  %v1128_v36 = vadd.f32 %v1120_v28, %v5290_v20  ;;  %v1083_v37 = vpop.f32.mrb[19].mxu0  ;;  %v1124_v38 = vpop.f32.mrb[11].mxu1  ;;  %v7126_v27 = vld [vmem:[#allocation18_spill] sm:$0xff]  ;;  %v7127_v28 = vld [vmem:[#allocation32_spill] sm:$0xff]  ;;  %v7132_v33 = vld [vmem:[#allocation23_spill] sm:$0xff] }
 0x268   :  { %v1127_v39 = vadd.f32 %v1081_v31, %v5294_v24  ;;  %v1129_v48 = vadd.f32 %v1122_v32, %v5305_v46  ;;  %v7130_v31 = vld [vmem:[#allocation21_spill] sm:$0xff]  ;;  %v7131_v32 = vld [vmem:[#allocation34_spill] sm:$0xff]  ;;  %v7133_v34 = vld [vmem:[#allocation35_spill] sm:$0xff] }
 0x269   :  { %v3856_v40 = vmul.f32 -1.442695, %v1126_v35  ;;  %v3858_v41 = vmul.f32 -1.442695, %v1128_v36  ;;  %v7134_v35 = vld [vmem:[#allocation25_spill] sm:$0xff]  ;;  %v7135_v36 = vld [vmem:[#allocation36_spill] sm:$0xff] }
 0x26a   :  { %v3857_v42 = vmul.f32 -1.442695, %v1127_v39  ;;  %v3859_v53 = vmul.f32 -1.442695, %v1129_v48  ;;  %v7136_v37 = vld [vmem:[#allocation27_spill] sm:$0xff]  ;;  %v7137_v38 = vld [vmem:[#allocation37_spill] sm:$0xff] }
 0x26b   :  { %4178 = vpow2.f32 %v3856_v40  ;;  %v7138_v39 = vld [vmem:[#allocation29_spill] sm:$0xff]  ;;  %v7139_v40 = vld [vmem:[#allocation38_spill] sm:$0xff] }
 0x26c   :  { %4180 = vpow2.f32 %v3858_v41  ;;  %v7140_v41 = vld [vmem:[#allocation39_spill] sm:$0xff]  ;;  %v7143_v48 = vld [vmem:[#allocation42_spill] sm:$0xff] }
 0x26d   :  { %4182 = vpow2.f32 %v3857_v42  ;;  %v7141_v42 = vld [vmem:[#allocation40_spill] sm:$0xff] }
 0x275   :  { %v4179_v50 = vpop.eup %4178 }
 0x276   :  { %v4181_v51 = vpop.eup %4180  ;;  %v1142_v21 = vadd.f32 1.0, %v4179_v50  ;;  %v7144_v50 = vld [vmem:[#allocation43_spill] sm:$0xff] }
 0x277   :  { %v4183_v54 = vpop.eup %4182  ;;  %v1144_v55 = vadd.f32 1.0, %v4181_v51  ;;  %v7145_v51 = vld [vmem:[#allocation44_spill] sm:$0xff] }
 0x278   :  { %v1143_v6 = vadd.f32 1.0, %v4183_v54  ;;  %v7147_v54 = vld [vmem:[#allocation46_spill] sm:$0xff] }
 0x279   :  { %4184 = vrcp.f32 %v1144_v55  ;;  %v7148_v55 = vld [vmem:[#allocation47_spill] sm:$0xff] }
 0x27a   :  { %4186 = vpow2.f32 %v3859_v53  ;;  %v7146_v53 = vld [vmem:[#allocation45_spill] sm:$0xff] }
 0x27b   :  { %4188 = vrcp.f32 %v1143_v6  ;;  %v7150_v6 = vld [vmem:[#allocation49_spill] sm:$0xff] }
 0x27c   :  { %4190 = vrcp.f32 %v1142_v21  ;;  %v7151_v21 = vld [vmem:[#allocation50_spill] sm:$0xff] }
 0x283   :  { %v4185_v7 = vpop.eup %4184 }
 0x284   :  { %v4187_v9 = vpop.eup %4186  ;;  %v1154_v18 = vmul.f32 2.0, %v4185_v7  ;;  %v7152_v7 = vld [vmem:[#allocation51_spill] sm:$0xff] }
 0x285   :  { %v4189_v14 = vpop.eup %4188  ;;  %v1145_v62 = vadd.f32 1.0, %v4187_v9  ;;  %v7153_v9 = vld [vmem:[#allocation52_spill] sm:$0xff] }
 0x286   :  { %v3860_v47 = vadd.f32 -1.0, %v1154_v18  ;;  %v4191_v0 = vpop.eup %4190  ;;  %v1156_v57 = vmul.f32 %v4189_v14, %v267_v4  ;;  %v7154_v18 = vld [vmem:[#allocation53_spill] sm:$0xff]  ;;  %v7155_v14 = vld [vmem:[#allocation54_spill] sm:$0xff]  ;;  %v7156_v4 = vld [vmem:[#allocation55_spill] sm:$0xff] }
 0x287   :  { %4192 = vrcp.f32 %v1145_v62  ;;  %v7159_v62 = vld [vmem:[#allocation58_spill] sm:$0xff] }
 0x288   :  { %v1157_v10 = vmul.f32 %v4191_v0, %v3860_v47  ;;  %v7157_v47 = vld [vmem:[#allocation56_spill] sm:$0xff]  ;;  %v7158_v0 = vld [vmem:[#allocation57_spill] sm:$0xff] }
 0x28a   :  { %v5311_v19 = vadd.f32 %v1157_v10, %v1156_v57  ;;  %v7160_v10 = vld [vmem:[#allocation59_spill] sm:$0xff]  ;;  %v7161_v57 = vld [vmem:[#allocation60_spill] sm:$0xff] }
 0x28c   :  { %4194 = vtanh.f32 %v5311_v19 }
 0x291   :  { %v4193_v52 = vpop.eup %4192 }
 0x296   :  { %v4195_v16 = vpop.eup %4194 }
 0x297   :  { %v1160_v59 = vmul.f32 %v4195_v16, %v4193_v52  ;;  %v7162_v52 = vld [vmem:[#allocation61_spill] sm:$0xff]  ;;  %v7163_v16 = vld [vmem:[#allocation62_spill] sm:$0xff] }
 0x299   :  { %v1161_v63 = vpack.c.bf16 %v1160_v59, %v1160_v59  ;;  %v7164_v59 = vld [vmem:[#allocation63_spill] sm:$0xff] }
 0x29b   :  { %1195 = vmatmul.mubr.bf16.vlgmr.msra.gmra.mrb[20].mxu0 %v1161_v63  ;;  %1236 = vmatmul.mubr.bf16.vlgmr.msra.gmra.mrb[12].mxu1 %v1161_v63  ;;  %v7165_v63 = vld [vmem:[#allocation64_spill] sm:$0xff] }
 0x29c   :  { %1245 = vmatpush1.bf16.msra.mxu0 %v5020_v58  ;;  %1286 = vmatpush1.bf16.msra.mxu1 %v4976_v44  ;;  %v7118_v58 = vld [vmem:[#allocation14_spill] sm:$0xff] }
 0x29d   :  { %1246 = vmatprep.subr.bf16.mxu0 %v5024_v60  ;;  %1287 = vmatprep.subr.bf16.mxu1 %v4980_v45  ;;  %v7119_v44 = vld [vmem:[#allocation26_spill] sm:$0xff]  ;;  %v7120_v60 = vld [vmem:[#allocation15_spill] sm:$0xff]  ;;  %v7121_v45 = vld [vmem:[#allocation28_spill] sm:$0xff] }
 0x29e   :  { %1276 = vmatprep.mubr.bf16.mxu0 %v7108_v1  ;;  %1317 = vmatprep.mubr.bf16.mxu1 %v7108_v1 }
 0x2a0   :  { %1247 = vmatpush1.bf16.msra.mxu0 %v7113_v5  ;;  %1288 = vmatpush1.bf16.msra.mxu1 %v7114_v23  ;;  %v7166_v5 = vld [vmem:[#allocation65_spill] sm:$0xff]  ;;  %v7167_v23 = vld [vmem:[#allocation66_spill] sm:$0xff] }
 0x2a1   :  { %1248 = vmatprep.subr.bf16.mxu0 %v7115_v3  ;;  %1289 = vmatprep.subr.bf16.mxu1 %v7116_v8  ;;  %v7168_v3 = vld [vmem:[#allocation67_spill] sm:$0xff]  ;;  %v7169_v8 = vld [vmem:[#allocation68_spill] sm:$0xff] }
 0x2a4   :  { %1249 = vmatpush1.bf16.msra.mxu0 %v7117_v12  ;;  %1290 = vmatpush1.bf16.msra.mxu1 %v7118_v58  ;;  %v7170_v12 = vld [vmem:[#allocation69_spill] sm:$0xff]  ;;  %v5382_v58 = vld [vmem:[#allocation7 + $0x4] ss:$16 sps:$4 sm:$0xff]  }
 0x2a5   :  { %1250 = vmatprep.subr.bf16.mxu0 %v7119_v44  ;;  %1291 = vmatprep.subr.bf16.mxu1 %v7120_v60  ;;  %7171 = vst [vmem:[#allocation20_spill] sm:$0xff] %v5382_v58  ;;  %v5385_v44 = vld [vmem:[#allocation7 + $0xc] ss:$16 sps:$4 sm:$0xff]  }
 0x2a6   :  { %7172 = vst [vmem:[#allocation12_spill] sm:$0xff] %v5385_v44 }
 0x2a8   :  { %1251 = vmatpush1.bf16.msra.mxu0 %v7121_v45  ;;  %1292 = vmatpush1.bf16.msra.mxu1 %v7122_v17 }
 0x2a9   :  { %1252 = vmatprep.subr.bf16.mxu0 %v7123_v22  ;;  %1293 = vmatprep.subr.bf16.mxu1 %v7124_v25 }
 0x2ac   :  { %1253 = vmatpush1.bf16.msra.mxu0 %v7125_v26  ;;  %1294 = vmatpush1.bf16.msra.mxu1 %v7126_v27 }
 0x2ad   :  { %1254 = vmatprep.subr.bf16.mxu0 %v7127_v28  ;;  %1295 = vmatprep.subr.bf16.mxu1 %v7128_v29 }
 0x2b0   :  { %1255 = vmatpush1.bf16.msra.mxu0 %v7129_v30  ;;  %1296 = vmatpush1.bf16.msra.mxu1 %v7130_v31 }
 0x2b1   :  { %1256 = vmatprep.subr.bf16.mxu0 %v7131_v32  ;;  %1297 = vmatprep.subr.bf16.mxu1 %v7132_v33 }
 0x2b4   :  { %1257 = vmatpush1.bf16.msra.mxu0 %v7133_v34  ;;  %1298 = vmatpush1.bf16.msra.mxu1 %v7134_v35 }
 0x2b5   :  { %1258 = vmatprep.subr.bf16.mxu0 %v7135_v36  ;;  %1299 = vmatprep.subr.bf16.mxu1 %v7136_v37 }
 0x2b8   :  { %1259 = vmatpush1.bf16.msra.mxu0 %v7137_v38  ;;  %1300 = vmatpush1.bf16.msra.mxu1 %v7138_v39 }
 0x2b9   :  { %1380 = vmatprep.subr.bf16.mxu0 %v7139_v40  ;;  %1421 = vmatprep.subr.bf16.mxu1 %v7140_v41 }
 0x2bb   :  { %1277 = vmatmul.mubr.bf16.vlgmr.msra.gmra.mrb[24].mxu0 %v5243_v61  ;;  %1318 = vmatmul.mubr.bf16.vlgmr.msra.gmra.mrb[16].mxu1 %v5243_v61  ;;  %v7149_v61 = vld [vmem:[#allocation48_spill] sm:$0xff] }
 0x2bc   :  { %1381 = vmatpush1.bf16.msra.mxu0 %v7141_v42  ;;  %1422 = vmatpush1.bf16.msra.mxu1 %v7142_v43 }
 0x2bd   :  { %1382 = vmatprep.subr.bf16.mxu0 %v7143_v48  ;;  %1423 = vmatprep.subr.bf16.mxu1 %v7144_v50 }
 0x2be   :  { %1412 = vmatprep.mubr.bf16.mxu0 %v7108_v1  ;;  %1453 = vmatprep.mubr.bf16.mxu1 %v7108_v1 }
 0x2c0   :  { %1383 = vmatpush1.bf16.msra.mxu0 %v7145_v51  ;;  %1424 = vmatpush1.bf16.msra.mxu1 %v7146_v53 }
 0x2c1   :  { %1384 = vmatprep.subr.bf16.mxu0 %v7147_v54  ;;  %1425 = vmatprep.subr.bf16.mxu1 %v7148_v55 }
 0x2c4   :  { %1385 = vmatpush1.bf16.msra.mxu0 %v7149_v61  ;;  %1426 = vmatpush1.bf16.msra.mxu1 %v7150_v6 }
 0x2c5   :  { %1386 = vmatprep.subr.bf16.mxu0 %v7151_v21  ;;  %1427 = vmatprep.subr.bf16.mxu1 %v7152_v7 }
 0x2c8   :  { %1387 = vmatpush1.bf16.msra.mxu0 %v7153_v9  ;;  %1428 = vmatpush1.bf16.msra.mxu1 %v7154_v18 }
 0x2c9   :  { %1388 = vmatprep.subr.bf16.mxu0 %v7155_v14  ;;  %1429 = vmatprep.subr.bf16.mxu1 %v7156_v4 }
 0x2cc   :  { %1389 = vmatpush1.bf16.msra.mxu0 %v7157_v47  ;;  %1430 = vmatpush1.bf16.msra.mxu1 %v7158_v0 }
 0x2cd   :  { %1390 = vmatprep.subr.bf16.mxu0 %v7159_v62  ;;  %1431 = vmatprep.subr.bf16.mxu1 %v7160_v10 }
 0x2d0   :  { %1391 = vmatpush1.bf16.msra.mxu0 %v7161_v57  ;;  %1432 = vmatpush1.bf16.msra.mxu1 %v7162_v52 }
 0x2d1   :  { %1392 = vmatprep.subr.bf16.mxu0 %v7163_v16  ;;  %1433 = vmatprep.subr.bf16.mxu1 %v7164_v59 }
 0x2d4   :  { %1393 = vmatpush1.bf16.msra.mxu0 %v7165_v63  ;;  %1434 = vmatpush1.bf16.msra.mxu1 %v7166_v5 }
 0x2d5   :  { %1394 = vmatprep.subr.bf16.mxu0 %v7167_v23  ;;  %1435 = vmatprep.subr.bf16.mxu1 %v7168_v3 }
 0x2d8   :  { %1395 = vmatpush1.bf16.msra.mxu0 %v7169_v8  ;;  %1436 = vmatpush1.bf16.msra.mxu1 %v7170_v12 }
 0x2d9   :  { %1498 = vmatprep.subr.bf16.mxu0 %v5382_v58  ;;  %1539 = vmatprep.subr.bf16.mxu1 %v5385_v44 }
 0x36e   :  { %v5388_v60 = vpop.f32.mrb[20].mxu0  ;;  %v5390_v17 = vpop.f32.mrb[12].mxu1 }
 0x36f   :  { %v5392_v25 = vpop.f32.mrb[21].mxu0  ;;  %v5394_v27 = vpop.f32.mrb[13].mxu1 }
 0x370   :  { %v1200_v29 = vpop.f32.mrb[22].mxu0  ;;  %v1241_v31 = vpop.f32.mrb[14].mxu1 }
 0x371   :  { %v1201_v33 = vpop.f32.mrb[23].mxu0  ;;  %v1242_v35 = vpop.f32.mrb[15].mxu1 }
 0x38e   :  { %v1278_v37 = vpop.f32.mrb[24].mxu0  ;;  %v1319_v39 = vpop.f32.mrb[16].mxu1 }
 0x38f   :  { %v1330_v12 = vrot.slane %v1278_v37, 6  ;;  %v1332_v58 = vrot.slane %v1319_v39, 6  ;;  %v1280_v8 = vpop.f32.mrb[25].mxu0  ;;  %v1321_v3 = vpop.f32.mrb[17].mxu1 }
 0x390   :  { %v1331_v23 = vrot.slane %v1280_v8, 6  ;;  %v1282_v44 = vpop.f32.mrb[26].mxu0  ;;  %v1323_v5 = vpop.f32.mrb[18].mxu1  ;;  %v1333_v37 = vrot.slane %v1321_v3, 6 }
 0x391   :  { %v1338_v63 = vadd.f32 %v1330_v12, %v5228_v49  ;;  %v1340_v59 = vadd.f32 %v1332_v58, %v5225_v2  ;;  %v1283_v16 = vpop.f32.mrb[27].mxu0  ;;  %v1324_v52 = vpop.f32.mrb[19].mxu1 }
 0x392   :  { %v1339_v29 = vadd.f32 %v1331_v23, %v5230_v56  ;;  %v1341_v39 = vadd.f32 %v1333_v37, %v5234_v11 }
 0x393   :  { %v3861_v31 = vmul.f32 -1.442695, %v1338_v63  ;;  %v3863_v33 = vmul.f32 -1.442695, %v1340_v59  ;;  %v1369_v63 = vrot.slane %v5240_v15, 6 }
 0x394   :  { %v3862_v35 = vmul.f32 -1.442695, %v1339_v29  ;;  %v3864_v8 = vmul.f32 -1.442695, %v1341_v39  ;;  %v5408_v15 = vld [vmem:[#allocation7] ss:$16 sps:$4 sm:$0xff]  }
 0x395   :  { %4196 = vpow2.f32 %v3861_v31 }
 0x396   :  { %4198 = vpow2.f32 %v3863_v33 }
 0x397   :  { %4200 = vpow2.f32 %v3862_v35 }
 0x398   :  { %4202 = vpow2.f32 %v3864_v8 }
 0x39f   :  { %v4197_v44 = vpop.eup %4196 }
 0x3a0   :  { %v4199_v5 = vpop.eup %4198  ;;  %v1354_v16 = vadd.f32 1.0, %v4197_v44 }
 0x3a1   :  { %v4201_v57 = vpop.eup %4200  ;;  %v1356_v12 = vadd.f32 1.0, %v4199_v5  ;;  %v5411_v5 = vld [vmem:[#allocation7 + $0x8] ss:$16 sps:$4 sm:$0xff]  }
 0x3a2   :  { %v1355_v49 = vadd.f32 1.0, %v4201_v57  ;;  %v4203_v52 = vpop.eup %4202 }
 0x3a3   :  { %4204 = vrcp.f32 %v1356_v12  ;;  %v1357_v33 = vadd.f32 1.0, %v4203_v52  ;;  %v5414_v12 = vld [vmem:[#allocation7 + $0x24] ss:$16 sps:$4 sm:$0xff]   ;;  %v5422_v52 = vld [vmem:[#allocation7 + $0x20] ss:$16 sps:$4 sm:$0xff]  }
 0x3a4   :  { %4206 = vrcp.f32 %v1355_v49  ;;  %7173 = vst [vmem:[#allocation22_spill] sm:$0xff] %v5414_v12  ;;  %7175 = vst [vmem:[#allocation24_spill] sm:$0xff] %v5422_v52 }
 0x3a5   :  { %4208 = vrcp.f32 %v1354_v16  ;;  %v5417_v16 = vld [vmem:[#allocation7 + $0x2c] ss:$16 sps:$4 sm:$0xff]  }
 0x3a6   :  { %4210 = vrcp.f32 %v1357_v33  ;;  %7174 = vst [vmem:[#allocation13_spill] sm:$0xff] %v5417_v16  ;;  %v5446_v33 = vld [vmem:[#allocation7 + $0x60] ss:$16 sps:$4 sm:$0xff]  }
 0x3a7   :  { %7183 = vst [vmem:[#allocation31_spill] sm:$0xff] %v5446_v33 }
 0x3ad   :  { %v4205_v59 = vpop.eup %4204 }
 0x3ae   :  { %v4207_v23 = vpop.eup %4206  ;;  %v1366_v3 = vmul.f32 2.0, %v4205_v59  ;;  %v5425_v59 = vld [vmem:[#allocation7 + $0x28] ss:$16 sps:$4 sm:$0xff]  }
 0x3af   :  { %v1371_v58 = vmul.f32 %v4207_v23, %v1369_v63  ;;  %v4209_v31 = vpop.eup %4208  ;;  %7176 = vst [vmem:[#allocation14_spill] sm:$0xff] %v5425_v59  ;;  %v5428_v63 = vld [vmem:[#allocation7 + $0x44] ss:$16 sps:$4 sm:$0xff]   ;;  %v5431_v23 = vld [vmem:[#allocation7 + $0x4c] ss:$16 sps:$4 sm:$0xff]  }
 0x3b0   :  { %v3865_v29 = vadd.f32 -1.0, %v1366_v3  ;;  %v4211_v57 = vpop.eup %4210  ;;  %7177 = vst [vmem:[#allocation26_spill] sm:$0xff] %v5428_v63  ;;  %7178 = vst [vmem:[#allocation15_spill] sm:$0xff] %v5431_v23  ;;  %v5434_v3 = vld [vmem:[#allocation7 + $0x40] ss:$16 sps:$4 sm:$0xff]  }
 0x3b1   :  { %7179 = vst [vmem:[#allocation28_spill] sm:$0xff] %v5434_v3 }
 0x3b2   :  { %v1372_v35 = vmul.f32 %v4209_v31, %v3865_v29  ;;  %v5440_v29 = vld [vmem:[#allocation7 + $0x64] ss:$16 sps:$4 sm:$0xff]   ;;  %v5443_v31 = vld [vmem:[#allocation7 + $0x6c] ss:$16 sps:$4 sm:$0xff]  }
 0x3b3   :  { %7181 = vst [vmem:[#allocation30_spill] sm:$0xff] %v5440_v29  ;;  %7182 = vst [vmem:[#allocation17_spill] sm:$0xff] %v5443_v31 }
 0x3b4   :  { %v5401_v37 = vadd.f32 %v1372_v35, %v1371_v58  ;;  %v5437_v58 = vld [vmem:[#allocation7 + $0x48] ss:$16 sps:$4 sm:$0xff]  }
 0x3b5   :  { %7180 = vst [vmem:[#allocation16_spill] sm:$0xff] %v5437_v58  ;;  %v5449_v35 = vld [vmem:[#allocation7 + $0x68] ss:$16 sps:$4 sm:$0xff]  }
 0x3b6   :  { %4212 = vtanh.f32 %v5401_v37  ;;  %7184 = vst [vmem:[#allocation18_spill] sm:$0xff] %v5449_v35 }
 0x3c0   :  { %v4213_v39 = vpop.eup %4212 }
 0x3c1   :  { %v1375_v49 = vmul.f32 %v4213_v39, %v4211_v57  ;;  %v5452_v57 = vld [vmem:[#allocation7 + $0x84] ss:$16 sps:$4 sm:$0xff]   ;;  %v5455_v39 = vld [vmem:[#allocation7 + $0x8c] ss:$16 sps:$4 sm:$0xff]  }
 0x3c2   :  { %7185 = vst [vmem:[#allocation32_spill] sm:$0xff] %v5452_v57  ;;  %7186 = vst [vmem:[#allocation19_spill] sm:$0xff] %v5455_v39 }
 0x3c3   :  { %v1376_v8 = vpack.c.bf16 %v1375_v49, %v1375_v49  ;;  %v5458_v49 = vld [vmem:[#allocation7 + $0x80] ss:$16 sps:$4 sm:$0xff]  }
 0x3c4   :  { %7187 = vst [vmem:[#allocation33_spill] sm:$0xff] %v5458_v49 }
 0x3c5   :  { %v5404_v44 = vrot.slane %v1376_v8, 1  ;;  %v5461_v8 = vld [vmem:[#allocation7 + $0x88] ss:$16 sps:$4 sm:$0xff]  }
 0x3c6   :  { %7188 = vst [vmem:[#allocation21_spill] sm:$0xff] %v5461_v8 }
 0x3c7   :  { %1413 = vmatmul.mubr.bf16.vlgmr.msra.gmra.mrb[28].mxu0 %v5404_v44  ;;  %1454 = vmatmul.mubr.bf16.vlgmr.msra.gmra.mrb[20].mxu1 %v5404_v44 }
 0x3c8   :  { %1499 = vmatpush1.bf16.msra.mxu0 %v5408_v15  ;;  %1540 = vmatpush1.bf16.msra.mxu1 %v5411_v5 }
 0x3c9   :  { %1500 = vmatprep.subr.bf16.mxu0 %v5414_v12  ;;  %1541 = vmatprep.subr.bf16.mxu1 %v5417_v16 }
 0x3ca   :  { %1530 = vmatprep.mubr.bf16.mxu0 %v7108_v1  ;;  %1571 = vmatprep.mubr.bf16.mxu1 %v7108_v1 }
 0x3cc   :  { %1501 = vmatpush1.bf16.msra.mxu0 %v5422_v52  ;;  %1542 = vmatpush1.bf16.msra.mxu1 %v5425_v59 }
 0x3cd   :  { %1502 = vmatprep.subr.bf16.mxu0 %v5428_v63  ;;  %1543 = vmatprep.subr.bf16.mxu1 %v5431_v23 }
 0x3d0   :  { %1503 = vmatpush1.bf16.msra.mxu0 %v5434_v3  ;;  %1544 = vmatpush1.bf16.msra.mxu1 %v5437_v58 }
 0x3d1   :  { %1504 = vmatprep.subr.bf16.mxu0 %v5440_v29  ;;  %1545 = vmatprep.subr.bf16.mxu1 %v5443_v31 }
 0x3d4   :  { %1505 = vmatpush1.bf16.msra.mxu0 %v5446_v33  ;;  %1546 = vmatpush1.bf16.msra.mxu1 %v5449_v35  ;;  %v5464_v33 = vld [vmem:[#allocation7 + $0xa4] ss:$16 sps:$4 sm:$0xff]   ;;  %v5467_v35 = vld [vmem:[#allocation7 + $0xac] ss:$16 sps:$4 sm:$0xff]  }
 0x3d5   :  { %1506 = vmatprep.subr.bf16.mxu0 %v5452_v57  ;;  %1547 = vmatprep.subr.bf16.mxu1 %v5455_v39  ;;  %7189 = vst [vmem:[#allocation34_spill] sm:$0xff] %v5464_v33  ;;  %7190 = vst [vmem:[#allocation23_spill] sm:$0xff] %v5467_v35  ;;  %v5470_v57 = vld [vmem:[#allocation7 + $0xa0] ss:$16 sps:$4 sm:$0xff]   ;;  %v5473_v39 = vld [vmem:[#allocation7 + $0xa8] ss:$16 sps:$4 sm:$0xff]  }
 0x3d6   :  { %7191 = vst [vmem:[#allocation35_spill] sm:$0xff] %v5470_v57  ;;  %7192 = vst [vmem:[#allocation25_spill] sm:$0xff] %v5473_v39 }
 0x3d8   :  { %1507 = vmatpush1.bf16.msra.mxu0 %v5458_v49  ;;  %1548 = vmatpush1.bf16.msra.mxu1 %v5461_v8  ;;  %v5476_v49 = vld [vmem:[#allocation7 + $0xc4] ss:$16 sps:$4 sm:$0xff]   ;;  %v5479_v8 = vld [vmem:[#allocation7 + $0xcc] ss:$16 sps:$4 sm:$0xff]  }
 0x3d9   :  { %1508 = vmatprep.subr.bf16.mxu0 %v5464_v33  ;;  %1549 = vmatprep.subr.bf16.mxu1 %v5467_v35  ;;  %7193 = vst [vmem:[#allocation36_spill] sm:$0xff] %v5476_v49  ;;  %7194 = vst [vmem:[#allocation27_spill] sm:$0xff] %v5479_v8  ;;  %v5482_v33 = vld [vmem:[#allocation7 + $0xc0] ss:$16 sps:$4 sm:$0xff]   ;;  %v5485_v35 = vld [vmem:[#allocation7 + $0xc8] ss:$16 sps:$4 sm:$0xff]  }
 0x3da   :  { %7195 = vst [vmem:[#allocation37_spill] sm:$0xff] %v5482_v33  ;;  %7196 = vst [vmem:[#allocation29_spill] sm:$0xff] %v5485_v35 }
 0x3dc   :  { %1509 = vmatpush1.bf16.msra.mxu0 %v5470_v57  ;;  %1550 = vmatpush1.bf16.msra.mxu1 %v5473_v39  ;;  %v5488_v57 = vld [vmem:[#allocation7 + $0xe4] ss:$16 sps:$4 sm:$0xff]   ;;  %v5491_v39 = vld [vmem:[#allocation7 + $0xec] ss:$16 sps:$4 sm:$0xff]  }
 0x3dd   :  { %1510 = vmatprep.subr.bf16.mxu0 %v5476_v49  ;;  %1551 = vmatprep.subr.bf16.mxu1 %v5479_v8  ;;  %7197 = vst [vmem:[#allocation38_spill] sm:$0xff] %v5488_v57  ;;  %7198 = vst [vmem:[#allocation39_spill] sm:$0xff] %v5491_v39  ;;  %v5494_v49 = vld [vmem:[#allocation7 + $0xe0] ss:$16 sps:$4 sm:$0xff]   ;;  %v5497_v8 = vld [vmem:[#allocation7 + $0xe8] ss:$16 sps:$4 sm:$0xff]  }
 0x3de   :  { %7199 = vst [vmem:[#allocation40_spill] sm:$0xff] %v5494_v49  ;;  %7200 = vst [vmem:[#allocation41_spill] sm:$0xff] %v5497_v8 }
 0x3e0   :  { %1511 = vmatpush1.bf16.msra.mxu0 %v5482_v33  ;;  %1552 = vmatpush1.bf16.msra.mxu1 %v5485_v35  ;;  %v5500_v33 = vld [vmem:[#allocation2 + $0x4] ss:$16 sps:$4 sm:$0xff]   ;;  %v5503_v35 = vld [vmem:[#allocation2 + $0xc] ss:$16 sps:$4 sm:$0xff]  }
 0x3e1   :  { %1512 = vmatprep.subr.bf16.mxu0 %v5488_v57  ;;  %1553 = vmatprep.subr.bf16.mxu1 %v5491_v39  ;;  %7201 = vst [vmem:[#allocation42_spill] sm:$0xff] %v5500_v33  ;;  %7202 = vst [vmem:[#allocation43_spill] sm:$0xff] %v5503_v35 }
 0x3e4   :  { %1513 = vmatpush1.bf16.msra.mxu0 %v5494_v49  ;;  %1554 = vmatpush1.bf16.msra.mxu1 %v5497_v8 }
 0x3e5   :  { %1580 = vmatprep.subr.bf16.mxu0 %v5500_v33  ;;  %1621 = vmatprep.subr.bf16.mxu1 %v5503_v35 }
 0x49a   :  { %v1414_v57 = vpop.f32.mrb[28].mxu0  ;;  %v1455_v31 = vpop.f32.mrb[20].mxu1 }
 0x49b   :  { %v1415_v39 = vadd.f32 %v1414_v57, %v5388_v60  ;;  %v1456_v29 = vadd.f32 %v1455_v31, %v5390_v17  ;;  %v1416_v58 = vpop.f32.mrb[29].mxu0  ;;  %v1457_v49 = vpop.f32.mrb[21].mxu1 }
 0x49c   :  { %v1417_v3 = vadd.f32 %v1416_v58, %v5392_v25  ;;  %v1458_v8 = vadd.f32 %v1457_v49, %v5394_v27  ;;  %v1418_v23 = vpop.f32.mrb[30].mxu0  ;;  %v1459_v63 = vpop.f32.mrb[22].mxu1 }
 0x49d   :  { %v1462_v33 = vadd.f32 %v1415_v39, %v5286_v13  ;;  %v1464_v59 = vadd.f32 %v1456_v29, %v5290_v20  ;;  %v1419_v52 = vpop.f32.mrb[31].mxu0  ;;  %v1460_v35 = vpop.f32.mrb[23].mxu1 }
 0x49e   :  { %v1463_v16 = vadd.f32 %v1417_v3, %v5294_v24  ;;  %v1465_v17 = vadd.f32 %v1458_v8, %v5305_v46 }
 0x49f   :  { %v3866_v12 = vmul.f32 -1.442695, %v1462_v33  ;;  %v3868_v60 = vmul.f32 -1.442695, %v1464_v59 }
 0x4a0   :  { %v3867_v57 = vmul.f32 -1.442695, %v1463_v16  ;;  %v3869_v23 = vmul.f32 -1.442695, %v1465_v17 }
 0x4a1   :  { %4214 = vpow2.f32 %v3866_v12 }
 0x4a2   :  { %4216 = vpow2.f32 %v3868_v60 }
 0x4a3   :  { %4218 = vpow2.f32 %v3867_v57 }
 0x4ab   :  { %v4215_v25 = vpop.eup %4214 }
 0x4ac   :  { %v4217_v27 = vpop.eup %4216  ;;  %v1478_v39 = vadd.f32 1.0, %v4215_v25 }
 0x4ad   :  { %v4219_v63 = vpop.eup %4218  ;;  %v1480_v58 = vadd.f32 1.0, %v4217_v27  ;;  %v5518_v27 = vld [vmem:[#allocation2] ss:$16 sps:$4 sm:$0xff]  }
 0x4ae   :  { %v1479_v31 = vadd.f32 1.0, %v4219_v63  ;;  %v5527_v63 = vld [vmem:[#allocation2 + $0x2c] ss:$16 sps:$4 sm:$0xff]  }
 0x4af   :  { %4220 = vrcp.f32 %v1480_v58  ;;  %v5532_v58 = vld [vmem:[#allocation2 + $0x20] ss:$16 sps:$4 sm:$0xff]  }
 0x4b0   :  { %4222 = vpow2.f32 %v3869_v23  ;;  %v5521_v23 = vld [vmem:[#allocation2 + $0x8] ss:$16 sps:$4 sm:$0xff]  }
 0x4b1   :  { %4224 = vrcp.f32 %v1479_v31  ;;  %v5535_v31 = vld [vmem:[#allocation2 + $0x28] ss:$16 sps:$4 sm:$0xff]  }
 0x4b2   :  { %4226 = vrcp.f32 %v1478_v39  ;;  %v5538_v39 = vld [vmem:[#allocation2 + $0x44] ss:$16 sps:$4 sm:$0xff]  }
 0x4b9   :  { %v4221_v52 = vpop.eup %4220 }
 0x4ba   :  { %v4223_v3 = vpop.eup %4222  ;;  %v1490_v59 = vmul.f32 2.0, %v4221_v52  ;;  %v5541_v52 = vld [vmem:[#allocation2 + $0x4c] ss:$16 sps:$4 sm:$0xff]  }
 0x4bb   :  { %v4225_v16 = vpop.eup %4224  ;;  %v1481_v33 = vadd.f32 1.0, %v4223_v3  ;;  %v5544_v3 = vld [vmem:[#allocation2 + $0x40] ss:$16 sps:$4 sm:$0xff]  }
 0x4bc   :  { %v3870_v12 = vadd.f32 -1.0, %v1490_v59  ;;  %v4227_v29 = vpop.eup %4226  ;;  %v1492_v49 = vmul.f32 %v4225_v16, %v5311_v19  ;;  %v5524_v19 = vld [vmem:[#allocation2 + $0x24] ss:$16 sps:$4 sm:$0xff]   ;;  %v5547_v59 = vld [vmem:[#allocation2 + $0x48] ss:$16 sps:$4 sm:$0xff]  }
 0x4bd   :  { %4228 = vrcp.f32 %v1481_v33  ;;  %v5550_v16 = vld [vmem:[#allocation2 + $0x64] ss:$16 sps:$4 sm:$0xff]   ;;  %v5561_v33 = vld [vmem:[#allocation2 + $0x8c] ss:$16 sps:$4 sm:$0xff]  }
 0x4be   :  { %v1493_v35 = vmul.f32 %v4227_v29, %v3870_v12  ;;  %v5553_v12 = vld [vmem:[#allocation2 + $0x6c] ss:$16 sps:$4 sm:$0xff]   ;;  %v5557_v29 = vld [vmem:[#allocation2 + $0x68] ss:$16 sps:$4 sm:$0xff]  }
 0x4c0   :  { %v5515_v8 = vadd.f32 %v1493_v35, %v1492_v49  ;;  %v5565_v35 = vld [vmem:[#allocation2 + $0x88] ss:$16 sps:$4 sm:$0xff]   ;;  %v5569_v49 = vld [vmem:[#allocation2 + $0xac] ss:$16 sps:$4 sm:$0xff]  }
 0x4c2   :  { %4230 = vtanh.f32 %v5515_v8 }
 0x4c7   :  { %v4229_v60 = vpop.eup %4228 }
 0x4cc   :  { %v4231_v57 = vpop.eup %4230 }
 0x4cd   :  { %v1496_v17 = vmul.f32 %v4231_v57, %v4229_v60 }
 0x4cf   :  { %v1497_v25 = vpack.c.bf16 %v1496_v17, %v1496_v17  ;;  %v7219_v17 = vld [vmem:[#allocation74_spill] sm:$0xff] }
 0x4d1   :  { %1531 = vmatmul.mubr.bf16.vlgmr.msra.gmra.mrb[32].mxu0 %v1497_v25  ;;  %1572 = vmatmul.mubr.bf16.vlgmr.msra.gmra.mrb[24].mxu1 %v1497_v25 }
 0x4d2   :  { %1581 = vmatpush1.bf16.msra.mxu0 %v5518_v27  ;;  %1622 = vmatpush1.bf16.msra.mxu1 %v5521_v23 }
 0x4d3   :  { %1582 = vmatprep.subr.bf16.mxu0 %v5524_v19  ;;  %1623 = vmatprep.subr.bf16.mxu1 %v5527_v63 }
 0x4d4   :  { %1612 = vmatprep.mubr.bf16.mxu0 %v7108_v1  ;;  %1653 = vmatprep.mubr.bf16.mxu1 %v7108_v1 }
 0x4d6   :  { %1583 = vmatpush1.bf16.msra.mxu0 %v5532_v58  ;;  %1624 = vmatpush1.bf16.msra.mxu1 %v5535_v31 }
 0x4d7   :  { %1584 = vmatprep.subr.bf16.mxu0 %v5538_v39  ;;  %1625 = vmatprep.subr.bf16.mxu1 %v5541_v52 }
 0x4da   :  { %1585 = vmatpush1.bf16.msra.mxu0 %v5544_v3  ;;  %1626 = vmatpush1.bf16.msra.mxu1 %v5547_v59 }
 0x4db   :  { %1586 = vmatprep.subr.bf16.mxu0 %v5550_v16  ;;  %1627 = vmatprep.subr.bf16.mxu1 %v5553_v12 }
 0x4de   :  { %1587 = vmatpush1.bf16.msra.mxu0 %v7121_v45  ;;  %1628 = vmatpush1.bf16.msra.mxu1 %v5557_v29  ;;  %v5573_v45 = vld [vmem:[#allocation2 + $0xa8] ss:$16 sps:$4 sm:$0xff]  }
 0x4df   :  { %1588 = vmatprep.subr.bf16.mxu0 %v7123_v22  ;;  %1629 = vmatprep.subr.bf16.mxu1 %v5561_v33  ;;  %v5577_v22 = vld [vmem:[#allocation2 + $0xcc] ss:$16 sps:$4 sm:$0xff]  }
 0x4e0   :  { %7203 = vst [vmem:[#allocation44_spill] sm:$0xff] %v5577_v22 }
 0x4e2   :  { %1589 = vmatpush1.bf16.msra.mxu0 %v7125_v26  ;;  %1630 = vmatpush1.bf16.msra.mxu1 %v5565_v35  ;;  %v5581_v26 = vld [vmem:[#allocation2 + $0xc8] ss:$16 sps:$4 sm:$0xff]  }
 0x4e3   :  { %1590 = vmatprep.subr.bf16.mxu0 %v7127_v28  ;;  %1631 = vmatprep.subr.bf16.mxu1 %v5569_v49  ;;  %7204 = vst [vmem:[#allocation45_spill] sm:$0xff] %v5581_v26  ;;  %v5585_v28 = vld [vmem:[#allocation2 + $0xec] ss:$16 sps:$4 sm:$0xff]  }
 0x4e4   :  { %7205 = vst [vmem:[#allocation46_spill] sm:$0xff] %v5585_v28 }
 0x4e6   :  { %1591 = vmatpush1.bf16.msra.mxu0 %v7129_v30  ;;  %1632 = vmatpush1.bf16.msra.mxu1 %v5573_v45  ;;  %v5589_v30 = vld [vmem:[#allocation2 + $0xe8] ss:$16 sps:$4 sm:$0xff]  }
 0x4e7   :  { %1592 = vmatprep.subr.bf16.mxu0 %v7131_v32  ;;  %1633 = vmatprep.subr.bf16.mxu1 %v5577_v22  ;;  %7206 = vst [vmem:[#allocation47_spill] sm:$0xff] %v5589_v30  ;;  %v7207_v32 = vld [vmem:[#allocation60_spill] sm:$0xff] }
 0x4ea   :  { %1593 = vmatpush1.bf16.msra.mxu0 %v7133_v34  ;;  %1634 = vmatpush1.bf16.msra.mxu1 %v5581_v26  ;;  %v7208_v34 = vld [vmem:[#allocation61_spill] sm:$0xff] }
 0x4eb   :  { %1594 = vmatprep.subr.bf16.mxu0 %v7135_v36  ;;  %1635 = vmatprep.subr.bf16.mxu1 %v5585_v28  ;;  %v7209_v36 = vld [vmem:[#allocation62_spill] sm:$0xff] }
 0x4ee   :  { %1595 = vmatpush1.bf16.msra.mxu0 %v7137_v38  ;;  %1636 = vmatpush1.bf16.msra.mxu1 %v5589_v30  ;;  %v7210_v38 = vld [vmem:[#allocation63_spill] sm:$0xff] }
 0x4ef   :  { %1716 = vmatprep.subr.bf16.mxu0 %v7139_v40  ;;  %1757 = vmatprep.subr.bf16.mxu1 %v7140_v41  ;;  %v7211_v40 = vld [vmem:[#allocation64_spill] sm:$0xff]  ;;  %v7212_v41 = vld [vmem:[#allocation65_spill] sm:$0xff] }
 0x4f1   :  { %1613 = vmatmul.mubr.bf16.vlgmr.msra.gmra.mrb[36].mxu0 %v5404_v44  ;;  %1654 = vmatmul.mubr.bf16.vlgmr.msra.gmra.mrb[28].mxu1 %v5404_v44 }
 0x4f2   :  { %1717 = vmatpush1.bf16.msra.mxu0 %v7141_v42  ;;  %1758 = vmatpush1.bf16.msra.mxu1 %v7142_v43  ;;  %v7213_v42 = vld [vmem:[#allocation66_spill] sm:$0xff]  ;;  %v7214_v43 = vld [vmem:[#allocation67_spill] sm:$0xff] }
 0x4f3   :  { %1718 = vmatprep.subr.bf16.mxu0 %v7143_v48  ;;  %1759 = vmatprep.subr.bf16.mxu1 %v7144_v50  ;;  %v7215_v48 = vld [vmem:[#allocation68_spill] sm:$0xff]  ;;  %v7216_v50 = vld [vmem:[#allocation69_spill] sm:$0xff] }
 0x4f4   :  { %1748 = vmatprep.mubr.bf16.mxu0 %v7108_v1  ;;  %1789 = vmatprep.mubr.bf16.mxu1 %v7108_v1 }
 0x4f6   :  { %1719 = vmatpush1.bf16.msra.mxu0 %v7145_v51  ;;  %1760 = vmatpush1.bf16.msra.mxu1 %v7146_v53  ;;  %v7217_v51 = vld [vmem:[#allocation20_spill] sm:$0xff] }
 0x4f7   :  { %1720 = vmatprep.subr.bf16.mxu0 %v7147_v54  ;;  %1761 = vmatprep.subr.bf16.mxu1 %v7148_v55  ;;  %v7218_v53 = vld [vmem:[#allocation12_spill] sm:$0xff] }
 0x4fa   :  { %1721 = vmatpush1.bf16.msra.mxu0 %v7149_v61  ;;  %1762 = vmatpush1.bf16.msra.mxu1 %v7150_v6 }
 0x4fb   :  { %1722 = vmatprep.subr.bf16.mxu0 %v7151_v21  ;;  %1763 = vmatprep.subr.bf16.mxu1 %v7152_v7 }
 0x4fe   :  { %1723 = vmatpush1.bf16.msra.mxu0 %v7153_v9  ;;  %1764 = vmatpush1.bf16.msra.mxu1 %v7154_v18 }
 0x4ff   :  { %1724 = vmatprep.subr.bf16.mxu0 %v7155_v14  ;;  %1765 = vmatprep.subr.bf16.mxu1 %v7156_v4 }
 0x502   :  { %1725 = vmatpush1.bf16.msra.mxu0 %v7157_v47  ;;  %1766 = vmatpush1.bf16.msra.mxu1 %v7158_v0 }
 0x503   :  { %1726 = vmatprep.subr.bf16.mxu0 %v7159_v62  ;;  %1767 = vmatprep.subr.bf16.mxu1 %v7160_v10 }
 0x506   :  { %1727 = vmatpush1.bf16.msra.mxu0 %v7207_v32  ;;  %1768 = vmatpush1.bf16.msra.mxu1 %v7208_v34 }
 0x507   :  { %1728 = vmatprep.subr.bf16.mxu0 %v7209_v36  ;;  %1769 = vmatprep.subr.bf16.mxu1 %v7210_v38 }
 0x50a   :  { %1729 = vmatpush1.bf16.msra.mxu0 %v7211_v40  ;;  %1770 = vmatpush1.bf16.msra.mxu1 %v7212_v41 }
 0x50b   :  { %1730 = vmatprep.subr.bf16.mxu0 %v7213_v42  ;;  %1771 = vmatprep.subr.bf16.mxu1 %v7214_v43 }
 0x50e   :  { %1731 = vmatpush1.bf16.msra.mxu0 %v7215_v48  ;;  %1772 = vmatpush1.bf16.msra.mxu1 %v7216_v50 }
 0x50f   :  { %1834 = vmatprep.subr.bf16.mxu0 %v7217_v51  ;;  %1875 = vmatprep.subr.bf16.mxu1 %v7218_v53 }
 0x5a4   :  { %v5630_v54 = vpop.f32.mrb[32].mxu0  ;;  %v5632_v55 = vpop.f32.mrb[24].mxu1 }
 0x5a5   :  { %v5634_v61 = vpop.f32.mrb[33].mxu0  ;;  %v5636_v6 = vpop.f32.mrb[25].mxu1 }
 0x5a6   :  { %v1536_v21 = vpop.f32.mrb[34].mxu0  ;;  %v1577_v7 = vpop.f32.mrb[26].mxu1 }
 0x5a7   :  { %v1537_v9 = vpop.f32.mrb[35].mxu0  ;;  %v1578_v18 = vpop.f32.mrb[27].mxu1 }
 0x5c4   :  { %v1614_v14 = vpop.f32.mrb[36].mxu0  ;;  %v1655_v4 = vpop.f32.mrb[28].mxu1 }
 0x5c5   :  { %v1666_v47 = vrot.slane %v1614_v14, 4  ;;  %v1668_v0 = vrot.slane %v1655_v4, 4  ;;  %v1616_v62 = vpop.f32.mrb[37].mxu0  ;;  %v1657_v10 = vpop.f32.mrb[29].mxu1 }
 0x5c6   :  { %v1667_v44 = vrot.slane %v1616_v62, 4  ;;  %v1618_v60 = vpop.f32.mrb[38].mxu0  ;;  %v1659_v57 = vpop.f32.mrb[30].mxu1  ;;  %v1669_v43 = vrot.slane %v1657_v10, 4  ;;  %v1705_v62 = vrot.slane %v5401_v37, 6  ;;  %v7220_v37 = vld [vmem:[#allocation22_spill] sm:$0xff] }
 0x5c7   :  { %v1674_v25 = vadd.f32 %v1666_v47, %v7219_v17  ;;  %v1676_v32 = vadd.f32 %v1668_v0, %v5225_v2  ;;  %v1619_v34 = vpop.f32.mrb[39].mxu0  ;;  %v1660_v36 = vpop.f32.mrb[31].mxu1 }
 0x5c8   :  { %v1675_v38 = vadd.f32 %v1667_v44, %v5230_v56  ;;  %v1677_v48 = vadd.f32 %v1669_v43, %v5234_v11 }
 0x5c9   :  { %v3871_v40 = vmul.f32 -1.442695, %v1674_v25  ;;  %v3873_v41 = vmul.f32 -1.442695, %v1676_v32 }
 0x5ca   :  { %v3872_v42 = vmul.f32 -1.442695, %v1675_v38  ;;  %v3874_v50 = vmul.f32 -1.442695, %v1677_v48  ;;  %v7221_v48 = vld [vmem:[#allocation13_spill] sm:$0xff] }
 0x5cb   :  { %4232 = vpow2.f32 %v3871_v40 }
 0x5cc   :  { %4234 = vpow2.f32 %v3873_v41 }
 0x5cd   :  { %4236 = vpow2.f32 %v3872_v42 }
 0x5ce   :  { %4238 = vpow2.f32 %v3874_v50  ;;  %v7222_v50 = vld [vmem:[#allocation24_spill] sm:$0xff] }
 0x5d5   :  { %v4233_v21 = vpop.eup %4232 }
 0x5d6   :  { %v4235_v7 = vpop.eup %4234  ;;  %v1690_v4 = vadd.f32 1.0, %v4233_v21  ;;  %v7223_v21 = vld [vmem:[#allocation14_spill] sm:$0xff] }
 0x5d7   :  { %v4237_v9 = vpop.eup %4236  ;;  %v1692_v18 = vadd.f32 1.0, %v4235_v7  ;;  %v7224_v7 = vld [vmem:[#allocation26_spill] sm:$0xff] }
 0x5d8   :  { %v1691_v14 = vadd.f32 1.0, %v4237_v9  ;;  %v4239_v47 = vpop.eup %4238  ;;  %v7225_v9 = vld [vmem:[#allocation15_spill] sm:$0xff] }
 0x5d9   :  { %4240 = vrcp.f32 %v1692_v18  ;;  %v1693_v32 = vadd.f32 1.0, %v4239_v47  ;;  %v7226_v18 = vld [vmem:[#allocation28_spill] sm:$0xff]  ;;  %v7229_v47 = vld [vmem:[#allocation17_spill] sm:$0xff] }
 0x5da   :  { %4242 = vrcp.f32 %v1691_v14  ;;  %v7227_v14 = vld [vmem:[#allocation16_spill] sm:$0xff] }
 0x5db   :  { %4244 = vrcp.f32 %v1690_v4  ;;  %v7228_v4 = vld [vmem:[#allocation30_spill] sm:$0xff] }
 0x5dc   :  { %4246 = vrcp.f32 %v1693_v32  ;;  %v7237_v32 = vld [vmem:[#allocation23_spill] sm:$0xff] }
 0x5e3   :  { %v4241_v0 = vpop.eup %4240 }
 0x5e4   :  { %v4243_v44 = vpop.eup %4242  ;;  %v1702_v10 = vmul.f32 2.0, %v4241_v0  ;;  %v7230_v0 = vld [vmem:[#allocation31_spill] sm:$0xff] }
 0x5e5   :  { %v1707_v60 = vmul.f32 %v4243_v44, %v1705_v62  ;;  %v4245_v25 = vpop.eup %4244  ;;  %v7231_v62 = vld [vmem:[#allocation18_spill] sm:$0xff]  ;;  %v7232_v44 = vld [vmem:[#allocation32_spill] sm:$0xff] }
 0x5e6   :  { %v3875_v57 = vadd.f32 -1.0, %v1702_v10  ;;  %v4247_v38 = vpop.eup %4246  ;;  %v7233_v10 = vld [vmem:[#allocation19_spill] sm:$0xff] }
 0x5e8   :  { %v1708_v34 = vmul.f32 %v4245_v25, %v3875_v57  ;;  %v7235_v57 = vld [vmem:[#allocation21_spill] sm:$0xff]  ;;  %v7236_v25 = vld [vmem:[#allocation34_spill] sm:$0xff] }
 0x5ea   :  { %v5643_v36 = vadd.f32 %v1708_v34, %v1707_v60  ;;  %v7234_v60 = vld [vmem:[#allocation33_spill] sm:$0xff]  ;;  %v7238_v34 = vld [vmem:[#allocation35_spill] sm:$0xff] }
 0x5ec   :  { %4248 = vtanh.f32 %v5643_v36 }
 0x5f6   :  { %v4249_v40 = vpop.eup %4248 }
 0x5f7   :  { %v1711_v41 = vmul.f32 %v4249_v40, %v4247_v38  ;;  %v7239_v38 = vld [vmem:[#allocation25_spill] sm:$0xff]  ;;  %v7240_v40 = vld [vmem:[#allocation36_spill] sm:$0xff] }
 0x5f9   :  { %v1712_v42 = vpack.c.bf16 %v1711_v41, %v1711_v41  ;;  %v7241_v41 = vld [vmem:[#allocation27_spill] sm:$0xff] }
 0x5fb   :  { %v5646_v43 = vrot.slane %v1712_v42, 2  ;;  %v7242_v42 = vld [vmem:[#allocation37_spill] sm:$0xff] }
 0x5fd   :  { %1749 = vmatmul.mubr.bf16.vlgmr.msra.gmra.mrb[40].mxu0 %v5646_v43  ;;  %1790 = vmatmul.mubr.bf16.vlgmr.msra.gmra.mrb[32].mxu1 %v5646_v43 }
 0x5fe   :  { %1835 = vmatpush1.bf16.msra.mxu0 %v5408_v15  ;;  %1876 = vmatpush1.bf16.msra.mxu1 %v5411_v5 }
 0x5ff   :  { %1836 = vmatprep.subr.bf16.mxu0 %v7220_v37  ;;  %1877 = vmatprep.subr.bf16.mxu1 %v7221_v48 }
 0x600   :  { %1866 = vmatprep.mubr.bf16.mxu0 %v7108_v1  ;;  %1907 = vmatprep.mubr.bf16.mxu1 %v7108_v1 }
 0x602   :  { %1837 = vmatpush1.bf16.msra.mxu0 %v7222_v50  ;;  %1878 = vmatpush1.bf16.msra.mxu1 %v7223_v21 }
 0x603   :  { %1838 = vmatprep.subr.bf16.mxu0 %v7224_v7  ;;  %1879 = vmatprep.subr.bf16.mxu1 %v7225_v9 }
 0x606   :  { %1839 = vmatpush1.bf16.msra.mxu0 %v7226_v18  ;;  %1880 = vmatpush1.bf16.msra.mxu1 %v7227_v14 }
 0x607   :  { %1840 = vmatprep.subr.bf16.mxu0 %v7228_v4  ;;  %1881 = vmatprep.subr.bf16.mxu1 %v7229_v47 }
 0x60a   :  { %1841 = vmatpush1.bf16.msra.mxu0 %v7230_v0  ;;  %1882 = vmatpush1.bf16.msra.mxu1 %v7231_v62 }
 0x60b   :  { %1842 = vmatprep.subr.bf16.mxu0 %v7232_v44  ;;  %1883 = vmatprep.subr.bf16.mxu1 %v7233_v10  ;;  %v7243_v44 = vld [vmem:[#allocation29_spill] sm:$0xff]  ;;  %v7244_v10 = vld [vmem:[#allocation38_spill] sm:$0xff] }
 0x60e   :  { %1843 = vmatpush1.bf16.msra.mxu0 %v7234_v60  ;;  %1884 = vmatpush1.bf16.msra.mxu1 %v7235_v57  ;;  %v7245_v60 = vld [vmem:[#allocation39_spill] sm:$0xff]  ;;  %v7246_v57 = vld [vmem:[#allocation40_spill] sm:$0xff] }
 0x60f   :  { %1844 = vmatprep.subr.bf16.mxu0 %v7236_v25  ;;  %1885 = vmatprep.subr.bf16.mxu1 %v7237_v32  ;;  %v7247_v25 = vld [vmem:[#allocation41_spill] sm:$0xff]  ;;  %v7248_v32 = vld [vmem:[#allocation42_spill] sm:$0xff] }
 0x612   :  { %1845 = vmatpush1.bf16.msra.mxu0 %v7238_v34  ;;  %1886 = vmatpush1.bf16.msra.mxu1 %v7239_v38  ;;  %v7249_v34 = vld [vmem:[#allocation43_spill] sm:$0xff] }
 0x613   :  { %1846 = vmatprep.subr.bf16.mxu0 %v7240_v40  ;;  %1887 = vmatprep.subr.bf16.mxu1 %v7241_v41 }
 0x616   :  { %1847 = vmatpush1.bf16.msra.mxu0 %v7242_v42  ;;  %1888 = vmatpush1.bf16.msra.mxu1 %v7243_v44 }
 0x617   :  { %1848 = vmatprep.subr.bf16.mxu0 %v7244_v10  ;;  %1889 = vmatprep.subr.bf16.mxu1 %v7245_v60 }
 0x61a   :  { %1849 = vmatpush1.bf16.msra.mxu0 %v7246_v57  ;;  %1890 = vmatpush1.bf16.msra.mxu1 %v7247_v25 }
 0x61b   :  { %1916 = vmatprep.subr.bf16.mxu0 %v7248_v32  ;;  %1957 = vmatprep.subr.bf16.mxu1 %v7249_v34 }
 0x6d0   :  { %v1750_v38 = vpop.f32.mrb[40].mxu0  ;;  %v1791_v40 = vpop.f32.mrb[32].mxu1 }
 0x6d1   :  { %v1751_v41 = vadd.f32 %v1750_v38, %v5630_v54  ;;  %v1792_v42 = vadd.f32 %v1791_v40, %v5632_v55  ;;  %v1752_v62 = vpop.f32.mrb[41].mxu0  ;;  %v1793_v44 = vpop.f32.mrb[33].mxu1 }
 0x6d2   :  { %v1753_v10 = vadd.f32 %v1752_v62, %v5634_v61  ;;  %v1794_v60 = vadd.f32 %v1793_v44, %v5636_v6  ;;  %v1754_v0 = vpop.f32.mrb[42].mxu0  ;;  %v1795_v57 = vpop.f32.mrb[34].mxu1 }
 0x6d3   :  { %v1798_v25 = vadd.f32 %v1751_v41, %v5286_v13  ;;  %v1800_v32 = vadd.f32 %v1792_v42, %v5290_v20  ;;  %v1755_v47 = vpop.f32.mrb[43].mxu0  ;;  %v1796_v34 = vpop.f32.mrb[35].mxu1 }
 0x6d4   :  { %v1799_v4 = vadd.f32 %v1753_v10, %v5294_v24  ;;  %v1801_v55 = vadd.f32 %v1794_v60, %v5305_v46 }
 0x6d5   :  { %v3876_v14 = vmul.f32 -1.442695, %v1798_v25  ;;  %v3878_v54 = vmul.f32 -1.442695, %v1800_v32 }
 0x6d6   :  { %v3877_v38 = vmul.f32 -1.442695, %v1799_v4  ;;  %v3879_v0 = vmul.f32 -1.442695, %v1801_v55 }
 0x6d7   :  { %4250 = vpow2.f32 %v3876_v14 }
 0x6d8   :  { %4252 = vpow2.f32 %v3878_v54 }
 0x6d9   :  { %4254 = vpow2.f32 %v3877_v38 }
 0x6e1   :  { %v4251_v61 = vpop.eup %4250 }
 0x6e2   :  { %v4253_v6 = vpop.eup %4252  ;;  %v1814_v40 = vadd.f32 1.0, %v4251_v61 }
 0x6e3   :  { %v4255_v62 = vpop.eup %4254  ;;  %v1816_v44 = vadd.f32 1.0, %v4253_v6  ;;  %v5714_v6 = vld [vmem:[#allocation2 + $0x84] ss:$16 sps:$4 sm:$0xff]  }
 0x6e4   :  { %v1815_v57 = vadd.f32 1.0, %v4255_v62  ;;  %v5722_v62 = vld [vmem:[#allocation2 + $0xa4] ss:$16 sps:$4 sm:$0xff]  }
 0x6e5   :  { %4256 = vrcp.f32 %v1816_v44  ;;  %v5726_v44 = vld [vmem:[#allocation2 + $0xa0] ss:$16 sps:$4 sm:$0xff]  }
 0x6e6   :  { %4258 = vpow2.f32 %v3879_v0  ;;  %v5718_v0 = vld [vmem:[#allocation2 + $0x80] ss:$16 sps:$4 sm:$0xff]  }
 0x6e7   :  { %4260 = vrcp.f32 %v1815_v57  ;;  %v5730_v57 = vld [vmem:[#allocation2 + $0xc4] ss:$16 sps:$4 sm:$0xff]  }
 0x6e8   :  { %4262 = vrcp.f32 %v1814_v40  ;;  %7250 = vst [vmem:[#allocation48_spill] sm:$0xff] %v5730_v57  ;;  %v5734_v40 = vld [vmem:[#allocation2 + $0xc0] ss:$16 sps:$4 sm:$0xff]  }
 0x6e9   :  { %7251 = vst [vmem:[#allocation49_spill] sm:$0xff] %v5734_v40 }
 0x6ef   :  { %v4257_v47 = vpop.eup %4256 }
 0x6f0   :  { %v4259_v10 = vpop.eup %4258  ;;  %v1826_v25 = vmul.f32 2.0, %v4257_v47  ;;  %v5738_v47 = vld [vmem:[#allocation2 + $0xe4] ss:$16 sps:$4 sm:$0xff]  }
 0x6f1   :  { %v4261_v4 = vpop.eup %4260  ;;  %v1817_v34 = vadd.f32 1.0, %v4259_v10  ;;  %7252 = vst [vmem:[#allocation50_spill] sm:$0xff] %v5738_v47  ;;  %v5742_v10 = vld [vmem:[#allocation2 + $0xe0] ss:$16 sps:$4 sm:$0xff]  }
 0x6f2   :  { %v3880_v14 = vadd.f32 -1.0, %v1826_v25  ;;  %v4263_v32 = vpop.eup %4262  ;;  %v1828_v60 = vmul.f32 %v4261_v4, %v5515_v8  ;;  %v5710_v8 = vld [vmem:[#allocation2 + $0x60] ss:$16 sps:$4 sm:$0xff]   ;;  %7253 = vst [vmem:[#allocation51_spill] sm:$0xff] %v5742_v10  ;;  %v5746_v25 = vld [vmem:[#allocation5 + $0x4] ss:$16 sps:$4 sm:$0xff]  }
 0x6f3   :  { %4264 = vrcp.f32 %v1817_v34  ;;  %7254 = vst [vmem:[#allocation52_spill] sm:$0xff] %v5746_v25  ;;  %v5749_v4 = vld [vmem:[#allocation5 + $0xc] ss:$16 sps:$4 sm:$0xff]   ;;  %v5760_v34 = vld [vmem:[#allocation5 + $0x24] ss:$16 sps:$4 sm:$0xff]  }
 0x6f4   :  { %v1829_v41 = vmul.f32 %v4263_v32, %v3880_v14  ;;  %7255 = vst [vmem:[#allocation53_spill] sm:$0xff] %v5749_v4  ;;  %v5754_v14 = vld [vmem:[#allocation5] ss:$16 sps:$4 sm:$0xff]   ;;  %v5757_v32 = vld [vmem:[#allocation5 + $0x8] ss:$16 sps:$4 sm:$0xff]   ;;  %7258 = vst [vmem:[#allocation56_spill] sm:$0xff] %v5760_v34 }
 0x6f5   :  { %7256 = vst [vmem:[#allocation54_spill] sm:$0xff] %v5754_v14  ;;  %7257 = vst [vmem:[#allocation55_spill] sm:$0xff] %v5757_v32 }
 0x6f6   :  { %v5693_v42 = vadd.f32 %v1829_v41, %v1828_v60  ;;  %v5763_v41 = vld [vmem:[#allocation5 + $0x2c] ss:$16 sps:$4 sm:$0xff]   ;;  %v5771_v60 = vld [vmem:[#allocation5 + $0x28] ss:$16 sps:$4 sm:$0xff]  }
 0x6f7   :  { %7259 = vst [vmem:[#allocation57_spill] sm:$0xff] %v5763_v41  ;;  %7261 = vst [vmem:[#allocation59_spill] sm:$0xff] %v5771_v60 }
 0x6f8   :  { %4266 = vtanh.f32 %v5693_v42 }
 0x6fd   :  { %v4265_v54 = vpop.eup %4264 }
 0x702   :  { %v4267_v38 = vpop.eup %4266 }
 0x703   :  { %v1832_v55 = vmul.f32 %v4267_v38, %v4265_v54  ;;  %v5774_v54 = vld [vmem:[#allocation5 + $0x44] ss:$16 sps:$4 sm:$0xff]   ;;  %v5777_v38 = vld [vmem:[#allocation5 + $0x4c] ss:$16 sps:$4 sm:$0xff]  }
 0x704   :  { %7262 = vst [vmem:[#allocation60_spill] sm:$0xff] %v5774_v54  ;;  %7263 = vst [vmem:[#allocation61_spill] sm:$0xff] %v5777_v38 }
 0x705   :  { %v1833_v61 = vpack.c.bf16 %v1832_v55, %v1832_v55  ;;  %v5780_v55 = vld [vmem:[#allocation5 + $0x40] ss:$16 sps:$4 sm:$0xff]  }
 0x706   :  { %7264 = vst [vmem:[#allocation62_spill] sm:$0xff] %v5780_v55 }
 0x707   :  { %1867 = vmatmul.mubr.bf16.vlgmr.msra.gmra.mrb[44].mxu0 %v1833_v61  ;;  %1908 = vmatmul.mubr.bf16.vlgmr.msra.gmra.mrb[36].mxu1 %v1833_v61  ;;  %v5783_v61 = vld [vmem:[#allocation5 + $0x48] ss:$16 sps:$4 sm:$0xff]  }
 0x708   :  { %1917 = vmatpush1.bf16.msra.mxu0 %v5518_v27  ;;  %1958 = vmatpush1.bf16.msra.mxu1 %v5521_v23  ;;  %7265 = vst [vmem:[#allocation63_spill] sm:$0xff] %v5783_v61 }
 0x709   :  { %1918 = vmatprep.subr.bf16.mxu0 %v5524_v19  ;;  %1959 = vmatprep.subr.bf16.mxu1 %v5527_v63 }
 0x70a   :  { %1948 = vmatprep.mubr.bf16.mxu0 %v7108_v1  ;;  %1989 = vmatprep.mubr.bf16.mxu1 %v7108_v1 }
 0x70c   :  { %1919 = vmatpush1.bf16.msra.mxu0 %v5532_v58  ;;  %1960 = vmatpush1.bf16.msra.mxu1 %v5535_v31 }
 0x70d   :  { %1920 = vmatprep.subr.bf16.mxu0 %v5538_v39  ;;  %1961 = vmatprep.subr.bf16.mxu1 %v5541_v52 }
 0x710   :  { %1921 = vmatpush1.bf16.msra.mxu0 %v5544_v3  ;;  %1962 = vmatpush1.bf16.msra.mxu1 %v5547_v59 }
 0x711   :  { %1922 = vmatprep.subr.bf16.mxu0 %v5550_v16  ;;  %1963 = vmatprep.subr.bf16.mxu1 %v5553_v12 }
 0x714   :  { %1923 = vmatpush1.bf16.msra.mxu0 %v5710_v8  ;;  %1964 = vmatpush1.bf16.msra.mxu1 %v5557_v29 }
 0x715   :  { %1924 = vmatprep.subr.bf16.mxu0 %v5714_v6  ;;  %1965 = vmatprep.subr.bf16.mxu1 %v5561_v33 }
 0x718   :  { %1925 = vmatpush1.bf16.msra.mxu0 %v5718_v0  ;;  %1966 = vmatpush1.bf16.msra.mxu1 %v5565_v35 }
 0x719   :  { %1926 = vmatprep.subr.bf16.mxu0 %v5722_v62  ;;  %1967 = vmatprep.subr.bf16.mxu1 %v5569_v49 }
 0x71c   :  { %1927 = vmatpush1.bf16.msra.mxu0 %v5726_v44  ;;  %1968 = vmatpush1.bf16.msra.mxu1 %v5573_v45 }
 0x71d   :  { %1928 = vmatprep.subr.bf16.mxu0 %v5730_v57  ;;  %1969 = vmatprep.subr.bf16.mxu1 %v5577_v22 }
 0x720   :  { %1929 = vmatpush1.bf16.msra.mxu0 %v5734_v40  ;;  %1970 = vmatpush1.bf16.msra.mxu1 %v5581_v26 }
 0x721   :  { %1930 = vmatprep.subr.bf16.mxu0 %v5738_v47  ;;  %1971 = vmatprep.subr.bf16.mxu1 %v5585_v28 }
 0x724   :  { %1931 = vmatpush1.bf16.msra.mxu0 %v5742_v10  ;;  %1972 = vmatpush1.bf16.msra.mxu1 %v5589_v30 }
 0x725   :  { %2052 = vmatprep.subr.bf16.mxu0 %v5746_v25  ;;  %2093 = vmatprep.subr.bf16.mxu1 %v5749_v4 }
 0x727   :  { %1949 = vmatmul.mubr.bf16.vlgmr.msra.gmra.mrb[48].mxu0 %v5646_v43  ;;  %1990 = vmatmul.mubr.bf16.vlgmr.msra.gmra.mrb[40].mxu1 %v5646_v43  ;;  %v5768_v43 = vld [vmem:[#allocation5 + $0x20] ss:$16 sps:$4 sm:$0xff]  }
 0x728   :  { %2053 = vmatpush1.bf16.msra.mxu0 %v5754_v14  ;;  %2094 = vmatpush1.bf16.msra.mxu1 %v5757_v32  ;;  %7260 = vst [vmem:[#allocation58_spill] sm:$0xff] %v5768_v43 }
 0x729   :  { %2054 = vmatprep.subr.bf16.mxu0 %v5760_v34  ;;  %2095 = vmatprep.subr.bf16.mxu1 %v5763_v41 }
 0x72a   :  { %2084 = vmatprep.mubr.bf16.mxu0 %v7108_v1  ;;  %2125 = vmatprep.mubr.bf16.mxu1 %v7108_v1 }
 0x72c   :  { %2055 = vmatpush1.bf16.msra.mxu0 %v5768_v43  ;;  %2096 = vmatpush1.bf16.msra.mxu1 %v5771_v60  ;;  %v5786_v43 = vld [vmem:[#allocation5 + $0x64] ss:$16 sps:$4 sm:$0xff]   ;;  %v5789_v60 = vld [vmem:[#allocation5 + $0x6c] ss:$16 sps:$4 sm:$0xff]  }
 0x72d   :  { %2056 = vmatprep.subr.bf16.mxu0 %v5774_v54  ;;  %2097 = vmatprep.subr.bf16.mxu1 %v5777_v38  ;;  %7266 = vst [vmem:[#allocation64_spill] sm:$0xff] %v5786_v43  ;;  %7267 = vst [vmem:[#allocation65_spill] sm:$0xff] %v5789_v60  ;;  %v5792_v54 = vld [vmem:[#allocation5 + $0x60] ss:$16 sps:$4 sm:$0xff]   ;;  %v5795_v38 = vld [vmem:[#allocation5 + $0x68] ss:$16 sps:$4 sm:$0xff]  }
 0x72e   :  { %7268 = vst [vmem:[#allocation66_spill] sm:$0xff] %v5792_v54  ;;  %7269 = vst [vmem:[#allocation67_spill] sm:$0xff] %v5795_v38 }
 0x730   :  { %2057 = vmatpush1.bf16.msra.mxu0 %v5780_v55  ;;  %2098 = vmatpush1.bf16.msra.mxu1 %v5783_v61  ;;  %v5798_v55 = vld [vmem:[#allocation5 + $0x84] ss:$16 sps:$4 sm:$0xff]   ;;  %v5801_v61 = vld [vmem:[#allocation5 + $0x8c] ss:$16 sps:$4 sm:$0xff]  }
 0x731   :  { %2058 = vmatprep.subr.bf16.mxu0 %v5786_v43  ;;  %2099 = vmatprep.subr.bf16.mxu1 %v5789_v60  ;;  %7270 = vst [vmem:[#allocation68_spill] sm:$0xff] %v5798_v55  ;;  %7271 = vst [vmem:[#allocation69_spill] sm:$0xff] %v5801_v61  ;;  %v5804_v43 = vld [vmem:[#allocation5 + $0x80] ss:$16 sps:$4 sm:$0xff]   ;;  %v5807_v60 = vld [vmem:[#allocation5 + $0x88] ss:$16 sps:$4 sm:$0xff]  }
 0x732   :  { %7272 = vst [vmem:[#allocation20_spill] sm:$0xff] %v5804_v43  ;;  %7273 = vst [vmem:[#allocation12_spill] sm:$0xff] %v5807_v60 }
 0x734   :  { %2059 = vmatpush1.bf16.msra.mxu0 %v5792_v54  ;;  %2100 = vmatpush1.bf16.msra.mxu1 %v5795_v38  ;;  %v5810_v54 = vld [vmem:[#allocation5 + $0xa4] ss:$16 sps:$4 sm:$0xff]   ;;  %v5813_v38 = vld [vmem:[#allocation5 + $0xac] ss:$16 sps:$4 sm:$0xff]  }
 0x735   :  { %2060 = vmatprep.subr.bf16.mxu0 %v5798_v55  ;;  %2101 = vmatprep.subr.bf16.mxu1 %v5801_v61  ;;  %7274 = vst [vmem:[#allocation74_spill] sm:$0xff] %v5810_v54  ;;  %7275 = vst [vmem:[#allocation22_spill] sm:$0xff] %v5813_v38  ;;  %v5816_v55 = vld [vmem:[#allocation5 + $0xa0] ss:$16 sps:$4 sm:$0xff]   ;;  %v5819_v61 = vld [vmem:[#allocation5 + $0xa8] ss:$16 sps:$4 sm:$0xff]  }
 0x736   :  { %7276 = vst [vmem:[#allocation13_spill] sm:$0xff] %v5816_v55  ;;  %7277 = vst [vmem:[#allocation24_spill] sm:$0xff] %v5819_v61 }
 0x738   :  { %2061 = vmatpush1.bf16.msra.mxu0 %v5804_v43  ;;  %2102 = vmatpush1.bf16.msra.mxu1 %v5807_v60  ;;  %v5822_v43 = vld [vmem:[#allocation5 + $0xc4] ss:$16 sps:$4 sm:$0xff]   ;;  %v5825_v60 = vld [vmem:[#allocation5 + $0xcc] ss:$16 sps:$4 sm:$0xff]  }
 0x739   :  { %2062 = vmatprep.subr.bf16.mxu0 %v5810_v54  ;;  %2103 = vmatprep.subr.bf16.mxu1 %v5813_v38  ;;  %7278 = vst [vmem:[#allocation14_spill] sm:$0xff] %v5822_v43  ;;  %7279 = vst [vmem:[#allocation26_spill] sm:$0xff] %v5825_v60  ;;  %v5828_v54 = vld [vmem:[#allocation5 + $0xc0] ss:$16 sps:$4 sm:$0xff]   ;;  %v5831_v38 = vld [vmem:[#allocation5 + $0xc8] ss:$16 sps:$4 sm:$0xff]  }
 0x73a   :  { %7280 = vst [vmem:[#allocation15_spill] sm:$0xff] %v5828_v54  ;;  %7281 = vst [vmem:[#allocation28_spill] sm:$0xff] %v5831_v38 }
 0x73c   :  { %2063 = vmatpush1.bf16.msra.mxu0 %v5816_v55  ;;  %2104 = vmatpush1.bf16.msra.mxu1 %v5819_v61  ;;  %v5834_v55 = vld [vmem:[#allocation5 + $0xe4] ss:$16 sps:$4 sm:$0xff]   ;;  %v5837_v61 = vld [vmem:[#allocation5 + $0xec] ss:$16 sps:$4 sm:$0xff]  }
 0x73d   :  { %2064 = vmatprep.subr.bf16.mxu0 %v5822_v43  ;;  %2105 = vmatprep.subr.bf16.mxu1 %v5825_v60  ;;  %7282 = vst [vmem:[#allocation75_spill] sm:$0xff] %v5834_v55  ;;  %7283 = vst [vmem:[#allocation76_spill] sm:$0xff] %v5837_v61  ;;  %v5840_v43 = vld [vmem:[#allocation5 + $0xe0] ss:$16 sps:$4 sm:$0xff]   ;;  %v5843_v60 = vld [vmem:[#allocation5 + $0xe8] ss:$16 sps:$4 sm:$0xff]  }
 0x73e   :  { %7284 = vst [vmem:[#allocation77_spill] sm:$0xff] %v5840_v43  ;;  %7285 = vst [vmem:[#allocation78_spill] sm:$0xff] %v5843_v60 }
 0x740   :  { %2065 = vmatpush1.bf16.msra.mxu0 %v5828_v54  ;;  %2106 = vmatpush1.bf16.msra.mxu1 %v5831_v38 }
 0x741   :  { %2066 = vmatprep.subr.bf16.mxu0 %v5834_v55  ;;  %2107 = vmatprep.subr.bf16.mxu1 %v5837_v61 }
 0x744   :  { %2067 = vmatpush1.bf16.msra.mxu0 %v5840_v43  ;;  %2108 = vmatpush1.bf16.msra.mxu1 %v5843_v60 }
 0x745   :  { %2170 = vmatprep.subr.bf16.mxu0 %v7217_v51  ;;  %2211 = vmatprep.subr.bf16.mxu1 %v7218_v53 }
 0x7da   :  { %v5848_v38 = vpop.f32.mrb[44].mxu0  ;;  %v5850_v54 = vpop.f32.mrb[36].mxu1 }
 0x7db   :  { %v5852_v55 = vpop.f32.mrb[45].mxu0  ;;  %v5854_v41 = vpop.f32.mrb[37].mxu1 }
 0x7dc   :  { %v1872_v61 = vpop.f32.mrb[46].mxu0  ;;  %v1913_v34 = vpop.f32.mrb[38].mxu1 }
 0x7dd   :  { %v1873_v32 = vpop.f32.mrb[47].mxu0  ;;  %v1914_v43 = vpop.f32.mrb[39].mxu1 }
 0x7fa   :  { %v1950_v14 = vpop.f32.mrb[48].mxu0  ;;  %v1991_v4 = vpop.f32.mrb[40].mxu1 }
 0x7fb   :  { %v2002_v25 = vrot.slane %v1950_v14, 2  ;;  %v2004_v60 = vrot.slane %v1991_v4, 2  ;;  %v1952_v30 = vpop.f32.mrb[49].mxu0  ;;  %v1993_v51 = vpop.f32.mrb[41].mxu1 }
 0x7fc   :  { %v2003_v10 = vrot.slane %v1952_v30, 2  ;;  %v1954_v53 = vpop.f32.mrb[50].mxu0  ;;  %v1995_v28 = vpop.f32.mrb[42].mxu1  ;;  %v2005_v14 = vrot.slane %v1993_v51, 2 }
 0x7fd   :  { %v2010_v47 = vadd.f32 %v2002_v25, %v7219_v17  ;;  %v2012_v26 = vadd.f32 %v2004_v60, %v5225_v2  ;;  %v1955_v40 = vpop.f32.mrb[51].mxu0  ;;  %v1996_v22 = vpop.f32.mrb[43].mxu1 }
 0x7fe   :  { %v2011_v61 = vadd.f32 %v2003_v10, %v5230_v56  ;;  %v2013_v4 = vadd.f32 %v2005_v14, %v5234_v11 }
 0x7ff   :  { %v3881_v34 = vmul.f32 -1.442695, %v2010_v47  ;;  %v3883_v32 = vmul.f32 -1.442695, %v2012_v26  ;;  %v2041_v26 = vrot.slane %v5643_v36, 6  ;;  %v7288_v36 = vld [vmem:[#allocation17_spill] sm:$0xff] }
 0x800   :  { %v3882_v43 = vmul.f32 -1.442695, %v2011_v61  ;;  %v3884_v30 = vmul.f32 -1.442695, %v2013_v4 }
 0x801   :  { %4268 = vpow2.f32 %v3881_v34 }
 0x802   :  { %4270 = vpow2.f32 %v3883_v32 }
 0x803   :  { %4272 = vpow2.f32 %v3882_v43 }
 0x804   :  { %4274 = vpow2.f32 %v3884_v30  ;;  %v7291_v30 = vld [vmem:[#allocation32_spill] sm:$0xff] }
 0x80b   :  { %v4269_v53 = vpop.eup %4268 }
 0x80c   :  { %v4271_v28 = vpop.eup %4270  ;;  %v2026_v2 = vadd.f32 1.0, %v4269_v53  ;;  %v7297_v53 = vld [vmem:[#allocation35_spill] sm:$0xff] }
 0x80d   :  { %v4273_v57 = vpop.eup %4272  ;;  %v2028_v17 = vadd.f32 1.0, %v4271_v28  ;;  %v7298_v28 = vld [vmem:[#allocation25_spill] sm:$0xff] }
 0x80e   :  { %v2027_v25 = vadd.f32 1.0, %v4273_v57  ;;  %v4275_v56 = vpop.eup %4274 }
 0x80f   :  { %4276 = vrcp.f32 %v2028_v17  ;;  %v2029_v51 = vadd.f32 1.0, %v4275_v56  ;;  %v7299_v17 = vld [vmem:[#allocation36_spill] sm:$0xff]  ;;  %v7302_v56 = vld [vmem:[#allocation29_spill] sm:$0xff] }
 0x810   :  { %4278 = vrcp.f32 %v2027_v25  ;;  %v7300_v25 = vld [vmem:[#allocation27_spill] sm:$0xff] }
 0x811   :  { %4280 = vrcp.f32 %v2026_v2  ;;  %v7301_v2 = vld [vmem:[#allocation37_spill] sm:$0xff] }
 0x812   :  { %4282 = vrcp.f32 %v2029_v51 }
 0x819   :  { %v4277_v22 = vpop.eup %4276 }
 0x81a   :  { %v4279_v40 = vpop.eup %4278  ;;  %v2038_v47 = vmul.f32 2.0, %v4277_v22  ;;  %v7303_v22 = vld [vmem:[#allocation38_spill] sm:$0xff] }
 0x81b   :  { %v2043_v10 = vmul.f32 %v4279_v40, %v2041_v26  ;;  %v4281_v11 = vpop.eup %4280  ;;  %v7304_v26 = vld [vmem:[#allocation39_spill] sm:$0xff]  ;;  %v7305_v40 = vld [vmem:[#allocation40_spill] sm:$0xff] }
 0x81c   :  { %v3885_v60 = vadd.f32 -1.0, %v2038_v47  ;;  %v4283_v57 = vpop.eup %4282  ;;  %v7306_v47 = vld [vmem:[#allocation41_spill] sm:$0xff] }
 0x81e   :  { %v2044_v61 = vmul.f32 %v4281_v11, %v3885_v60  ;;  %v7308_v60 = vld [vmem:[#allocation43_spill] sm:$0xff] }
 0x820   :  { %v5861_v34 = vadd.f32 %v2044_v61, %v2043_v10  ;;  %v7307_v10 = vld [vmem:[#allocation42_spill] sm:$0xff] }
 0x822   :  { %4284 = vtanh.f32 %v5861_v34 }
 0x82c   :  { %v4285_v32 = vpop.eup %4284 }
 0x82d   :  { %v2047_v43 = vmul.f32 %v4285_v32, %v4283_v57 }
 0x82f   :  { %v2048_v14 = vpack.c.bf16 %v2047_v43, %v2047_v43 }
 0x831   :  { %v5864_v4 = vrot.slane %v2048_v14, 3 }
 0x833   :  { %2085 = vmatmul.mubr.bf16.vlgmr.msra.gmra.mrb[52].mxu0 %v5864_v4  ;;  %2126 = vmatmul.mubr.bf16.vlgmr.msra.gmra.mrb[44].mxu1 %v5864_v4 }
 0x834   :  { %2171 = vmatpush1.bf16.msra.mxu0 %v5408_v15  ;;  %2212 = vmatpush1.bf16.msra.mxu1 %v5411_v5  ;;  %v7286_v15 = vld [vmem:[#allocation16_spill] sm:$0xff]  ;;  %v7287_v5 = vld [vmem:[#allocation30_spill] sm:$0xff] }
 0x835   :  { %2172 = vmatprep.subr.bf16.mxu0 %v7220_v37  ;;  %2213 = vmatprep.subr.bf16.mxu1 %v7221_v48  ;;  %v7289_v37 = vld [vmem:[#allocation31_spill] sm:$0xff]  ;;  %v7290_v48 = vld [vmem:[#allocation18_spill] sm:$0xff] }
 0x836   :  { %2202 = vmatprep.mubr.bf16.mxu0 %v7108_v1  ;;  %2243 = vmatprep.mubr.bf16.mxu1 %v7108_v1 }
 0x838   :  { %2173 = vmatpush1.bf16.msra.mxu0 %v7222_v50  ;;  %2214 = vmatpush1.bf16.msra.mxu1 %v7223_v21  ;;  %v7292_v50 = vld [vmem:[#allocation19_spill] sm:$0xff]  ;;  %v7293_v21 = vld [vmem:[#allocation33_spill] sm:$0xff] }
 0x839   :  { %2174 = vmatprep.subr.bf16.mxu0 %v7224_v7  ;;  %2215 = vmatprep.subr.bf16.mxu1 %v7225_v9  ;;  %v7294_v7 = vld [vmem:[#allocation21_spill] sm:$0xff]  ;;  %v7295_v9 = vld [vmem:[#allocation34_spill] sm:$0xff] }
 0x83c   :  { %2175 = vmatpush1.bf16.msra.mxu0 %v7226_v18  ;;  %2216 = vmatpush1.bf16.msra.mxu1 %v7286_v15  ;;  %v7296_v18 = vld [vmem:[#allocation23_spill] sm:$0xff] }
 0x83d   :  { %2176 = vmatprep.subr.bf16.mxu0 %v7287_v5  ;;  %2217 = vmatprep.subr.bf16.mxu1 %v7288_v36 }
 0x840   :  { %2177 = vmatpush1.bf16.msra.mxu0 %v7289_v37  ;;  %2218 = vmatpush1.bf16.msra.mxu1 %v7290_v48 }
 0x841   :  { %2178 = vmatprep.subr.bf16.mxu0 %v7291_v30  ;;  %2219 = vmatprep.subr.bf16.mxu1 %v7292_v50 }
 0x844   :  { %2179 = vmatpush1.bf16.msra.mxu0 %v7293_v21  ;;  %2220 = vmatpush1.bf16.msra.mxu1 %v7294_v7 }
 0x845   :  { %2180 = vmatprep.subr.bf16.mxu0 %v7295_v9  ;;  %2221 = vmatprep.subr.bf16.mxu1 %v7296_v18 }
 0x848   :  { %2181 = vmatpush1.bf16.msra.mxu0 %v7297_v53  ;;  %2222 = vmatpush1.bf16.msra.mxu1 %v7298_v28 }
 0x849   :  { %2182 = vmatprep.subr.bf16.mxu0 %v7299_v17  ;;  %2223 = vmatprep.subr.bf16.mxu1 %v7300_v25 }
 0x84c   :  { %2183 = vmatpush1.bf16.msra.mxu0 %v7301_v2  ;;  %2224 = vmatpush1.bf16.msra.mxu1 %v7302_v56 }
 0x84d   :  { %2184 = vmatprep.subr.bf16.mxu0 %v7303_v22  ;;  %2225 = vmatprep.subr.bf16.mxu1 %v7304_v26 }
 0x850   :  { %2185 = vmatpush1.bf16.msra.mxu0 %v7305_v40  ;;  %2226 = vmatpush1.bf16.msra.mxu1 %v7306_v47 }
 0x851   :  { %2252 = vmatprep.subr.bf16.mxu0 %v7307_v10  ;;  %2293 = vmatprep.subr.bf16.mxu1 %v7308_v60 }
 0x906   :  { %v2086_v11 = vpop.f32.mrb[52].mxu0  ;;  %v2127_v51 = vpop.f32.mrb[44].mxu1 }
 0x907   :  { %v2087_v61 = vadd.f32 %v2086_v11, %v5848_v38  ;;  %v2128_v57 = vadd.f32 %v2127_v51, %v5850_v54  ;;  %v2088_v32 = vpop.f32.mrb[53].mxu0  ;;  %v2129_v43 = vpop.f32.mrb[45].mxu1 }
 0x908   :  { %v2089_v14 = vadd.f32 %v2088_v32, %v5852_v55  ;;  %v2130_v15 = vadd.f32 %v2129_v43, %v5854_v41  ;;  %v2090_v5 = vpop.f32.mrb[54].mxu0  ;;  %v2131_v36 = vpop.f32.mrb[46].mxu1 }
 0x909   :  { %v2134_v37 = vadd.f32 %v2087_v61, %v5286_v13  ;;  %v2136_v48 = vadd.f32 %v2128_v57, %v5290_v20  ;;  %v2091_v30 = vpop.f32.mrb[55].mxu0  ;;  %v2132_v50 = vpop.f32.mrb[47].mxu1  ;;  %v7330_v5 = vld [vmem:[#allocation65_spill] sm:$0xff]  ;;  %v7331_v36 = vld [vmem:[#allocation66_spill] sm:$0xff] }
 0x90a   :  { %v2135_v21 = vadd.f32 %v2089_v14, %v5294_v24  ;;  %v2137_v54 = vadd.f32 %v2130_v15, %v5305_v46  ;;  %v7328_v14 = vld [vmem:[#allocation63_spill] sm:$0xff]  ;;  %v7329_v15 = vld [vmem:[#allocation64_spill] sm:$0xff]  ;;  %v7334_v30 = vld [vmem:[#allocation69_spill] sm:$0xff] }
 0x90b   :  { %v3886_v7 = vmul.f32 -1.442695, %v2134_v37  ;;  %v3888_v38 = vmul.f32 -1.442695, %v2136_v48  ;;  %v7332_v37 = vld [vmem:[#allocation67_spill] sm:$0xff]  ;;  %v7333_v48 = vld [vmem:[#allocation68_spill] sm:$0xff] }
 0x90c   :  { %v3887_v9 = vmul.f32 -1.442695, %v2135_v21  ;;  %v3889_v18 = vmul.f32 -1.442695, %v2137_v54  ;;  %v7335_v50 = vld [vmem:[#allocation20_spill] sm:$0xff] }
 0x90d   :  { %4286 = vpow2.f32 %v3886_v7  ;;  %v7336_v21 = vld [vmem:[#allocation12_spill] sm:$0xff]  ;;  %v7337_v7 = vld [vmem:[#allocation74_spill] sm:$0xff] }
 0x90e   :  { %4288 = vpow2.f32 %v3888_v38  ;;  %v7338_v38 = vld [vmem:[#allocation22_spill] sm:$0xff]  ;;  %v7340_v54 = vld [vmem:[#allocation24_spill] sm:$0xff] }
 0x90f   :  { %4290 = vpow2.f32 %v3887_v9  ;;  %v7339_v9 = vld [vmem:[#allocation13_spill] sm:$0xff] }
 0x917   :  { %v4287_v55 = vpop.eup %4286 }
 0x918   :  { %v4289_v41 = vpop.eup %4288  ;;  %v2150_v25 = vadd.f32 1.0, %v4287_v55  ;;  %v7341_v55 = vld [vmem:[#allocation14_spill] sm:$0xff] }
 0x919   :  { %v4291_v53 = vpop.eup %4290  ;;  %v2152_v28 = vadd.f32 1.0, %v4289_v41  ;;  %v7342_v41 = vld [vmem:[#allocation26_spill] sm:$0xff] }
 0x91a   :  { %v2151_v17 = vadd.f32 1.0, %v4291_v53  ;;  %v7344_v53 = vld [vmem:[#allocation28_spill] sm:$0xff] }
 0x91b   :  { %4292 = vrcp.f32 %v2152_v28  ;;  %v7345_v28 = vld [vmem:[#allocation75_spill] sm:$0xff] }
 0x91c   :  { %4294 = vpow2.f32 %v3889_v18  ;;  %v7343_v18 = vld [vmem:[#allocation15_spill] sm:$0xff] }
 0x91d   :  { %4296 = vrcp.f32 %v2151_v17  ;;  %v7346_v17 = vld [vmem:[#allocation76_spill] sm:$0xff] }
 0x91e   :  { %4298 = vrcp.f32 %v2150_v25  ;;  %v7347_v25 = vld [vmem:[#allocation77_spill] sm:$0xff] }
 0x925   :  { %v4293_v2 = vpop.eup %4292 }
 0x926   :  { %v4295_v56 = vpop.eup %4294  ;;  %v2162_v22 = vmul.f32 2.0, %v4293_v2  ;;  %v7348_v2 = vld [vmem:[#allocation78_spill] sm:$0xff] }
 0x927   :  { %v4297_v26 = vpop.eup %4296  ;;  %v2153_v10 = vadd.f32 1.0, %v4295_v56  ;;  %v5982_v56 = vld [vmem:[#allocation7 + $0x4] ss:$16 sps:$4 sm:$0xff]  }
 0x928   :  { %v3890_v40 = vadd.f32 -1.0, %v2162_v22  ;;  %v4299_v47 = vpop.eup %4298  ;;  %v2164_v11 = vmul.f32 %v4297_v26, %v5693_v42  ;;  %v7326_v42 = vld [vmem:[#allocation61_spill] sm:$0xff]  ;;  %7349 = vst [vmem:[#allocation16_spill] sm:$0xff] %v5982_v56 }
 0x929   :  { %4300 = vrcp.f32 %v2153_v10  ;;  %v5985_v22 = vld [vmem:[#allocation7 + $0xc] ss:$16 sps:$4 sm:$0xff]  }
 0x92a   :  { %v2165_v60 = vmul.f32 %v4299_v47, %v3890_v40  ;;  %7350 = vst [vmem:[#allocation30_spill] sm:$0xff] %v5985_v22 }
 0x92c   :  { %v5911_v51 = vadd.f32 %v2165_v60, %v2164_v11 }
 0x92e   :  { %4302 = vtanh.f32 %v5911_v51 }
 0x933   :  { %v4301_v61 = vpop.eup %4300 }
 0x938   :  { %v4303_v57 = vpop.eup %4302 }
 0x939   :  { %v2168_v32 = vmul.f32 %v4303_v57, %v4301_v61 }
 0x93b   :  { %v2169_v43 = vpack.c.bf16 %v2168_v32, %v2168_v32 }
 0x93d   :  { %2203 = vmatmul.mubr.bf16.vlgmr.msra.gmra.mrb[56].mxu0 %v2169_v43  ;;  %2244 = vmatmul.mubr.bf16.vlgmr.msra.gmra.mrb[48].mxu1 %v2169_v43 }
 0x93e   :  { %2253 = vmatpush1.bf16.msra.mxu0 %v5518_v27  ;;  %2294 = vmatpush1.bf16.msra.mxu1 %v5521_v23  ;;  %v7309_v27 = vld [vmem:[#allocation48_spill] sm:$0xff] }
 0x93f   :  { %2254 = vmatprep.subr.bf16.mxu0 %v5524_v19  ;;  %2295 = vmatprep.subr.bf16.mxu1 %v5527_v63  ;;  %v7310_v23 = vld [vmem:[#allocation44_spill] sm:$0xff]  ;;  %v7311_v19 = vld [vmem:[#allocation49_spill] sm:$0xff] }
 0x940   :  { %2284 = vmatprep.mubr.bf16.mxu0 %v7108_v1  ;;  %2325 = vmatprep.mubr.bf16.mxu1 %v7108_v1  ;;  %v7312_v63 = vld [vmem:[#allocation45_spill] sm:$0xff] }
 0x942   :  { %2255 = vmatpush1.bf16.msra.mxu0 %v5532_v58  ;;  %2296 = vmatpush1.bf16.msra.mxu1 %v5535_v31  ;;  %v7313_v58 = vld [vmem:[#allocation50_spill] sm:$0xff] }
 0x943   :  { %2256 = vmatprep.subr.bf16.mxu0 %v5538_v39  ;;  %2297 = vmatprep.subr.bf16.mxu1 %v5541_v52  ;;  %v7314_v31 = vld [vmem:[#allocation46_spill] sm:$0xff]  ;;  %v7315_v39 = vld [vmem:[#allocation51_spill] sm:$0xff] }
 0x944   :  { %v7316_v52 = vld [vmem:[#allocation47_spill] sm:$0xff] }
 0x946   :  { %2257 = vmatpush1.bf16.msra.mxu0 %v5544_v3  ;;  %2298 = vmatpush1.bf16.msra.mxu1 %v5547_v59  ;;  %v7317_v3 = vld [vmem:[#allocation52_spill] sm:$0xff]  ;;  %v7318_v59 = vld [vmem:[#allocation53_spill] sm:$0xff] }
 0x947   :  { %2258 = vmatprep.subr.bf16.mxu0 %v5550_v16  ;;  %2299 = vmatprep.subr.bf16.mxu1 %v5553_v12  ;;  %v7319_v16 = vld [vmem:[#allocation54_spill] sm:$0xff]  ;;  %v7320_v12 = vld [vmem:[#allocation55_spill] sm:$0xff] }
 0x94a   :  { %2259 = vmatpush1.bf16.msra.mxu0 %v5710_v8  ;;  %2300 = vmatpush1.bf16.msra.mxu1 %v5557_v29  ;;  %v7321_v29 = vld [vmem:[#allocation56_spill] sm:$0xff] }
 0x94b   :  { %2260 = vmatprep.subr.bf16.mxu0 %v5714_v6  ;;  %2301 = vmatprep.subr.bf16.mxu1 %v5561_v33  ;;  %v7322_v33 = vld [vmem:[#allocation57_spill] sm:$0xff] }
 0x94e   :  { %2261 = vmatpush1.bf16.msra.mxu0 %v5718_v0  ;;  %2302 = vmatpush1.bf16.msra.mxu1 %v5565_v35  ;;  %v7323_v35 = vld [vmem:[#allocation58_spill] sm:$0xff] }
 0x94f   :  { %2262 = vmatprep.subr.bf16.mxu0 %v5722_v62  ;;  %2303 = vmatprep.subr.bf16.mxu1 %v5569_v49  ;;  %v7324_v49 = vld [vmem:[#allocation59_spill] sm:$0xff] }
 0x952   :  { %2263 = vmatpush1.bf16.msra.mxu0 %v5726_v44  ;;  %2304 = vmatpush1.bf16.msra.mxu1 %v5573_v45  ;;  %v7325_v45 = vld [vmem:[#allocation60_spill] sm:$0xff] }
 0x953   :  { %2264 = vmatprep.subr.bf16.mxu0 %v7309_v27  ;;  %2305 = vmatprep.subr.bf16.mxu1 %v7310_v23  ;;  %v7351_v23 = vld [vmem:[#allocation70_spill] sm:$0xff] }
 0x956   :  { %2265 = vmatpush1.bf16.msra.mxu0 %v7311_v19  ;;  %2306 = vmatpush1.bf16.msra.mxu1 %v7312_v63 }
 0x957   :  { %2266 = vmatprep.subr.bf16.mxu0 %v7313_v58  ;;  %2307 = vmatprep.subr.bf16.mxu1 %v7314_v31  ;;  %v7352_v31 = vld [vmem:[#allocation72_spill] sm:$0xff] }
 0x95a   :  { %2267 = vmatpush1.bf16.msra.mxu0 %v7315_v39  ;;  %2308 = vmatpush1.bf16.msra.mxu1 %v7316_v52 }
 0x95b   :  { %2373 = vmatprep.subr.bf16.mxu0 %v7317_v3  ;;  %2414 = vmatprep.subr.bf16.mxu1 %v7318_v59 }
 0x95d   :  { %2285 = vmatmul.mubr.bf16.vlgmr.msra.gmra.mrb[60].mxu0 %v5864_v4  ;;  %2326 = vmatmul.mubr.bf16.vlgmr.msra.gmra.mrb[52].mxu1 %v5864_v4  ;;  %v7327_v4 = vld [vmem:[#allocation62_spill] sm:$0xff] }
 0x95e   :  { %2374 = vmatpush1.bf16.msra.mxu0 %v7319_v16  ;;  %2415 = vmatpush1.bf16.msra.mxu1 %v7320_v12 }
 0x95f   :  { %2375 = vmatprep.subr.bf16.mxu0 %v7321_v29  ;;  %2416 = vmatprep.subr.bf16.mxu1 %v7322_v33 }
 0x960   :  { %2405 = vmatprep.mubr.bf16.mxu0 %v7108_v1  ;;  %2446 = vmatprep.mubr.bf16.mxu1 %v7108_v1 }
 0x962   :  { %2376 = vmatpush1.bf16.msra.mxu0 %v7323_v35  ;;  %2417 = vmatpush1.bf16.msra.mxu1 %v7324_v49 }
 0x963   :  { %2377 = vmatprep.subr.bf16.mxu0 %v7325_v45  ;;  %2418 = vmatprep.subr.bf16.mxu1 %v7326_v42 }
 0x966   :  { %2378 = vmatpush1.bf16.msra.mxu0 %v7327_v4  ;;  %2419 = vmatpush1.bf16.msra.mxu1 %v7328_v14 }
 0x967   :  { %2379 = vmatprep.subr.bf16.mxu0 %v7329_v15  ;;  %2420 = vmatprep.subr.bf16.mxu1 %v7330_v5 }
 0x96a   :  { %2380 = vmatpush1.bf16.msra.mxu0 %v7331_v36  ;;  %2421 = vmatpush1.bf16.msra.mxu1 %v7332_v37 }
 0x96b   :  { %2381 = vmatprep.subr.bf16.mxu0 %v7333_v48  ;;  %2422 = vmatprep.subr.bf16.mxu1 %v7334_v30 }
 0x96e   :  { %2382 = vmatpush1.bf16.msra.mxu0 %v7335_v50  ;;  %2423 = vmatpush1.bf16.msra.mxu1 %v7336_v21 }
 0x96f   :  { %2383 = vmatprep.subr.bf16.mxu0 %v7337_v7  ;;  %2424 = vmatprep.subr.bf16.mxu1 %v7338_v38 }
 0x972   :  { %2384 = vmatpush1.bf16.msra.mxu0 %v7339_v9  ;;  %2425 = vmatpush1.bf16.msra.mxu1 %v7340_v54 }
 0x973   :  { %2385 = vmatprep.subr.bf16.mxu0 %v7341_v55  ;;  %2426 = vmatprep.subr.bf16.mxu1 %v7342_v41 }
 0x976   :  { %2386 = vmatpush1.bf16.msra.mxu0 %v7343_v18  ;;  %2427 = vmatpush1.bf16.msra.mxu1 %v7344_v53 }
 0x977   :  { %2387 = vmatprep.subr.bf16.mxu0 %v7345_v28  ;;  %2428 = vmatprep.subr.bf16.mxu1 %v7346_v17 }
 0x97a   :  { %2388 = vmatpush1.bf16.msra.mxu0 %v7347_v25  ;;  %2429 = vmatpush1.bf16.msra.mxu1 %v7348_v2  ;;  %v7353_v2 = vld [vmem:[#allocation71_spill] sm:$0xff] }
 0x97b   :  { %2491 = vmatprep.subr.bf16.mxu0 %v5982_v56  ;;  %2532 = vmatprep.subr.bf16.mxu1 %v5985_v22 }
 0xa10   :  { %v5988_v26 = vpop.f32.mrb[56].mxu0  ;;  %v5990_v40 = vpop.f32.mrb[48].mxu1 }
 0xa11   :  { %v5992_v47 = vpop.f32.mrb[57].mxu0  ;;  %v5994_v10 = vpop.f32.mrb[49].mxu1 }
 0xa12   :  { %v2208_v60 = vpop.f32.mrb[58].mxu0  ;;  %v2249_v11 = vpop.f32.mrb[50].mxu1 }
 0xa13   :  { %v2209_v61 = vpop.f32.mrb[59].mxu0  ;;  %v2250_v57 = vpop.f32.mrb[51].mxu1  ;;  %v7354_v11 = vld [vmem:[#allocation73_spill] sm:$0xff] }
 0xa30   :  { %v2286_v32 = vpop.f32.mrb[60].mxu0  ;;  %v2327_v43 = vpop.f32.mrb[52].mxu1 }
 0xa31   :  { %v2334_v63 = vadd.f32 %v2286_v32, %v7351_v23  ;;  %v2336_v52 = vadd.f32 %v2327_v43, %v7352_v31  ;;  %v2288_v56 = vpop.f32.mrb[61].mxu0  ;;  %v2329_v22 = vpop.f32.mrb[53].mxu1 }
 0xa32   :  { %v2335_v25 = vadd.f32 %v2288_v56, %v7353_v2  ;;  %v2290_v17 = vpop.f32.mrb[62].mxu0  ;;  %v2331_v28 = vpop.f32.mrb[54].mxu1  ;;  %v2337_v61 = vadd.f32 %v2329_v22, %v7354_v11 }
 0xa33   :  { %v3891_v53 = vmul.f32 -1.442695, %v2334_v63  ;;  %v3893_v18 = vmul.f32 -1.442695, %v2336_v52  ;;  %v2291_v41 = vpop.f32.mrb[63].mxu0  ;;  %v2332_v55 = vpop.f32.mrb[55].mxu1 }
 0xa34   :  { %v3892_v60 = vmul.f32 -1.442695, %v2335_v25  ;;  %v3894_v57 = vmul.f32 -1.442695, %v2337_v61  ;;  %v2365_v55 = vrot.slane %v5861_v34, 6 }
 0xa35   :  { %4304 = vpow2.f32 %v3891_v53  ;;  %v6008_v34 = vld [vmem:[#allocation7] ss:$16 sps:$4 sm:$0xff]  }
 0xa36   :  { %4306 = vpow2.f32 %v3893_v18 }
 0xa37   :  { %4308 = vpow2.f32 %v3892_v60 }
 0xa38   :  { %4310 = vpow2.f32 %v3894_v57  ;;  %v6011_v57 = vld [vmem:[#allocation7 + $0x8] ss:$16 sps:$4 sm:$0xff]  }
 0xa3f   :  { %v4305_v32 = vpop.eup %4304 }
 0xa40   :  { %v4307_v23 = vpop.eup %4306  ;;  %v2350_v56 = vadd.f32 1.0, %v4305_v32  ;;  %v6014_v32 = vld [vmem:[#allocation7 + $0x24] ss:$16 sps:$4 sm:$0xff]  }
 0xa41   :  { %v4309_v43 = vpop.eup %4308  ;;  %v2352_v31 = vadd.f32 1.0, %v4307_v23  ;;  %7355 = vst [vmem:[#allocation17_spill] sm:$0xff] %v6014_v32 }
 0xa42   :  { %v2351_v54 = vadd.f32 1.0, %v4309_v43  ;;  %v4311_v28 = vpop.eup %4310  ;;  %v6017_v43 = vld [vmem:[#allocation7 + $0x2c] ss:$16 sps:$4 sm:$0xff]  }
 0xa43   :  { %4312 = vrcp.f32 %v2352_v31  ;;  %v2353_v63 = vadd.f32 1.0, %v4311_v28  ;;  %7356 = vst [vmem:[#allocation31_spill] sm:$0xff] %v6017_v43  ;;  %v6025_v28 = vld [vmem:[#allocation7 + $0x28] ss:$16 sps:$4 sm:$0xff]  }
 0xa44   :  { %4314 = vrcp.f32 %v2351_v54  ;;  %7358 = vst [vmem:[#allocation32_spill] sm:$0xff] %v6025_v28 }
 0xa45   :  { %4316 = vrcp.f32 %v2350_v56  ;;  %v6022_v56 = vld [vmem:[#allocation7 + $0x20] ss:$16 sps:$4 sm:$0xff]  }
 0xa46   :  { %4318 = vrcp.f32 %v2353_v63  ;;  %7357 = vst [vmem:[#allocation18_spill] sm:$0xff] %v6022_v56  ;;  %v6049_v63 = vld [vmem:[#allocation7 + $0x68] ss:$16 sps:$4 sm:$0xff]  }
 0xa47   :  { %7366 = vst [vmem:[#allocation36_spill] sm:$0xff] %v6049_v63 }
 0xa4d   :  { %v4313_v41 = vpop.eup %4312 }
 0xa4e   :  { %v4315_v53 = vpop.eup %4314  ;;  %v2362_v18 = vmul.f32 2.0, %v4313_v41  ;;  %v6028_v41 = vld [vmem:[#allocation7 + $0x44] ss:$16 sps:$4 sm:$0xff]  }
 0xa4f   :  { %v2367_v17 = vmul.f32 %v4315_v53, %v2365_v55  ;;  %v4317_v22 = vpop.eup %4316  ;;  %7359 = vst [vmem:[#allocation19_spill] sm:$0xff] %v6028_v41  ;;  %v6031_v55 = vld [vmem:[#allocation7 + $0x4c] ss:$16 sps:$4 sm:$0xff]   ;;  %v6034_v53 = vld [vmem:[#allocation7 + $0x40] ss:$16 sps:$4 sm:$0xff]  }
 0xa50   :  { %v3895_v25 = vadd.f32 -1.0, %v2362_v18  ;;  %v4319_v23 = vpop.eup %4318  ;;  %7360 = vst [vmem:[#allocation33_spill] sm:$0xff] %v6031_v55  ;;  %7361 = vst [vmem:[#allocation21_spill] sm:$0xff] %v6034_v53  ;;  %v6037_v18 = vld [vmem:[#allocation7 + $0x48] ss:$16 sps:$4 sm:$0xff]  }
 0xa51   :  { %7362 = vst [vmem:[#allocation34_spill] sm:$0xff] %v6037_v18 }
 0xa52   :  { %v2368_v52 = vmul.f32 %v4317_v22, %v3895_v25  ;;  %v6043_v25 = vld [vmem:[#allocation7 + $0x6c] ss:$16 sps:$4 sm:$0xff]   ;;  %v6046_v22 = vld [vmem:[#allocation7 + $0x60] ss:$16 sps:$4 sm:$0xff]  }
 0xa53   :  { %7364 = vst [vmem:[#allocation35_spill] sm:$0xff] %v6043_v25  ;;  %7365 = vst [vmem:[#allocation25_spill] sm:$0xff] %v6046_v22 }
 0xa54   :  { %v6001_v60 = vadd.f32 %v2368_v52, %v2367_v17  ;;  %v6040_v17 = vld [vmem:[#allocation7 + $0x64] ss:$16 sps:$4 sm:$0xff]  }
 0xa55   :  { %7363 = vst [vmem:[#allocation23_spill] sm:$0xff] %v6040_v17  ;;  %v6052_v52 = vld [vmem:[#allocation7 + $0x84] ss:$16 sps:$4 sm:$0xff]  }
 0xa56   :  { %4320 = vtanh.f32 %v6001_v60  ;;  %7367 = vst [vmem:[#allocation27_spill] sm:$0xff] %v6052_v52 }
 0xa60   :  { %v4321_v31 = vpop.eup %4320 }
 0xa61   :  { %v2371_v54 = vmul.f32 %v4321_v31, %v4319_v23  ;;  %v6055_v23 = vld [vmem:[#allocation7 + $0x8c] ss:$16 sps:$4 sm:$0xff]   ;;  %v6058_v31 = vld [vmem:[#allocation7 + $0x80] ss:$16 sps:$4 sm:$0xff]  }
 0xa62   :  { %7368 = vst [vmem:[#allocation37_spill] sm:$0xff] %v6055_v23  ;;  %7369 = vst [vmem:[#allocation29_spill] sm:$0xff] %v6058_v31 }
 0xa63   :  { %v6004_v61 = vpack.c.bf16 %v2371_v54, %v2371_v54  ;;  %v6061_v54 = vld [vmem:[#allocation7 + $0x88] ss:$16 sps:$4 sm:$0xff]  }
 0xa64   :  { %7370 = vst [vmem:[#allocation38_spill] sm:$0xff] %v6061_v54 }
 0xa65   :  { %2406 = vmatmul.mubr.bf16.vlgmr.msra.gmra.mrb[64].mxu0 %v6004_v61  ;;  %2447 = vmatmul.mubr.bf16.vlgmr.msra.gmra.mrb[56].mxu1 %v6004_v61 }
 0xa66   :  { %2492 = vmatpush1.bf16.msra.mxu0 %v6008_v34  ;;  %2533 = vmatpush1.bf16.msra.mxu1 %v6011_v57 }
 0xa67   :  { %2493 = vmatprep.subr.bf16.mxu0 %v6014_v32  ;;  %2534 = vmatprep.subr.bf16.mxu1 %v6017_v43 }
 0xa68   :  { %2523 = vmatprep.mubr.bf16.mxu0 %v7108_v1  ;;  %2564 = vmatprep.mubr.bf16.mxu1 %v7108_v1 }
 0xa6a   :  { %2494 = vmatpush1.bf16.msra.mxu0 %v6022_v56  ;;  %2535 = vmatpush1.bf16.msra.mxu1 %v6025_v28 }
 0xa6b   :  { %2495 = vmatprep.subr.bf16.mxu0 %v6028_v41  ;;  %2536 = vmatprep.subr.bf16.mxu1 %v6031_v55 }
 0xa6e   :  { %2496 = vmatpush1.bf16.msra.mxu0 %v6034_v53  ;;  %2537 = vmatpush1.bf16.msra.mxu1 %v6037_v18 }
 0xa6f   :  { %2497 = vmatprep.subr.bf16.mxu0 %v6040_v17  ;;  %2538 = vmatprep.subr.bf16.mxu1 %v6043_v25 }
 0xa72   :  { %2498 = vmatpush1.bf16.msra.mxu0 %v6046_v22  ;;  %2539 = vmatpush1.bf16.msra.mxu1 %v6049_v63  ;;  %v6064_v22 = vld [vmem:[#allocation7 + $0xa4] ss:$16 sps:$4 sm:$0xff]   ;;  %v6067_v63 = vld [vmem:[#allocation7 + $0xac] ss:$16 sps:$4 sm:$0xff]  }
 0xa73   :  { %2499 = vmatprep.subr.bf16.mxu0 %v6052_v52  ;;  %2540 = vmatprep.subr.bf16.mxu1 %v6055_v23  ;;  %7371 = vst [vmem:[#allocation39_spill] sm:$0xff] %v6064_v22  ;;  %7372 = vst [vmem:[#allocation40_spill] sm:$0xff] %v6067_v63  ;;  %v6070_v52 = vld [vmem:[#allocation7 + $0xa0] ss:$16 sps:$4 sm:$0xff]   ;;  %v6073_v23 = vld [vmem:[#allocation7 + $0xa8] ss:$16 sps:$4 sm:$0xff]  }
 0xa74   :  { %7373 = vst [vmem:[#allocation41_spill] sm:$0xff] %v6070_v52  ;;  %7374 = vst [vmem:[#allocation42_spill] sm:$0xff] %v6073_v23 }
 0xa76   :  { %2500 = vmatpush1.bf16.msra.mxu0 %v6058_v31  ;;  %2541 = vmatpush1.bf16.msra.mxu1 %v6061_v54  ;;  %v6076_v31 = vld [vmem:[#allocation7 + $0xc4] ss:$16 sps:$4 sm:$0xff]   ;;  %v6079_v54 = vld [vmem:[#allocation7 + $0xcc] ss:$16 sps:$4 sm:$0xff]  }
 0xa77   :  { %2501 = vmatprep.subr.bf16.mxu0 %v6064_v22  ;;  %2542 = vmatprep.subr.bf16.mxu1 %v6067_v63  ;;  %7375 = vst [vmem:[#allocation43_spill] sm:$0xff] %v6076_v31  ;;  %7376 = vst [vmem:[#allocation48_spill] sm:$0xff] %v6079_v54  ;;  %v6082_v22 = vld [vmem:[#allocation7 + $0xc0] ss:$16 sps:$4 sm:$0xff]   ;;  %v6085_v63 = vld [vmem:[#allocation7 + $0xc8] ss:$16 sps:$4 sm:$0xff]  }
 0xa78   :  { %7377 = vst [vmem:[#allocation44_spill] sm:$0xff] %v6082_v22  ;;  %7378 = vst [vmem:[#allocation49_spill] sm:$0xff] %v6085_v63 }
 0xa7a   :  { %2502 = vmatpush1.bf16.msra.mxu0 %v6070_v52  ;;  %2543 = vmatpush1.bf16.msra.mxu1 %v6073_v23  ;;  %v6088_v52 = vld [vmem:[#allocation7 + $0xe4] ss:$16 sps:$4 sm:$0xff]   ;;  %v6091_v23 = vld [vmem:[#allocation7 + $0xec] ss:$16 sps:$4 sm:$0xff]  }
 0xa7b   :  { %2503 = vmatprep.subr.bf16.mxu0 %v6076_v31  ;;  %2544 = vmatprep.subr.bf16.mxu1 %v6079_v54  ;;  %7379 = vst [vmem:[#allocation45_spill] sm:$0xff] %v6088_v52  ;;  %7380 = vst [vmem:[#allocation50_spill] sm:$0xff] %v6091_v23  ;;  %v6094_v31 = vld [vmem:[#allocation7 + $0xe0] ss:$16 sps:$4 sm:$0xff]   ;;  %v6097_v54 = vld [vmem:[#allocation7 + $0xe8] ss:$16 sps:$4 sm:$0xff]  }
 0xa7c   :  { %7381 = vst [vmem:[#allocation46_spill] sm:$0xff] %v6094_v31  ;;  %7382 = vst [vmem:[#allocation51_spill] sm:$0xff] %v6097_v54 }
 0xa7e   :  { %2504 = vmatpush1.bf16.msra.mxu0 %v6082_v22  ;;  %2545 = vmatpush1.bf16.msra.mxu1 %v6085_v63  ;;  %v6100_v22 = vld [vmem:[#allocation2 + $0x4] ss:$16 sps:$4 sm:$0xff]   ;;  %v6103_v63 = vld [vmem:[#allocation2 + $0xc] ss:$16 sps:$4 sm:$0xff]  }
 0xa7f   :  { %2505 = vmatprep.subr.bf16.mxu0 %v6088_v52  ;;  %2546 = vmatprep.subr.bf16.mxu1 %v6091_v23  ;;  %7383 = vst [vmem:[#allocation47_spill] sm:$0xff] %v6100_v22  ;;  %7384 = vst [vmem:[#allocation52_spill] sm:$0xff] %v6103_v63 }
 0xa82   :  { %2506 = vmatpush1.bf16.msra.mxu0 %v6094_v31  ;;  %2547 = vmatpush1.bf16.msra.mxu1 %v6097_v54 }
 0xa83   :  { %2573 = vmatprep.subr.bf16.mxu0 %v6100_v22  ;;  %2614 = vmatprep.subr.bf16.mxu1 %v6103_v63 }
 0xb38   :  { %v2407_v52 = vpop.f32.mrb[64].mxu0  ;;  %v2448_v25 = vpop.f32.mrb[56].mxu1 }
 0xb39   :  { %v2408_v23 = vadd.f32 %v2407_v52, %v5988_v26  ;;  %v2449_v17 = vadd.f32 %v2448_v25, %v5990_v40  ;;  %v2409_v18 = vpop.f32.mrb[65].mxu0  ;;  %v2450_v31 = vpop.f32.mrb[57].mxu1 }
 0xb3a   :  { %v2410_v53 = vadd.f32 %v2409_v18, %v5992_v47  ;;  %v2451_v54 = vadd.f32 %v2450_v31, %v5994_v10  ;;  %v2411_v55 = vpop.f32.mrb[66].mxu0  ;;  %v2452_v41 = vpop.f32.mrb[58].mxu1 }
 0xb3b   :  { %v2455_v22 = vadd.f32 %v2408_v23, %v5286_v13  ;;  %v2457_v28 = vadd.f32 %v2449_v17, %v5290_v20  ;;  %v2412_v56 = vpop.f32.mrb[67].mxu0  ;;  %v2453_v63 = vpop.f32.mrb[59].mxu1 }
 0xb3c   :  { %v2456_v43 = vadd.f32 %v2410_v53, %v5294_v24  ;;  %v2458_v40 = vadd.f32 %v2451_v54, %v5305_v46 }
 0xb3d   :  { %v3896_v32 = vmul.f32 -1.442695, %v2455_v22  ;;  %v3898_v26 = vmul.f32 -1.442695, %v2457_v28 }
 0xb3e   :  { %v3897_v52 = vmul.f32 -1.442695, %v2456_v43  ;;  %v3899_v55 = vmul.f32 -1.442695, %v2458_v40 }
 0xb3f   :  { %4322 = vpow2.f32 %v3896_v32 }
 0xb40   :  { %4324 = vpow2.f32 %v3898_v26 }
 0xb41   :  { %4326 = vpow2.f32 %v3897_v52 }
 0xb49   :  { %v4323_v47 = vpop.eup %4322 }
 0xb4a   :  { %v4325_v10 = vpop.eup %4324  ;;  %v2471_v23 = vadd.f32 1.0, %v4323_v47 }
 0xb4b   :  { %v4327_v41 = vpop.eup %4326  ;;  %v2473_v18 = vadd.f32 1.0, %v4325_v10  ;;  %v6118_v10 = vld [vmem:[#allocation2] ss:$16 sps:$4 sm:$0xff]  }
 0xb4c   :  { %v2472_v25 = vadd.f32 1.0, %v4327_v41  ;;  %v6127_v41 = vld [vmem:[#allocation2 + $0x2c] ss:$16 sps:$4 sm:$0xff]  }
 0xb4d   :  { %4328 = vrcp.f32 %v2473_v18  ;;  %v6132_v18 = vld [vmem:[#allocation2 + $0x20] ss:$16 sps:$4 sm:$0xff]  }
 0xb4e   :  { %4330 = vpow2.f32 %v3899_v55  ;;  %v6121_v55 = vld [vmem:[#allocation2 + $0x8] ss:$16 sps:$4 sm:$0xff]  }
 0xb4f   :  { %4332 = vrcp.f32 %v2472_v25  ;;  %v6135_v25 = vld [vmem:[#allocation2 + $0x28] ss:$16 sps:$4 sm:$0xff]  }
 0xb50   :  { %4334 = vrcp.f32 %v2471_v23  ;;  %v6138_v23 = vld [vmem:[#allocation2 + $0x44] ss:$16 sps:$4 sm:$0xff]  }
 0xb57   :  { %v4329_v56 = vpop.eup %4328 }
 0xb58   :  { %v4331_v53 = vpop.eup %4330  ;;  %v2483_v28 = vmul.f32 2.0, %v4329_v56  ;;  %v6141_v56 = vld [vmem:[#allocation2 + $0x4c] ss:$16 sps:$4 sm:$0xff]  }
 0xb59   :  { %v4333_v43 = vpop.eup %4332  ;;  %v2474_v22 = vadd.f32 1.0, %v4331_v53  ;;  %v6144_v53 = vld [vmem:[#allocation2 + $0x40] ss:$16 sps:$4 sm:$0xff]  }
 0xb5a   :  { %v3900_v32 = vadd.f32 -1.0, %v2483_v28  ;;  %v4335_v17 = vpop.eup %4334  ;;  %v2485_v31 = vmul.f32 %v4333_v43, %v5911_v51  ;;  %v6124_v51 = vld [vmem:[#allocation2 + $0x24] ss:$16 sps:$4 sm:$0xff]   ;;  %v6147_v28 = vld [vmem:[#allocation2 + $0x48] ss:$16 sps:$4 sm:$0xff]  }
 0xb5b   :  { %4336 = vrcp.f32 %v2474_v22  ;;  %v6150_v43 = vld [vmem:[#allocation2 + $0x64] ss:$16 sps:$4 sm:$0xff]   ;;  %v6161_v22 = vld [vmem:[#allocation2 + $0x8c] ss:$16 sps:$4 sm:$0xff]  }
 0xb5c   :  { %v2486_v63 = vmul.f32 %v4335_v17, %v3900_v32  ;;  %v6153_v32 = vld [vmem:[#allocation2 + $0x6c] ss:$16 sps:$4 sm:$0xff]   ;;  %v6157_v17 = vld [vmem:[#allocation2 + $0x68] ss:$16 sps:$4 sm:$0xff]  }
 0xb5e   :  { %v6115_v54 = vadd.f32 %v2486_v63, %v2485_v31  ;;  %v6165_v63 = vld [vmem:[#allocation2 + $0x88] ss:$16 sps:$4 sm:$0xff]   ;;  %v6169_v31 = vld [vmem:[#allocation2 + $0xac] ss:$16 sps:$4 sm:$0xff]  }
 0xb60   :  { %4338 = vtanh.f32 %v6115_v54 }
 0xb65   :  { %v4337_v26 = vpop.eup %4336 }
 0xb6a   :  { %v4339_v52 = vpop.eup %4338 }
 0xb6b   :  { %v2489_v40 = vmul.f32 %v4339_v52, %v4337_v26  ;;  %v7400_v26 = vld [vmem:[#allocation70_spill] sm:$0xff] }
 0xb6d   :  { %v2490_v47 = vpack.c.bf16 %v2489_v40, %v2489_v40  ;;  %v7401_v40 = vld [vmem:[#allocation72_spill] sm:$0xff] }
 0xb6f   :  { %2524 = vmatmul.mubr.bf16.vlgmr.msra.gmra.mrb[68].mxu0 %v2490_v47  ;;  %2565 = vmatmul.mubr.bf16.vlgmr.msra.gmra.mrb[60].mxu1 %v2490_v47 }
 0xb70   :  { %2574 = vmatpush1.bf16.msra.mxu0 %v6118_v10  ;;  %2615 = vmatpush1.bf16.msra.mxu1 %v6121_v55 }
 0xb71   :  { %2575 = vmatprep.subr.bf16.mxu0 %v6124_v51  ;;  %2616 = vmatprep.subr.bf16.mxu1 %v6127_v41 }
 0xb72   :  { %2605 = vmatprep.mubr.bf16.mxu0 %v7108_v1  ;;  %2646 = vmatprep.mubr.bf16.mxu1 %v7108_v1 }
 0xb74   :  { %2576 = vmatpush1.bf16.msra.mxu0 %v6132_v18  ;;  %2617 = vmatpush1.bf16.msra.mxu1 %v6135_v25 }
 0xb75   :  { %2577 = vmatprep.subr.bf16.mxu0 %v6138_v23  ;;  %2618 = vmatprep.subr.bf16.mxu1 %v6141_v56 }
 0xb78   :  { %2578 = vmatpush1.bf16.msra.mxu0 %v6144_v53  ;;  %2619 = vmatpush1.bf16.msra.mxu1 %v6147_v28 }
 0xb79   :  { %2579 = vmatprep.subr.bf16.mxu0 %v6150_v43  ;;  %2620 = vmatprep.subr.bf16.mxu1 %v6153_v32 }
 0xb7c   :  { %2580 = vmatpush1.bf16.msra.mxu0 %v5710_v8  ;;  %2621 = vmatpush1.bf16.msra.mxu1 %v6157_v17  ;;  %v6173_v8 = vld [vmem:[#allocation2 + $0xa8] ss:$16 sps:$4 sm:$0xff]  }
 0xb7d   :  { %2581 = vmatprep.subr.bf16.mxu0 %v5714_v6  ;;  %2622 = vmatprep.subr.bf16.mxu1 %v6161_v22  ;;  %v6177_v6 = vld [vmem:[#allocation2 + $0xcc] ss:$16 sps:$4 sm:$0xff]  }
 0xb7e   :  { %7385 = vst [vmem:[#allocation53_spill] sm:$0xff] %v6177_v6 }
 0xb80   :  { %2582 = vmatpush1.bf16.msra.mxu0 %v5718_v0  ;;  %2623 = vmatpush1.bf16.msra.mxu1 %v6165_v63  ;;  %v6181_v0 = vld [vmem:[#allocation2 + $0xc8] ss:$16 sps:$4 sm:$0xff]  }
 0xb81   :  { %2583 = vmatprep.subr.bf16.mxu0 %v5722_v62  ;;  %2624 = vmatprep.subr.bf16.mxu1 %v6169_v31  ;;  %7386 = vst [vmem:[#allocation54_spill] sm:$0xff] %v6181_v0  ;;  %v6185_v62 = vld [vmem:[#allocation2 + $0xec] ss:$16 sps:$4 sm:$0xff]  }
 0xb82   :  { %7387 = vst [vmem:[#allocation55_spill] sm:$0xff] %v6185_v62 }
 0xb84   :  { %2584 = vmatpush1.bf16.msra.mxu0 %v5726_v44  ;;  %2625 = vmatpush1.bf16.msra.mxu1 %v6173_v8  ;;  %v6189_v44 = vld [vmem:[#allocation2 + $0xe8] ss:$16 sps:$4 sm:$0xff]  }
 0xb85   :  { %2585 = vmatprep.subr.bf16.mxu0 %v7309_v27  ;;  %2626 = vmatprep.subr.bf16.mxu1 %v6177_v6  ;;  %7388 = vst [vmem:[#allocation56_spill] sm:$0xff] %v6189_v44  ;;  %v7389_v27 = vld [vmem:[#allocation24_spill] sm:$0xff] }
 0xb88   :  { %2586 = vmatpush1.bf16.msra.mxu0 %v7311_v19  ;;  %2627 = vmatpush1.bf16.msra.mxu1 %v6181_v0  ;;  %v7390_v19 = vld [vmem:[#allocation14_spill] sm:$0xff] }
 0xb89   :  { %2587 = vmatprep.subr.bf16.mxu0 %v7313_v58  ;;  %2628 = vmatprep.subr.bf16.mxu1 %v6185_v62  ;;  %v7391_v58 = vld [vmem:[#allocation26_spill] sm:$0xff] }
 0xb8c   :  { %2588 = vmatpush1.bf16.msra.mxu0 %v7315_v39  ;;  %2629 = vmatpush1.bf16.msra.mxu1 %v6189_v44  ;;  %v7392_v39 = vld [vmem:[#allocation15_spill] sm:$0xff] }
 0xb8d   :  { %2709 = vmatprep.subr.bf16.mxu0 %v7317_v3  ;;  %2750 = vmatprep.subr.bf16.mxu1 %v7318_v59  ;;  %v7393_v3 = vld [vmem:[#allocation28_spill] sm:$0xff]  ;;  %v7394_v59 = vld [vmem:[#allocation75_spill] sm:$0xff] }
 0xb8f   :  { %2606 = vmatmul.mubr.bf16.vlgmr.msra.gmra.mrb[72].mxu0 %v6004_v61  ;;  %2647 = vmatmul.mubr.bf16.vlgmr.msra.gmra.mrb[64].mxu1 %v6004_v61 }
 0xb90   :  { %2710 = vmatpush1.bf16.msra.mxu0 %v7319_v16  ;;  %2751 = vmatpush1.bf16.msra.mxu1 %v7320_v12  ;;  %v7395_v16 = vld [vmem:[#allocation76_spill] sm:$0xff]  ;;  %v7396_v12 = vld [vmem:[#allocation77_spill] sm:$0xff] }
 0xb91   :  { %2711 = vmatprep.subr.bf16.mxu0 %v7321_v29  ;;  %2752 = vmatprep.subr.bf16.mxu1 %v7322_v33  ;;  %v7397_v29 = vld [vmem:[#allocation78_spill] sm:$0xff]  ;;  %v7398_v33 = vld [vmem:[#allocation16_spill] sm:$0xff] }
 0xb92   :  { %2741 = vmatprep.mubr.bf16.mxu0 %v7108_v1  ;;  %2782 = vmatprep.mubr.bf16.mxu1 %v7108_v1 }
 0xb94   :  { %2712 = vmatpush1.bf16.msra.mxu0 %v7323_v35  ;;  %2753 = vmatpush1.bf16.msra.mxu1 %v7324_v49  ;;  %v7399_v35 = vld [vmem:[#allocation30_spill] sm:$0xff] }
 0xb95   :  { %2713 = vmatprep.subr.bf16.mxu0 %v7325_v45  ;;  %2754 = vmatprep.subr.bf16.mxu1 %v7326_v42 }
 0xb98   :  { %2714 = vmatpush1.bf16.msra.mxu0 %v7327_v4  ;;  %2755 = vmatpush1.bf16.msra.mxu1 %v7328_v14 }
 0xb99   :  { %2715 = vmatprep.subr.bf16.mxu0 %v7329_v15  ;;  %2756 = vmatprep.subr.bf16.mxu1 %v7330_v5 }
 0xb9c   :  { %2716 = vmatpush1.bf16.msra.mxu0 %v7331_v36  ;;  %2757 = vmatpush1.bf16.msra.mxu1 %v7332_v37 }
 0xb9d   :  { %2717 = vmatprep.subr.bf16.mxu0 %v7333_v48  ;;  %2758 = vmatprep.subr.bf16.mxu1 %v7334_v30 }
 0xba0   :  { %2718 = vmatpush1.bf16.msra.mxu0 %v7335_v50  ;;  %2759 = vmatpush1.bf16.msra.mxu1 %v7336_v21 }
 0xba1   :  { %2719 = vmatprep.subr.bf16.mxu0 %v7337_v7  ;;  %2760 = vmatprep.subr.bf16.mxu1 %v7338_v38 }
 0xba4   :  { %2720 = vmatpush1.bf16.msra.mxu0 %v7339_v9  ;;  %2761 = vmatpush1.bf16.msra.mxu1 %v7389_v27 }
 0xba5   :  { %2721 = vmatprep.subr.bf16.mxu0 %v7390_v19  ;;  %2762 = vmatprep.subr.bf16.mxu1 %v7391_v58 }
 0xba8   :  { %2722 = vmatpush1.bf16.msra.mxu0 %v7392_v39  ;;  %2763 = vmatpush1.bf16.msra.mxu1 %v7393_v3 }
 0xba9   :  { %2723 = vmatprep.subr.bf16.mxu0 %v7394_v59  ;;  %2764 = vmatprep.subr.bf16.mxu1 %v7395_v16 }
 0xbac   :  { %2724 = vmatpush1.bf16.msra.mxu0 %v7396_v12  ;;  %2765 = vmatpush1.bf16.msra.mxu1 %v7397_v29 }
 0xbad   :  { %2827 = vmatprep.subr.bf16.mxu0 %v7398_v33  ;;  %2868 = vmatprep.subr.bf16.mxu1 %v7399_v35 }
 0xc42   :  { %v6230_v49 = vpop.f32.mrb[68].mxu0  ;;  %v6232_v45 = vpop.f32.mrb[60].mxu1 }
 0xc43   :  { %v6234_v42 = vpop.f32.mrb[69].mxu0  ;;  %v6236_v4 = vpop.f32.mrb[61].mxu1 }
 0xc44   :  { %v2529_v14 = vpop.f32.mrb[70].mxu0  ;;  %v2570_v15 = vpop.f32.mrb[62].mxu1 }
 0xc45   :  { %v2530_v5 = vpop.f32.mrb[71].mxu0  ;;  %v2571_v36 = vpop.f32.mrb[63].mxu1 }
 0xc62   :  { %v2607_v37 = vpop.f32.mrb[72].mxu0  ;;  %v2648_v48 = vpop.f32.mrb[64].mxu1 }
 0xc63   :  { %v2659_v30 = vrot.slane %v2607_v37, 6  ;;  %v2661_v50 = vrot.slane %v2648_v48, 6  ;;  %v2609_v21 = vpop.f32.mrb[73].mxu0  ;;  %v2650_v7 = vpop.f32.mrb[65].mxu1 }
 0xc64   :  { %v2660_v38 = vrot.slane %v2609_v21, 6  ;;  %v2611_v9 = vpop.f32.mrb[74].mxu0  ;;  %v2652_v61 = vpop.f32.mrb[66].mxu1  ;;  %v2662_v16 = vrot.slane %v2650_v7, 6  ;;  %v2698_v21 = vrot.slane %v6001_v60, 6  ;;  %v7402_v60 = vld [vmem:[#allocation17_spill] sm:$0xff] }
 0xc65   :  { %v2667_v52 = vadd.f32 %v2659_v30, %v7400_v26  ;;  %v2669_v47 = vadd.f32 %v2661_v50, %v7401_v40  ;;  %v2612_v27 = vpop.f32.mrb[75].mxu0  ;;  %v2653_v19 = vpop.f32.mrb[67].mxu1 }
 0xc66   :  { %v2668_v58 = vadd.f32 %v2660_v38, %v7353_v2  ;;  %v2670_v12 = vadd.f32 %v2662_v16, %v7354_v11 }
 0xc67   :  { %v3901_v39 = vmul.f32 -1.442695, %v2667_v52  ;;  %v3903_v3 = vmul.f32 -1.442695, %v2669_v47 }
 0xc68   :  { %v3902_v59 = vmul.f32 -1.442695, %v2668_v58  ;;  %v3904_v29 = vmul.f32 -1.442695, %v2670_v12  ;;  %v7403_v12 = vld [vmem:[#allocation31_spill] sm:$0xff] }
 0xc69   :  { %4340 = vpow2.f32 %v3901_v39 }
 0xc6a   :  { %4342 = vpow2.f32 %v3903_v3 }
 0xc6b   :  { %4344 = vpow2.f32 %v3902_v59 }
 0xc6c   :  { %4346 = vpow2.f32 %v3904_v29  ;;  %v7404_v29 = vld [vmem:[#allocation18_spill] sm:$0xff] }
 0xc73   :  { %v4341_v14 = vpop.eup %4340 }
 0xc74   :  { %v4343_v15 = vpop.eup %4342  ;;  %v2683_v48 = vadd.f32 1.0, %v4341_v14  ;;  %v7405_v14 = vld [vmem:[#allocation32_spill] sm:$0xff] }
 0xc75   :  { %v4345_v5 = vpop.eup %4344  ;;  %v2685_v36 = vadd.f32 1.0, %v4343_v15  ;;  %v7406_v15 = vld [vmem:[#allocation19_spill] sm:$0xff] }
 0xc76   :  { %v2684_v37 = vadd.f32 1.0, %v4345_v5  ;;  %v4347_v30 = vpop.eup %4346  ;;  %v7407_v5 = vld [vmem:[#allocation33_spill] sm:$0xff] }
 0xc77   :  { %4348 = vrcp.f32 %v2685_v36  ;;  %v2686_v47 = vadd.f32 1.0, %v4347_v30  ;;  %v7408_v36 = vld [vmem:[#allocation21_spill] sm:$0xff]  ;;  %v7411_v30 = vld [vmem:[#allocation35_spill] sm:$0xff] }
 0xc78   :  { %4350 = vrcp.f32 %v2684_v37  ;;  %v7409_v37 = vld [vmem:[#allocation34_spill] sm:$0xff] }
 0xc79   :  { %4352 = vrcp.f32 %v2683_v48  ;;  %v7410_v48 = vld [vmem:[#allocation23_spill] sm:$0xff] }
 0xc7a   :  { %4354 = vrcp.f32 %v2686_v47  ;;  %v7419_v47 = vld [vmem:[#allocation40_spill] sm:$0xff] }
 0xc81   :  { %v4349_v50 = vpop.eup %4348 }
 0xc82   :  { %v4351_v38 = vpop.eup %4350  ;;  %v2695_v7 = vmul.f32 2.0, %v4349_v50  ;;  %v7412_v50 = vld [vmem:[#allocation25_spill] sm:$0xff] }
 0xc83   :  { %v2700_v9 = vmul.f32 %v4351_v38, %v2698_v21  ;;  %v4353_v52 = vpop.eup %4352  ;;  %v7413_v21 = vld [vmem:[#allocation36_spill] sm:$0xff]  ;;  %v7414_v38 = vld [vmem:[#allocation27_spill] sm:$0xff] }
 0xc84   :  { %v3905_v61 = vadd.f32 -1.0, %v2695_v7  ;;  %v4355_v58 = vpop.eup %4354  ;;  %v7415_v7 = vld [vmem:[#allocation37_spill] sm:$0xff] }
 0xc86   :  { %v2701_v27 = vmul.f32 %v4353_v52, %v3905_v61  ;;  %v7417_v61 = vld [vmem:[#allocation38_spill] sm:$0xff]  ;;  %v7418_v52 = vld [vmem:[#allocation39_spill] sm:$0xff] }
 0xc88   :  { %v6243_v19 = vadd.f32 %v2701_v27, %v2700_v9  ;;  %v7416_v9 = vld [vmem:[#allocation29_spill] sm:$0xff] }
 0xc89   :  { %v7420_v27 = vld [vmem:[#allocation41_spill] sm:$0xff] }
 0xc8a   :  { %4356 = vtanh.f32 %v6243_v19 }
 0xc94   :  { %v4357_v39 = vpop.eup %4356 }
 0xc95   :  { %v2704_v3 = vmul.f32 %v4357_v39, %v4355_v58  ;;  %v7421_v58 = vld [vmem:[#allocation42_spill] sm:$0xff]  ;;  %v7422_v39 = vld [vmem:[#allocation43_spill] sm:$0xff] }
 0xc97   :  { %v2705_v59 = vpack.c.bf16 %v2704_v3, %v2704_v3  ;;  %v7423_v3 = vld [vmem:[#allocation48_spill] sm:$0xff] }
 0xc99   :  { %v6246_v16 = vrot.slane %v2705_v59, 1  ;;  %v7424_v59 = vld [vmem:[#allocation44_spill] sm:$0xff] }
 0xc9b   :  { %2742 = vmatmul.mubr.bf16.vlgmr.msra.gmra.mrb[76].mxu0 %v6246_v16  ;;  %2783 = vmatmul.mubr.bf16.vlgmr.msra.gmra.mrb[68].mxu1 %v6246_v16 }
 0xc9c   :  { %2828 = vmatpush1.bf16.msra.mxu0 %v6008_v34  ;;  %2869 = vmatpush1.bf16.msra.mxu1 %v6011_v57 }
 0xc9d   :  { %2829 = vmatprep.subr.bf16.mxu0 %v7402_v60  ;;  %2870 = vmatprep.subr.bf16.mxu1 %v7403_v12 }
 0xc9e   :  { %2859 = vmatprep.mubr.bf16.mxu0 %v7108_v1  ;;  %2900 = vmatprep.mubr.bf16.mxu1 %v7108_v1 }
 0xca0   :  { %2830 = vmatpush1.bf16.msra.mxu0 %v7404_v29  ;;  %2871 = vmatpush1.bf16.msra.mxu1 %v7405_v14 }
 0xca1   :  { %2831 = vmatprep.subr.bf16.mxu0 %v7406_v15  ;;  %2872 = vmatprep.subr.bf16.mxu1 %v7407_v5 }
 0xca4   :  { %2832 = vmatpush1.bf16.msra.mxu0 %v7408_v36  ;;  %2873 = vmatpush1.bf16.msra.mxu1 %v7409_v37 }
 0xca5   :  { %2833 = vmatprep.subr.bf16.mxu0 %v7410_v48  ;;  %2874 = vmatprep.subr.bf16.mxu1 %v7411_v30 }
 0xca8   :  { %2834 = vmatpush1.bf16.msra.mxu0 %v7412_v50  ;;  %2875 = vmatpush1.bf16.msra.mxu1 %v7413_v21 }
 0xca9   :  { %2835 = vmatprep.subr.bf16.mxu0 %v7414_v38  ;;  %2876 = vmatprep.subr.bf16.mxu1 %v7415_v7  ;;  %v7425_v38 = vld [vmem:[#allocation49_spill] sm:$0xff] }
 0xcaa   :  { %v7426_v7 = vld [vmem:[#allocation45_spill] sm:$0xff] }
 0xcac   :  { %2836 = vmatpush1.bf16.msra.mxu0 %v7416_v9  ;;  %2877 = vmatpush1.bf16.msra.mxu1 %v7417_v61  ;;  %v7427_v9 = vld [vmem:[#allocation50_spill] sm:$0xff] }
 0xcad   :  { %2837 = vmatprep.subr.bf16.mxu0 %v7418_v52  ;;  %2878 = vmatprep.subr.bf16.mxu1 %v7419_v47  ;;  %v7428_v61 = vld [vmem:[#allocation46_spill] sm:$0xff]  ;;  %v7429_v52 = vld [vmem:[#allocation51_spill] sm:$0xff] }
 0xcae   :  { %v7430_v47 = vld [vmem:[#allocation47_spill] sm:$0xff] }
 0xcb0   :  { %2838 = vmatpush1.bf16.msra.mxu0 %v7420_v27  ;;  %2879 = vmatpush1.bf16.msra.mxu1 %v7421_v58  ;;  %v7431_v27 = vld [vmem:[#allocation52_spill] sm:$0xff] }
 0xcb1   :  { %2839 = vmatprep.subr.bf16.mxu0 %v7422_v39  ;;  %2880 = vmatprep.subr.bf16.mxu1 %v7423_v3 }
 0xcb4   :  { %2840 = vmatpush1.bf16.msra.mxu0 %v7424_v59  ;;  %2881 = vmatpush1.bf16.msra.mxu1 %v7425_v38 }
 0xcb5   :  { %2841 = vmatprep.subr.bf16.mxu0 %v7426_v7  ;;  %2882 = vmatprep.subr.bf16.mxu1 %v7427_v9 }
 0xcb8   :  { %2842 = vmatpush1.bf16.msra.mxu0 %v7428_v61  ;;  %2883 = vmatpush1.bf16.msra.mxu1 %v7429_v52 }
 0xcb9   :  { %2909 = vmatprep.subr.bf16.mxu0 %v7430_v47  ;;  %2950 = vmatprep.subr.bf16.mxu1 %v7431_v27 }
 0xd6e   :  { %v2743_v58 = vpop.f32.mrb[76].mxu0  ;;  %v2784_v39 = vpop.f32.mrb[68].mxu1 }
 0xd6f   :  { %v2744_v3 = vadd.f32 %v2743_v58, %v6230_v49  ;;  %v2785_v59 = vadd.f32 %v2784_v39, %v6232_v45  ;;  %v2745_v21 = vpop.f32.mrb[77].mxu0  ;;  %v2786_v38 = vpop.f32.mrb[69].mxu1 }
 0xd70   :  { %v2746_v7 = vadd.f32 %v2745_v21, %v6234_v42  ;;  %v2787_v9 = vadd.f32 %v2786_v38, %v6236_v4  ;;  %v2747_v50 = vpop.f32.mrb[78].mxu0  ;;  %v2788_v61 = vpop.f32.mrb[70].mxu1 }
 0xd71   :  { %v2791_v52 = vadd.f32 %v2744_v3, %v5286_v13  ;;  %v2793_v47 = vadd.f32 %v2785_v59, %v5290_v20  ;;  %v2748_v30 = vpop.f32.mrb[79].mxu0  ;;  %v2789_v27 = vpop.f32.mrb[71].mxu1 }
 0xd72   :  { %v2792_v48 = vadd.f32 %v2746_v7, %v5294_v24  ;;  %v2794_v45 = vadd.f32 %v2787_v9, %v5305_v46 }
 0xd73   :  { %v3906_v37 = vmul.f32 -1.442695, %v2791_v52  ;;  %v3908_v49 = vmul.f32 -1.442695, %v2793_v47 }
 0xd74   :  { %v3907_v58 = vmul.f32 -1.442695, %v2792_v48  ;;  %v3909_v50 = vmul.f32 -1.442695, %v2794_v45 }
 0xd75   :  { %4358 = vpow2.f32 %v3906_v37 }
 0xd76   :  { %4360 = vpow2.f32 %v3908_v49 }
 0xd77   :  { %4362 = vpow2.f32 %v3907_v58 }
 0xd7f   :  { %v4359_v42 = vpop.eup %4358 }
 0xd80   :  { %v4361_v4 = vpop.eup %4360  ;;  %v2807_v39 = vadd.f32 1.0, %v4359_v42 }
 0xd81   :  { %v4363_v21 = vpop.eup %4362  ;;  %v2809_v38 = vadd.f32 1.0, %v4361_v4  ;;  %v6314_v4 = vld [vmem:[#allocation2 + $0x84] ss:$16 sps:$4 sm:$0xff]  }
 0xd82   :  { %v2808_v61 = vadd.f32 1.0, %v4363_v21  ;;  %v6322_v21 = vld [vmem:[#allocation2 + $0xa4] ss:$16 sps:$4 sm:$0xff]  }
 0xd83   :  { %4364 = vrcp.f32 %v2809_v38  ;;  %v6326_v38 = vld [vmem:[#allocation2 + $0xa0] ss:$16 sps:$4 sm:$0xff]  }
 0xd84   :  { %4366 = vpow2.f32 %v3909_v50  ;;  %v6318_v50 = vld [vmem:[#allocation2 + $0x80] ss:$16 sps:$4 sm:$0xff]  }
 0xd85   :  { %4368 = vrcp.f32 %v2808_v61  ;;  %v6330_v61 = vld [vmem:[#allocation2 + $0xc4] ss:$16 sps:$4 sm:$0xff]  }
 0xd86   :  { %4370 = vrcp.f32 %v2807_v39  ;;  %7432 = vst [vmem:[#allocation57_spill] sm:$0xff] %v6330_v61  ;;  %v6334_v39 = vld [vmem:[#allocation2 + $0xc0] ss:$16 sps:$4 sm:$0xff]  }
 0xd87   :  { %7433 = vst [vmem:[#allocation58_spill] sm:$0xff] %v6334_v39 }
 0xd8d   :  { %v4365_v30 = vpop.eup %4364 }
 0xd8e   :  { %v4367_v7 = vpop.eup %4366  ;;  %v2819_v52 = vmul.f32 2.0, %v4365_v30  ;;  %v6338_v30 = vld [vmem:[#allocation2 + $0xe4] ss:$16 sps:$4 sm:$0xff]  }
 0xd8f   :  { %v4369_v48 = vpop.eup %4368  ;;  %v2810_v27 = vadd.f32 1.0, %v4367_v7  ;;  %7434 = vst [vmem:[#allocation59_spill] sm:$0xff] %v6338_v30  ;;  %v6342_v7 = vld [vmem:[#allocation2 + $0xe0] ss:$16 sps:$4 sm:$0xff]  }
 0xd90   :  { %v3910_v37 = vadd.f32 -1.0, %v2819_v52  ;;  %v4371_v47 = vpop.eup %4370  ;;  %v2821_v9 = vmul.f32 %v4369_v48, %v6115_v54  ;;  %v6310_v54 = vld [vmem:[#allocation2 + $0x60] ss:$16 sps:$4 sm:$0xff]   ;;  %7435 = vst [vmem:[#allocation60_spill] sm:$0xff] %v6342_v7  ;;  %v6346_v52 = vld [vmem:[#allocation5 + $0x4] ss:$16 sps:$4 sm:$0xff]  }
 0xd91   :  { %4372 = vrcp.f32 %v2810_v27  ;;  %7436 = vst [vmem:[#allocation61_spill] sm:$0xff] %v6346_v52  ;;  %v6349_v48 = vld [vmem:[#allocation5 + $0xc] ss:$16 sps:$4 sm:$0xff]   ;;  %v6360_v27 = vld [vmem:[#allocation5 + $0x24] ss:$16 sps:$4 sm:$0xff]  }
 0xd92   :  { %v2822_v3 = vmul.f32 %v4371_v47, %v3910_v37  ;;  %7437 = vst [vmem:[#allocation62_spill] sm:$0xff] %v6349_v48  ;;  %v6354_v37 = vld [vmem:[#allocation5] ss:$16 sps:$4 sm:$0xff]   ;;  %v6357_v47 = vld [vmem:[#allocation5 + $0x8] ss:$16 sps:$4 sm:$0xff]   ;;  %7440 = vst [vmem:[#allocation65_spill] sm:$0xff] %v6360_v27 }
 0xd93   :  { %7438 = vst [vmem:[#allocation63_spill] sm:$0xff] %v6354_v37  ;;  %7439 = vst [vmem:[#allocation64_spill] sm:$0xff] %v6357_v47 }
 0xd94   :  { %v6293_v59 = vadd.f32 %v2822_v3, %v2821_v9  ;;  %v6363_v3 = vld [vmem:[#allocation5 + $0x2c] ss:$16 sps:$4 sm:$0xff]   ;;  %v6371_v9 = vld [vmem:[#allocation5 + $0x28] ss:$16 sps:$4 sm:$0xff]  }
 0xd95   :  { %7441 = vst [vmem:[#allocation66_spill] sm:$0xff] %v6363_v3  ;;  %7443 = vst [vmem:[#allocation68_spill] sm:$0xff] %v6371_v9 }
 0xd96   :  { %4374 = vtanh.f32 %v6293_v59 }
 0xd9b   :  { %v4373_v49 = vpop.eup %4372 }
 0xda0   :  { %v4375_v58 = vpop.eup %4374 }
 0xda1   :  { %v2825_v45 = vmul.f32 %v4375_v58, %v4373_v49  ;;  %v6374_v49 = vld [vmem:[#allocation5 + $0x44] ss:$16 sps:$4 sm:$0xff]   ;;  %v6377_v58 = vld [vmem:[#allocation5 + $0x4c] ss:$16 sps:$4 sm:$0xff]  }
 0xda2   :  { %7444 = vst [vmem:[#allocation69_spill] sm:$0xff] %v6374_v49  ;;  %7445 = vst [vmem:[#allocation20_spill] sm:$0xff] %v6377_v58 }
 0xda3   :  { %v2826_v42 = vpack.c.bf16 %v2825_v45, %v2825_v45  ;;  %v6380_v45 = vld [vmem:[#allocation5 + $0x40] ss:$16 sps:$4 sm:$0xff]  }
 0xda4   :  { %7446 = vst [vmem:[#allocation12_spill] sm:$0xff] %v6380_v45 }
 0xda5   :  { %2860 = vmatmul.mubr.bf16.vlgmr.msra.gmra.mrb[80].mxu0 %v2826_v42  ;;  %2901 = vmatmul.mubr.bf16.vlgmr.msra.gmra.mrb[72].mxu1 %v2826_v42  ;;  %v6383_v42 = vld [vmem:[#allocation5 + $0x48] ss:$16 sps:$4 sm:$0xff]  }
 0xda6   :  { %2910 = vmatpush1.bf16.msra.mxu0 %v6118_v10  ;;  %2951 = vmatpush1.bf16.msra.mxu1 %v6121_v55  ;;  %7447 = vst [vmem:[#allocation74_spill] sm:$0xff] %v6383_v42 }
 0xda7   :  { %2911 = vmatprep.subr.bf16.mxu0 %v6124_v51  ;;  %2952 = vmatprep.subr.bf16.mxu1 %v6127_v41 }
 0xda8   :  { %2941 = vmatprep.mubr.bf16.mxu0 %v7108_v1  ;;  %2982 = vmatprep.mubr.bf16.mxu1 %v7108_v1 }
 0xdaa   :  { %2912 = vmatpush1.bf16.msra.mxu0 %v6132_v18  ;;  %2953 = vmatpush1.bf16.msra.mxu1 %v6135_v25 }
 0xdab   :  { %2913 = vmatprep.subr.bf16.mxu0 %v6138_v23  ;;  %2954 = vmatprep.subr.bf16.mxu1 %v6141_v56 }
 0xdae   :  { %2914 = vmatpush1.bf16.msra.mxu0 %v6144_v53  ;;  %2955 = vmatpush1.bf16.msra.mxu1 %v6147_v28 }
 0xdaf   :  { %2915 = vmatprep.subr.bf16.mxu0 %v6150_v43  ;;  %2956 = vmatprep.subr.bf16.mxu1 %v6153_v32 }
 0xdb2   :  { %2916 = vmatpush1.bf16.msra.mxu0 %v6310_v54  ;;  %2957 = vmatpush1.bf16.msra.mxu1 %v6157_v17 }
 0xdb3   :  { %2917 = vmatprep.subr.bf16.mxu0 %v6314_v4  ;;  %2958 = vmatprep.subr.bf16.mxu1 %v6161_v22 }
 0xdb6   :  { %2918 = vmatpush1.bf16.msra.mxu0 %v6318_v50  ;;  %2959 = vmatpush1.bf16.msra.mxu1 %v6165_v63 }
 0xdb7   :  { %2919 = vmatprep.subr.bf16.mxu0 %v6322_v21  ;;  %2960 = vmatprep.subr.bf16.mxu1 %v6169_v31 }
 0xdba   :  { %2920 = vmatpush1.bf16.msra.mxu0 %v6326_v38  ;;  %2961 = vmatpush1.bf16.msra.mxu1 %v6173_v8 }
 0xdbb   :  { %2921 = vmatprep.subr.bf16.mxu0 %v6330_v61  ;;  %2962 = vmatprep.subr.bf16.mxu1 %v6177_v6 }
 0xdbe   :  { %2922 = vmatpush1.bf16.msra.mxu0 %v6334_v39  ;;  %2963 = vmatpush1.bf16.msra.mxu1 %v6181_v0 }
 0xdbf   :  { %2923 = vmatprep.subr.bf16.mxu0 %v6338_v30  ;;  %2964 = vmatprep.subr.bf16.mxu1 %v6185_v62 }
 0xdc2   :  { %2924 = vmatpush1.bf16.msra.mxu0 %v6342_v7  ;;  %2965 = vmatpush1.bf16.msra.mxu1 %v6189_v44 }
 0xdc3   :  { %3045 = vmatprep.subr.bf16.mxu0 %v6346_v52  ;;  %3086 = vmatprep.subr.bf16.mxu1 %v6349_v48 }
 0xdc5   :  { %2942 = vmatmul.mubr.bf16.vlgmr.msra.gmra.mrb[84].mxu0 %v6246_v16  ;;  %2983 = vmatmul.mubr.bf16.vlgmr.msra.gmra.mrb[76].mxu1 %v6246_v16  ;;  %v6368_v16 = vld [vmem:[#allocation5 + $0x20] ss:$16 sps:$4 sm:$0xff]  }
 0xdc6   :  { %3046 = vmatpush1.bf16.msra.mxu0 %v6354_v37  ;;  %3087 = vmatpush1.bf16.msra.mxu1 %v6357_v47  ;;  %7442 = vst [vmem:[#allocation67_spill] sm:$0xff] %v6368_v16 }
 0xdc7   :  { %3047 = vmatprep.subr.bf16.mxu0 %v6360_v27  ;;  %3088 = vmatprep.subr.bf16.mxu1 %v6363_v3 }
 0xdc8   :  { %3077 = vmatprep.mubr.bf16.mxu0 %v7108_v1  ;;  %3118 = vmatprep.mubr.bf16.mxu1 %v7108_v1 }
 0xdca   :  { %3048 = vmatpush1.bf16.msra.mxu0 %v6368_v16  ;;  %3089 = vmatpush1.bf16.msra.mxu1 %v6371_v9  ;;  %v6386_v16 = vld [vmem:[#allocation5 + $0x64] ss:$16 sps:$4 sm:$0xff]   ;;  %v6389_v9 = vld [vmem:[#allocation5 + $0x6c] ss:$16 sps:$4 sm:$0xff]  }
 0xdcb   :  { %3049 = vmatprep.subr.bf16.mxu0 %v6374_v49  ;;  %3090 = vmatprep.subr.bf16.mxu1 %v6377_v58  ;;  %7448 = vst [vmem:[#allocation22_spill] sm:$0xff] %v6386_v16  ;;  %7449 = vst [vmem:[#allocation13_spill] sm:$0xff] %v6389_v9  ;;  %v6392_v49 = vld [vmem:[#allocation5 + $0x60] ss:$16 sps:$4 sm:$0xff]   ;;  %v6395_v58 = vld [vmem:[#allocation5 + $0x68] ss:$16 sps:$4 sm:$0xff]  }
 0xdcc   :  { %7450 = vst [vmem:[#allocation71_spill] sm:$0xff] %v6392_v49  ;;  %7451 = vst [vmem:[#allocation73_spill] sm:$0xff] %v6395_v58 }
 0xdce   :  { %3050 = vmatpush1.bf16.msra.mxu0 %v6380_v45  ;;  %3091 = vmatpush1.bf16.msra.mxu1 %v6383_v42  ;;  %v6398_v45 = vld [vmem:[#allocation5 + $0x84] ss:$16 sps:$4 sm:$0xff]   ;;  %v6401_v42 = vld [vmem:[#allocation5 + $0x8c] ss:$16 sps:$4 sm:$0xff]  }
 0xdcf   :  { %3051 = vmatprep.subr.bf16.mxu0 %v6386_v16  ;;  %3092 = vmatprep.subr.bf16.mxu1 %v6389_v9  ;;  %7452 = vst [vmem:[#allocation24_spill] sm:$0xff] %v6398_v45  ;;  %7453 = vst [vmem:[#allocation14_spill] sm:$0xff] %v6401_v42  ;;  %v6404_v16 = vld [vmem:[#allocation5 + $0x80] ss:$16 sps:$4 sm:$0xff]   ;;  %v6407_v9 = vld [vmem:[#allocation5 + $0x88] ss:$16 sps:$4 sm:$0xff]  }
 0xdd0   :  { %7454 = vst [vmem:[#allocation26_spill] sm:$0xff] %v6404_v16  ;;  %7455 = vst [vmem:[#allocation15_spill] sm:$0xff] %v6407_v9 }
 0xdd2   :  { %3052 = vmatpush1.bf16.msra.mxu0 %v6392_v49  ;;  %3093 = vmatpush1.bf16.msra.mxu1 %v6395_v58  ;;  %v6410_v49 = vld [vmem:[#allocation5 + $0xa4] ss:$16 sps:$4 sm:$0xff]   ;;  %v6413_v58 = vld [vmem:[#allocation5 + $0xac] ss:$16 sps:$4 sm:$0xff]  }
 0xdd3   :  { %3053 = vmatprep.subr.bf16.mxu0 %v6398_v45  ;;  %3094 = vmatprep.subr.bf16.mxu1 %v6401_v42  ;;  %7456 = vst [vmem:[#allocation28_spill] sm:$0xff] %v6410_v49  ;;  %7457 = vst [vmem:[#allocation75_spill] sm:$0xff] %v6413_v58  ;;  %v6416_v45 = vld [vmem:[#allocation5 + $0xa0] ss:$16 sps:$4 sm:$0xff]   ;;  %v6419_v42 = vld [vmem:[#allocation5 + $0xa8] ss:$16 sps:$4 sm:$0xff]  }
 0xdd4   :  { %7458 = vst [vmem:[#allocation76_spill] sm:$0xff] %v6416_v45  ;;  %7459 = vst [vmem:[#allocation77_spill] sm:$0xff] %v6419_v42 }
 0xdd6   :  { %3054 = vmatpush1.bf16.msra.mxu0 %v6404_v16  ;;  %3095 = vmatpush1.bf16.msra.mxu1 %v6407_v9  ;;  %v6422_v16 = vld [vmem:[#allocation5 + $0xc4] ss:$16 sps:$4 sm:$0xff]   ;;  %v6425_v9 = vld [vmem:[#allocation5 + $0xcc] ss:$16 sps:$4 sm:$0xff]  }
 0xdd7   :  { %3055 = vmatprep.subr.bf16.mxu0 %v6410_v49  ;;  %3096 = vmatprep.subr.bf16.mxu1 %v6413_v58  ;;  %7460 = vst [vmem:[#allocation78_spill] sm:$0xff] %v6422_v16  ;;  %7461 = vst [vmem:[#allocation16_spill] sm:$0xff] %v6425_v9  ;;  %v6428_v49 = vld [vmem:[#allocation5 + $0xc0] ss:$16 sps:$4 sm:$0xff]   ;;  %v6431_v58 = vld [vmem:[#allocation5 + $0xc8] ss:$16 sps:$4 sm:$0xff]  }
 0xdd8   :  { %7462 = vst [vmem:[#allocation30_spill] sm:$0xff] %v6428_v49  ;;  %7463 = vst [vmem:[#allocation72_spill] sm:$0xff] %v6431_v58 }
 0xdda   :  { %3056 = vmatpush1.bf16.msra.mxu0 %v6416_v45  ;;  %3097 = vmatpush1.bf16.msra.mxu1 %v6419_v42  ;;  %v6434_v45 = vld [vmem:[#allocation5 + $0xe4] ss:$16 sps:$4 sm:$0xff]   ;;  %v6437_v42 = vld [vmem:[#allocation5 + $0xec] ss:$16 sps:$4 sm:$0xff]  }
 0xddb   :  { %3057 = vmatprep.subr.bf16.mxu0 %v6422_v16  ;;  %3098 = vmatprep.subr.bf16.mxu1 %v6425_v9  ;;  %7464 = vst [vmem:[#allocation17_spill] sm:$0xff] %v6434_v45  ;;  %7465 = vst [vmem:[#allocation31_spill] sm:$0xff] %v6437_v42  ;;  %v6440_v16 = vld [vmem:[#allocation5 + $0xe0] ss:$16 sps:$4 sm:$0xff]   ;;  %v6443_v9 = vld [vmem:[#allocation5 + $0xe8] ss:$16 sps:$4 sm:$0xff]  }
 0xddc   :  { %7466 = vst [vmem:[#allocation18_spill] sm:$0xff] %v6440_v16  ;;  %7467 = vst [vmem:[#allocation32_spill] sm:$0xff] %v6443_v9 }
 0xdde   :  { %3058 = vmatpush1.bf16.msra.mxu0 %v6428_v49  ;;  %3099 = vmatpush1.bf16.msra.mxu1 %v6431_v58 }
 0xddf   :  { %3059 = vmatprep.subr.bf16.mxu0 %v6434_v45  ;;  %3100 = vmatprep.subr.bf16.mxu1 %v6437_v42 }
 0xde2   :  { %3060 = vmatpush1.bf16.msra.mxu0 %v6440_v16  ;;  %3101 = vmatpush1.bf16.msra.mxu1 %v6443_v9 }
 0xde3   :  { %3163 = vmatprep.subr.bf16.mxu0 %v7398_v33  ;;  %3204 = vmatprep.subr.bf16.mxu1 %v7399_v35 }
 0xe78   :  { %v6448_v58 = vpop.f32.mrb[80].mxu0  ;;  %v6450_v49 = vpop.f32.mrb[72].mxu1 }
 0xe79   :  { %v6452_v45 = vpop.f32.mrb[81].mxu0  ;;  %v6454_v3 = vpop.f32.mrb[73].mxu1 }
 0xe7a   :  { %v2865_v42 = vpop.f32.mrb[82].mxu0  ;;  %v2906_v27 = vpop.f32.mrb[74].mxu1 }
 0xe7b   :  { %v2866_v47 = vpop.f32.mrb[83].mxu0  ;;  %v2907_v16 = vpop.f32.mrb[75].mxu1 }
 0xe98   :  { %v2943_v37 = vpop.f32.mrb[84].mxu0  ;;  %v2984_v48 = vpop.f32.mrb[76].mxu1 }
 0xe99   :  { %v2995_v52 = vrot.slane %v2943_v37, 4  ;;  %v2997_v9 = vrot.slane %v2984_v48, 4  ;;  %v2945_v44 = vpop.f32.mrb[85].mxu0  ;;  %v2986_v33 = vpop.f32.mrb[77].mxu1 }
 0xe9a   :  { %v2996_v7 = vrot.slane %v2945_v44, 4  ;;  %v2947_v35 = vpop.f32.mrb[86].mxu0  ;;  %v2988_v62 = vpop.f32.mrb[78].mxu1  ;;  %v2998_v37 = vrot.slane %v2986_v33, 4 }
 0xe9b   :  { %v3003_v30 = vadd.f32 %v2995_v52, %v7400_v26  ;;  %v3005_v0 = vadd.f32 %v2997_v9, %v7401_v40  ;;  %v2948_v39 = vpop.f32.mrb[87].mxu0  ;;  %v2989_v6 = vpop.f32.mrb[79].mxu1 }
 0xe9c   :  { %v3004_v42 = vadd.f32 %v2996_v7, %v7353_v2  ;;  %v3006_v48 = vadd.f32 %v2998_v37, %v7354_v11 }
 0xe9d   :  { %v3911_v27 = vmul.f32 -1.442695, %v3003_v30  ;;  %v3913_v47 = vmul.f32 -1.442695, %v3005_v0  ;;  %v3034_v30 = vrot.slane %v6243_v19, 6  ;;  %v7470_v19 = vld [vmem:[#allocation35_spill] sm:$0xff] }
 0xe9e   :  { %v3912_v16 = vmul.f32 -1.442695, %v3004_v42  ;;  %v3914_v44 = vmul.f32 -1.442695, %v3006_v48 }
 0xe9f   :  { %4376 = vpow2.f32 %v3911_v27 }
 0xea0   :  { %4378 = vpow2.f32 %v3913_v47 }
 0xea1   :  { %4380 = vpow2.f32 %v3912_v16 }
 0xea2   :  { %4382 = vpow2.f32 %v3914_v44 }
 0xea9   :  { %v4377_v35 = vpop.eup %4376 }
 0xeaa   :  { %v4379_v62 = vpop.eup %4378  ;;  %v3019_v39 = vadd.f32 1.0, %v4377_v35 }
 0xeab   :  { %v4381_v61 = vpop.eup %4380  ;;  %v3021_v52 = vadd.f32 1.0, %v4379_v62  ;;  %v7473_v62 = vld [vmem:[#allocation27_spill] sm:$0xff] }
 0xeac   :  { %v3020_v26 = vadd.f32 1.0, %v4381_v61  ;;  %v4383_v6 = vpop.eup %4382 }
 0xead   :  { %4384 = vrcp.f32 %v3021_v52  ;;  %v3022_v47 = vadd.f32 1.0, %v4383_v6  ;;  %v7479_v52 = vld [vmem:[#allocation41_spill] sm:$0xff]  ;;  %v7481_v6 = vld [vmem:[#allocation43_spill] sm:$0xff] }
 0xeae   :  { %4386 = vrcp.f32 %v3020_v26 }
 0xeaf   :  { %4388 = vrcp.f32 %v3019_v39  ;;  %v7480_v39 = vld [vmem:[#allocation42_spill] sm:$0xff] }
 0xeb0   :  { %4390 = vrcp.f32 %v3022_v47  ;;  %v7489_v47 = vld [vmem:[#allocation47_spill] sm:$0xff] }
 0xeb7   :  { %v4385_v0 = vpop.eup %4384 }
 0xeb8   :  { %v4387_v7 = vpop.eup %4386  ;;  %v3031_v9 = vmul.f32 2.0, %v4385_v0  ;;  %v7482_v0 = vld [vmem:[#allocation48_spill] sm:$0xff] }
 0xeb9   :  { %v3036_v33 = vmul.f32 %v4387_v7, %v3034_v30  ;;  %v4389_v27 = vpop.eup %4388  ;;  %v7483_v30 = vld [vmem:[#allocation44_spill] sm:$0xff]  ;;  %v7484_v7 = vld [vmem:[#allocation49_spill] sm:$0xff] }
 0xeba   :  { %v3915_v42 = vadd.f32 -1.0, %v3031_v9  ;;  %v4391_v61 = vpop.eup %4390  ;;  %v7485_v9 = vld [vmem:[#allocation45_spill] sm:$0xff] }
 0xebc   :  { %v3037_v16 = vmul.f32 %v4389_v27, %v3915_v42  ;;  %v7487_v42 = vld [vmem:[#allocation46_spill] sm:$0xff]  ;;  %v7488_v27 = vld [vmem:[#allocation51_spill] sm:$0xff] }
 0xebe   :  { %v6461_v37 = vadd.f32 %v3037_v16, %v3036_v33  ;;  %v7486_v33 = vld [vmem:[#allocation50_spill] sm:$0xff]  ;;  %v7490_v16 = vld [vmem:[#allocation52_spill] sm:$0xff] }
 0xec0   :  { %4392 = vtanh.f32 %v6461_v37 }
 0xeca   :  { %v4393_v48 = vpop.eup %4392 }
 0xecb   :  { %v3040_v26 = vmul.f32 %v4393_v48, %v4391_v61 }
 0xecd   :  { %v3041_v44 = vpack.c.bf16 %v3040_v26, %v3040_v26 }
 0xecf   :  { %v6464_v35 = vrot.slane %v3041_v44, 2 }
 0xed1   :  { %3078 = vmatmul.mubr.bf16.vlgmr.msra.gmra.mrb[88].mxu0 %v6464_v35  ;;  %3119 = vmatmul.mubr.bf16.vlgmr.msra.gmra.mrb[80].mxu1 %v6464_v35 }
 0xed2   :  { %3164 = vmatpush1.bf16.msra.mxu0 %v6008_v34  ;;  %3205 = vmatpush1.bf16.msra.mxu1 %v6011_v57  ;;  %v7468_v34 = vld [vmem:[#allocation34_spill] sm:$0xff]  ;;  %v7469_v57 = vld [vmem:[#allocation23_spill] sm:$0xff] }
 0xed3   :  { %3165 = vmatprep.subr.bf16.mxu0 %v7402_v60  ;;  %3206 = vmatprep.subr.bf16.mxu1 %v7403_v12  ;;  %v7471_v60 = vld [vmem:[#allocation25_spill] sm:$0xff]  ;;  %v7472_v12 = vld [vmem:[#allocation36_spill] sm:$0xff] }
 0xed4   :  { %3195 = vmatprep.mubr.bf16.mxu0 %v7108_v1  ;;  %3236 = vmatprep.mubr.bf16.mxu1 %v7108_v1 }
 0xed6   :  { %3166 = vmatpush1.bf16.msra.mxu0 %v7404_v29  ;;  %3207 = vmatpush1.bf16.msra.mxu1 %v7405_v14  ;;  %v7474_v29 = vld [vmem:[#allocation37_spill] sm:$0xff] }
 0xed7   :  { %3167 = vmatprep.subr.bf16.mxu0 %v7406_v15  ;;  %3208 = vmatprep.subr.bf16.mxu1 %v7407_v5  ;;  %v7475_v14 = vld [vmem:[#allocation29_spill] sm:$0xff]  ;;  %v7476_v15 = vld [vmem:[#allocation38_spill] sm:$0xff]  ;;  %v7477_v5 = vld [vmem:[#allocation39_spill] sm:$0xff] }
 0xeda   :  { %3168 = vmatpush1.bf16.msra.mxu0 %v7408_v36  ;;  %3209 = vmatpush1.bf16.msra.mxu1 %v7468_v34  ;;  %v7478_v36 = vld [vmem:[#allocation40_spill] sm:$0xff] }
 0xedb   :  { %3169 = vmatprep.subr.bf16.mxu0 %v7469_v57  ;;  %3210 = vmatprep.subr.bf16.mxu1 %v7470_v19 }
 0xede   :  { %3170 = vmatpush1.bf16.msra.mxu0 %v7471_v60  ;;  %3211 = vmatpush1.bf16.msra.mxu1 %v7472_v12 }
 0xedf   :  { %3171 = vmatprep.subr.bf16.mxu0 %v7473_v62  ;;  %3212 = vmatprep.subr.bf16.mxu1 %v7474_v29 }
 0xee2   :  { %3172 = vmatpush1.bf16.msra.mxu0 %v7475_v14  ;;  %3213 = vmatpush1.bf16.msra.mxu1 %v7476_v15 }
 0xee3   :  { %3173 = vmatprep.subr.bf16.mxu0 %v7477_v5  ;;  %3214 = vmatprep.subr.bf16.mxu1 %v7478_v36 }
 0xee6   :  { %3174 = vmatpush1.bf16.msra.mxu0 %v7479_v52  ;;  %3215 = vmatpush1.bf16.msra.mxu1 %v7480_v39 }
 0xee7   :  { %3175 = vmatprep.subr.bf16.mxu0 %v7481_v6  ;;  %3216 = vmatprep.subr.bf16.mxu1 %v7482_v0 }
 0xeea   :  { %3176 = vmatpush1.bf16.msra.mxu0 %v7483_v30  ;;  %3217 = vmatpush1.bf16.msra.mxu1 %v7484_v7 }
 0xeeb   :  { %3177 = vmatprep.subr.bf16.mxu0 %v7485_v9  ;;  %3218 = vmatprep.subr.bf16.mxu1 %v7486_v33 }
 0xeee   :  { %3178 = vmatpush1.bf16.msra.mxu0 %v7487_v42  ;;  %3219 = vmatpush1.bf16.msra.mxu1 %v7488_v27 }
 0xeef   :  { %3245 = vmatprep.subr.bf16.mxu0 %v7489_v47  ;;  %3286 = vmatprep.subr.bf16.mxu1 %v7490_v16 }
 0xfa4   :  { %v3079_v61 = vpop.f32.mrb[88].mxu0  ;;  %v3120_v48 = vpop.f32.mrb[80].mxu1 }
 0xfa5   :  { %v3080_v26 = vadd.f32 %v3079_v61, %v6448_v58  ;;  %v3121_v44 = vadd.f32 %v3120_v48, %v6450_v49  ;;  %v3081_v34 = vpop.f32.mrb[89].mxu0  ;;  %v3122_v57 = vpop.f32.mrb[81].mxu1 }
 0xfa6   :  { %v3082_v19 = vadd.f32 %v3081_v34, %v6452_v45  ;;  %v3123_v60 = vadd.f32 %v3122_v57, %v6454_v3  ;;  %v3083_v12 = vpop.f32.mrb[90].mxu0  ;;  %v3124_v62 = vpop.f32.mrb[82].mxu1 }
 0xfa7   :  { %v3127_v29 = vadd.f32 %v3080_v26, %v5286_v13  ;;  %v3129_v14 = vadd.f32 %v3121_v44, %v5290_v20  ;;  %v3084_v15 = vpop.f32.mrb[91].mxu0  ;;  %v3125_v5 = vpop.f32.mrb[83].mxu1  ;;  %v7516_v62 = vld [vmem:[#allocation14_spill] sm:$0xff] }
 0xfa8   :  { %v3128_v36 = vadd.f32 %v3082_v19, %v5294_v24  ;;  %v3130_v49 = vadd.f32 %v3123_v60, %v5305_v46  ;;  %v7519_v15 = vld [vmem:[#allocation28_spill] sm:$0xff]  ;;  %v7520_v5 = vld [vmem:[#allocation75_spill] sm:$0xff] }
 0xfa9   :  { %v3916_v52 = vmul.f32 -1.442695, %v3127_v29  ;;  %v3918_v58 = vmul.f32 -1.442695, %v3129_v14  ;;  %v7517_v29 = vld [vmem:[#allocation26_spill] sm:$0xff]  ;;  %v7518_v14 = vld [vmem:[#allocation15_spill] sm:$0xff] }
 0xfaa   :  { %v3917_v39 = vmul.f32 -1.442695, %v3128_v36  ;;  %v3919_v6 = vmul.f32 -1.442695, %v3130_v49  ;;  %v7521_v36 = vld [vmem:[#allocation76_spill] sm:$0xff]  ;;  %v7525_v49 = vld [vmem:[#allocation30_spill] sm:$0xff] }
 0xfab   :  { %4394 = vpow2.f32 %v3916_v52  ;;  %v7522_v52 = vld [vmem:[#allocation77_spill] sm:$0xff] }
 0xfac   :  { %4396 = vpow2.f32 %v3918_v58  ;;  %v7523_v58 = vld [vmem:[#allocation78_spill] sm:$0xff] }
 0xfad   :  { %4398 = vpow2.f32 %v3917_v39  ;;  %v7524_v39 = vld [vmem:[#allocation16_spill] sm:$0xff] }
 0xfb5   :  { %v4395_v45 = vpop.eup %4394 }
 0xfb6   :  { %v4397_v3 = vpop.eup %4396  ;;  %v3143_v9 = vadd.f32 1.0, %v4395_v45  ;;  %v7526_v45 = vld [vmem:[#allocation72_spill] sm:$0xff] }
 0xfb7   :  { %v4399_v0 = vpop.eup %4398  ;;  %v3145_v30 = vadd.f32 1.0, %v4397_v3  ;;  %v7527_v3 = vld [vmem:[#allocation17_spill] sm:$0xff] }
 0xfb8   :  { %v3144_v7 = vadd.f32 1.0, %v4399_v0  ;;  %v7529_v0 = vld [vmem:[#allocation18_spill] sm:$0xff] }
 0xfb9   :  { %4400 = vrcp.f32 %v3145_v30  ;;  %v7530_v30 = vld [vmem:[#allocation32_spill] sm:$0xff] }
 0xfba   :  { %4402 = vpow2.f32 %v3919_v6  ;;  %v7528_v6 = vld [vmem:[#allocation31_spill] sm:$0xff] }
 0xfbb   :  { %4404 = vrcp.f32 %v3144_v7 }
 0xfbc   :  { %4406 = vrcp.f32 %v3143_v9 }
 0xfc3   :  { %v4401_v33 = vpop.eup %4400 }
 0xfc4   :  { %v4403_v42 = vpop.eup %4402  ;;  %v3155_v27 = vmul.f32 2.0, %v4401_v33 }
 0xfc5   :  { %v4405_v47 = vpop.eup %4404  ;;  %v3146_v48 = vadd.f32 1.0, %v4403_v42 }
 0xfc6   :  { %v3920_v16 = vadd.f32 -1.0, %v3155_v27  ;;  %v4407_v61 = vpop.eup %4406  ;;  %v3157_v44 = vmul.f32 %v4405_v47, %v6293_v59  ;;  %v7508_v59 = vld [vmem:[#allocation20_spill] sm:$0xff] }
 0xfc7   :  { %4408 = vrcp.f32 %v3146_v48 }
 0xfc8   :  { %v3158_v26 = vmul.f32 %v4407_v61, %v3920_v16 }
 0xfca   :  { %v6511_v34 = vadd.f32 %v3158_v26, %v3157_v44 }
 0xfcc   :  { %4410 = vtanh.f32 %v6511_v34 }
 0xfd1   :  { %v4409_v57 = vpop.eup %4408 }
 0xfd6   :  { %v4411_v19 = vpop.eup %4410 }
 0xfd7   :  { %v3161_v60 = vmul.f32 %v4411_v19, %v4409_v57 }
 0xfd9   :  { %v3162_v12 = vpack.c.bf16 %v3161_v60, %v3161_v60 }
 0xfdb   :  { %3196 = vmatmul.mubr.bf16.vlgmr.msra.gmra.mrb[92].mxu0 %v3162_v12  ;;  %3237 = vmatmul.mubr.bf16.vlgmr.msra.gmra.mrb[84].mxu1 %v3162_v12 }
 0xfdc   :  { %3246 = vmatpush1.bf16.msra.mxu0 %v6118_v10  ;;  %3287 = vmatpush1.bf16.msra.mxu1 %v6121_v55  ;;  %v7491_v10 = vld [vmem:[#allocation57_spill] sm:$0xff] }
 0xfdd   :  { %3247 = vmatprep.subr.bf16.mxu0 %v6124_v51  ;;  %3288 = vmatprep.subr.bf16.mxu1 %v6127_v41  ;;  %v7492_v55 = vld [vmem:[#allocation53_spill] sm:$0xff]  ;;  %v7493_v51 = vld [vmem:[#allocation58_spill] sm:$0xff] }
 0xfde   :  { %3277 = vmatprep.mubr.bf16.mxu0 %v7108_v1  ;;  %3318 = vmatprep.mubr.bf16.mxu1 %v7108_v1  ;;  %v7494_v41 = vld [vmem:[#allocation54_spill] sm:$0xff] }
 0xfe0   :  { %3248 = vmatpush1.bf16.msra.mxu0 %v6132_v18  ;;  %3289 = vmatpush1.bf16.msra.mxu1 %v6135_v25  ;;  %v7495_v18 = vld [vmem:[#allocation59_spill] sm:$0xff] }
 0xfe1   :  { %3249 = vmatprep.subr.bf16.mxu0 %v6138_v23  ;;  %3290 = vmatprep.subr.bf16.mxu1 %v6141_v56  ;;  %v7496_v25 = vld [vmem:[#allocation55_spill] sm:$0xff]  ;;  %v7497_v23 = vld [vmem:[#allocation60_spill] sm:$0xff] }
 0xfe2   :  { %v7498_v56 = vld [vmem:[#allocation56_spill] sm:$0xff] }
 0xfe4   :  { %3250 = vmatpush1.bf16.msra.mxu0 %v6144_v53  ;;  %3291 = vmatpush1.bf16.msra.mxu1 %v6147_v28  ;;  %v7499_v53 = vld [vmem:[#allocation61_spill] sm:$0xff]  ;;  %v7500_v28 = vld [vmem:[#allocation62_spill] sm:$0xff] }
 0xfe5   :  { %3251 = vmatprep.subr.bf16.mxu0 %v6150_v43  ;;  %3292 = vmatprep.subr.bf16.mxu1 %v6153_v32  ;;  %v7501_v43 = vld [vmem:[#allocation63_spill] sm:$0xff]  ;;  %v7502_v32 = vld [vmem:[#allocation64_spill] sm:$0xff] }
 0xfe8   :  { %3252 = vmatpush1.bf16.msra.mxu0 %v6310_v54  ;;  %3293 = vmatpush1.bf16.msra.mxu1 %v6157_v17  ;;  %v7503_v17 = vld [vmem:[#allocation65_spill] sm:$0xff]  ;;  %v7509_v54 = vld [vmem:[#allocation12_spill] sm:$0xff] }
 0xfe9   :  { %3253 = vmatprep.subr.bf16.mxu0 %v6314_v4  ;;  %3294 = vmatprep.subr.bf16.mxu1 %v6161_v22  ;;  %v7504_v22 = vld [vmem:[#allocation66_spill] sm:$0xff] }
 0xfea   :  { %v7510_v4 = vld [vmem:[#allocation74_spill] sm:$0xff] }
 0xfec   :  { %3254 = vmatpush1.bf16.msra.mxu0 %v6318_v50  ;;  %3295 = vmatpush1.bf16.msra.mxu1 %v6165_v63  ;;  %v7505_v63 = vld [vmem:[#allocation67_spill] sm:$0xff]  ;;  %v7511_v50 = vld [vmem:[#allocation22_spill] sm:$0xff] }
 0xfed   :  { %3255 = vmatprep.subr.bf16.mxu0 %v6322_v21  ;;  %3296 = vmatprep.subr.bf16.mxu1 %v6169_v31  ;;  %v7506_v31 = vld [vmem:[#allocation68_spill] sm:$0xff]  ;;  %v7512_v21 = vld [vmem:[#allocation13_spill] sm:$0xff] }
 0xff0   :  { %3256 = vmatpush1.bf16.msra.mxu0 %v6326_v38  ;;  %3297 = vmatpush1.bf16.msra.mxu1 %v6173_v8  ;;  %v7507_v8 = vld [vmem:[#allocation69_spill] sm:$0xff]  ;;  %v7513_v38 = vld [vmem:[#allocation71_spill] sm:$0xff] }
 0xff1   :  { %3257 = vmatprep.subr.bf16.mxu0 %v7491_v10  ;;  %3298 = vmatprep.subr.bf16.mxu1 %v7492_v55 }
 0xff4   :  { %3258 = vmatpush1.bf16.msra.mxu0 %v7493_v51  ;;  %3299 = vmatpush1.bf16.msra.mxu1 %v7494_v41  ;;  %v7531_v51 = vld [vmem:[#allocation70_spill] sm:$0xff] }
 0xff5   :  { %3259 = vmatprep.subr.bf16.mxu0 %v7495_v18  ;;  %3300 = vmatprep.subr.bf16.mxu1 %v7496_v25 }
 0xff8   :  { %3260 = vmatpush1.bf16.msra.mxu0 %v7497_v23  ;;  %3301 = vmatpush1.bf16.msra.mxu1 %v7498_v56 }
 0xff9   :  { %3381 = vmatprep.subr.bf16.mxu0 %v7499_v53  ;;  %3422 = vmatprep.subr.bf16.mxu1 %v7500_v28 }
 0xffb   :  { %3278 = vmatmul.mubr.bf16.vlgmr.msra.gmra.mrb[96].mxu0 %v6464_v35  ;;  %3319 = vmatmul.mubr.bf16.vlgmr.msra.gmra.mrb[88].mxu1 %v6464_v35  ;;  %v7514_v35 = vld [vmem:[#allocation73_spill] sm:$0xff] }
 0xffc   :  { %3382 = vmatpush1.bf16.msra.mxu0 %v7501_v43  ;;  %3423 = vmatpush1.bf16.msra.mxu1 %v7502_v32 }
 0xffd   :  { %3383 = vmatprep.subr.bf16.mxu0 %v7503_v17  ;;  %3424 = vmatprep.subr.bf16.mxu1 %v7504_v22 }
 0xffe   :  { %3413 = vmatprep.mubr.bf16.mxu0 %v7108_v1  ;;  %3454 = vmatprep.mubr.bf16.mxu1 %v7108_v1  ;;  %v7515_v1 = vld [vmem:[#allocation24_spill] sm:$0xff] }
0x1000   :  { %3384 = vmatpush1.bf16.msra.mxu0 %v7505_v63  ;;  %3425 = vmatpush1.bf16.msra.mxu1 %v7506_v31 }
0x1001   :  { %3385 = vmatprep.subr.bf16.mxu0 %v7507_v8  ;;  %3426 = vmatprep.subr.bf16.mxu1 %v7508_v59 }
0x1004   :  { %3386 = vmatpush1.bf16.msra.mxu0 %v7509_v54  ;;  %3427 = vmatpush1.bf16.msra.mxu1 %v7510_v4 }
0x1005   :  { %3387 = vmatprep.subr.bf16.mxu0 %v7511_v50  ;;  %3428 = vmatprep.subr.bf16.mxu1 %v7512_v21  ;;  %v3370_v50 = vrot.slane %v6461_v37, 6  ;;  %v4150_v37 = vld [vmem:[%s6683_s10] sm:$0xff]  }
0x1008   :  { %3388 = vmatpush1.bf16.msra.mxu0 %v7513_v38  ;;  %3429 = vmatpush1.bf16.msra.mxu1 %v7514_v35 }
0x1009   :  { %3389 = vmatprep.subr.bf16.mxu0 %v7515_v1  ;;  %3430 = vmatprep.subr.bf16.mxu1 %v7516_v62 }
0x100c   :  { %3390 = vmatpush1.bf16.msra.mxu0 %v7517_v29  ;;  %3431 = vmatpush1.bf16.msra.mxu1 %v7518_v14 }
0x100d   :  { %3391 = vmatprep.subr.bf16.mxu0 %v7519_v15  ;;  %3432 = vmatprep.subr.bf16.mxu1 %v7520_v5 }
0x1010   :  { %3392 = vmatpush1.bf16.msra.mxu0 %v7521_v36  ;;  %3433 = vmatpush1.bf16.msra.mxu1 %v7522_v52 }
0x1011   :  { %3393 = vmatprep.subr.bf16.mxu0 %v7523_v58  ;;  %3434 = vmatprep.subr.bf16.mxu1 %v7524_v39  ;;  %v4741_v39 = vmov 0.0  }
0x1014   :  { %3394 = vmatpush1.bf16.msra.mxu0 %v7525_v49  ;;  %3435 = vmatpush1.bf16.msra.mxu1 %v7526_v45  ;;  %v4151_v49 = vld [vmem:[%s6683_s10 + $0x8] sm:$0xff]   ;;  %v4152_v45 = vld [vmem:[%s6683_s10 + $0x10] sm:$0xff]  }
0x1015   :  { %3395 = vmatprep.subr.bf16.mxu0 %v7527_v3  ;;  %3436 = vmatprep.subr.bf16.mxu1 %v7528_v6  ;;  %v4153_v3 = vld [vmem:[%s6683_s10 + $0x18] sm:$0xff]   ;;  %v3516_v6 = vld [vmem:[%s6684_s11] sm:$0x3] }
0x1018   :  { %3396 = vmatpush1.bf16.msra.mxu0 %v7529_v0  ;;  %3437 = vmatpush1.bf16.msra.mxu1 %v7530_v30  ;;  %v4154_v0 = vld [vmem:[%s6683_s10 + $0x20] sm:$0xff]   ;;  %v4742_v30 = vmov 65535  }
0x1019   :  { %3965 = vmatprep.subr.bf16.mxu1 %v4741_v39  ;;  %3959 = vmatprep.subr.bf16.mxu0 %v4741_v39 }
0x10ae   :  { %v6582_v7 = vpop.f32.mrb[92].mxu0  ;;  %v6584_v9 = vpop.f32.mrb[84].mxu1 }
0x10af   :  { %v6586_v33 = vpop.f32.mrb[93].mxu0  ;;  %v6588_v42 = vpop.f32.mrb[85].mxu1 }
0x10b0   :  { %v3201_v27 = vpop.f32.mrb[94].mxu0  ;;  %v3242_v47 = vpop.f32.mrb[86].mxu1 }
0x10b1   :  { %v3202_v16 = vpop.f32.mrb[95].mxu0  ;;  %v3243_v61 = vpop.f32.mrb[87].mxu1  ;;  %v3522_v27 = vsel %vm3521_vm2, 4294967295, %v4742_v30 }
0x10b2   :  { %v3523_v47 = vsel %vm145_vm0, %v3522_v27, 0  ;;  %v4155_v61 = vld [vmem:[%s6683_s10 + $0x28] sm:$0xff]  }
0x10b3   :  { %v3525_v16 = vand.u32 %v3523_v47, %v3516_v6 }
0x10ce   :  { %v3279_v48 = vpop.f32.mrb[96].mxu0  ;;  %v3320_v26 = vpop.f32.mrb[88].mxu1 }
0x10cf   :  { %v3331_v44 = vrot.slane %v3279_v48, 2  ;;  %v3333_v57 = vrot.slane %v3320_v26, 2  ;;  %v3281_v19 = vpop.f32.mrb[97].mxu0  ;;  %v3322_v60 = vpop.f32.mrb[89].mxu1  ;;  %v3515_v48 = vld [vmem:[%s6674_s1] sm:$0x1] }
0x10d0   :  { %v3332_v12 = vrot.slane %v3281_v19, 2  ;;  %v3283_v10 = vpop.f32.mrb[98].mxu0  ;;  %v3324_v55 = vpop.f32.mrb[90].mxu1  ;;  %v3334_v32 = vrot.slane %v3322_v60, 2  ;;  %v4156_v26 = vld [vmem:[%s6683_s10 + $0x30] sm:$0xff]  }
0x10d1   :  { %v3339_v41 = vadd.f32 %v3331_v44, %v7531_v51  ;;  %v3341_v18 = vadd.f32 %v3333_v57, %v7401_v40  ;;  %v3284_v25 = vpop.f32.mrb[99].mxu0  ;;  %v3325_v23 = vpop.f32.mrb[91].mxu1  ;;  %v4157_v44 = vld [vmem:[%s6683_s10 + $0x38] sm:$0xff]  }
0x10d2   :  { %v3340_v56 = vadd.f32 %v3332_v12, %v7353_v2  ;;  %v3342_v17 = vadd.f32 %v3334_v32, %v7354_v11 }
0x10d3   :  { %v3921_v53 = vmul.f32 -1.442695, %v3339_v41  ;;  %v3923_v28 = vmul.f32 -1.442695, %v3341_v18 }
0x10d4   :  { %v3922_v43 = vmul.f32 -1.442695, %v3340_v56  ;;  %v3924_v22 = vmul.f32 -1.442695, %v3342_v17 }
0x10d5   :  { %4412 = vpow2.f32 %v3921_v53 }
0x10d6   :  { %4414 = vpow2.f32 %v3923_v28 }
0x10d7   :  { %4416 = vpow2.f32 %v3922_v43 }
0x10d8   :  { %4418 = vpow2.f32 %v3924_v22 }
0x10df   :  { %v4413_v63 = vpop.eup %4412 }
0x10e0   :  { %v4415_v31 = vpop.eup %4414  ;;  %v3355_v40 = vadd.f32 1.0, %v4413_v63 }
0x10e1   :  { %v4417_v8 = vpop.eup %4416  ;;  %v3357_v59 = vadd.f32 1.0, %v4415_v31 }
0x10e2   :  { %v3356_v54 = vadd.f32 1.0, %v4417_v8  ;;  %v4419_v2 = vpop.eup %4418 }
0x10e3   :  { %4420 = vrcp.f32 %v3357_v59  ;;  %v3358_v62 = vadd.f32 1.0, %v4419_v2 }
0x10e4   :  { %4422 = vrcp.f32 %v3356_v54 }
0x10e5   :  { %4424 = vrcp.f32 %v3355_v40 }
0x10e6   :  { %4426 = vrcp.f32 %v3358_v62 }
0x10ed   :  { %v4421_v4 = vpop.eup %4420 }
0x10ee   :  { %v4423_v21 = vpop.eup %4422  ;;  %v3367_v38 = vmul.f32 2.0, %v4421_v4 }
0x10ef   :  { %v3372_v35 = vmul.f32 %v4423_v21, %v3370_v50  ;;  %v4425_v11 = vpop.eup %4424 }
0x10f0   :  { %v3925_v1 = vadd.f32 -1.0, %v3367_v38  ;;  %v4427_v15 = vpop.eup %4426 }
0x10f2   :  { %v3373_v29 = vmul.f32 %v4425_v11, %v3925_v1 }
0x10f4   :  { %v3374_v14 = vadd.f32 %v3373_v29, %v3372_v35 }
0x10f6   :  { %4428 = vtanh.f32 %v3374_v14 }
0x1100   :  { %v4429_v5 = vpop.eup %4428 }
0x1101   :  { %v3376_v36 = vmul.f32 %v4429_v5, %v4427_v15  ;;  %v4158_v5 = vld [vmem:[%s6686_s13] sm:$0xff]  }
0x1103   :  { %v3377_v52 = vpack.c.bf16 %v3376_v36, %v3376_v36 }
0x1105   :  { %v3379_v58 = vrot.slane %v3377_v52, 3  ;;  %v3940_v52 = vld [vmem:[%s6685_s12] ss:$0 sm:$0xff] }
0x1107   :  { %3414 = vmatmul.mubr.bf16.vlgmr.msra.gmra.mrb[100].mxu0 %v3379_v58  ;;  %3455 = vmatmul.mubr.bf16.vlgmr.msra.gmra.mrb[92].mxu1 %v3379_v58 }
0x1108   :  { %3966 = vmatpush3.bf16.msra.mxu1 %v4150_v37  ;;  %3961 = vmatprep.mubr.msk.bf16.mxu0 %vm4743_vm3, %v4741_v39 }
0x1109   :  { %3967 = vmatprep.subr.bf16.mxu1 %v4741_v39  ;;  %3981 = vmatprep.mubr.msk.bf16.mxu1 %vm4743_vm3, %v4741_v39 }
0x110a   :  { %3960 = vmatpush3.bf16.msra.mxu0 %v3525_v16 }
0x110b   :  { %3985 = vmatprep.subr.bf16.mxu0 %v4741_v39 }
0x110c   :  { %3968 = vmatpush3.bf16.msra.mxu1 %v4151_v49 }
0x110d   :  { %3969 = vmatprep.subr.bf16.mxu1 %v4741_v39 }
0x110f   :  { %3962 = vmatmul.mubr.msk.bf16.vlgmr.msra.gmra.mrb[104].mxu0 %vm3517_vm4, %v3515_v48 }
0x1110   :  { %3970 = vmatpush3.bf16.msra.mxu1 %v4152_v45  ;;  %3989 = vmatprep.mubr.msk.bf16.mxu0 %vm4743_vm3, %v4741_v39 }
0x1111   :  { %3971 = vmatprep.subr.bf16.mxu1 %v4741_v39  ;;  %3986 = vmatpush3.bf16.msra.mxu0 %v4158_v5 }
0x1112   :  { %3987 = vmatprep.subr.bf16.mxu0 %v4741_v39 }
0x1114   :  { %3972 = vmatpush3.bf16.msra.mxu1 %v4153_v3 }
0x1115   :  { %3973 = vmatprep.subr.bf16.mxu1 %v4741_v39 }
0x1118   :  { %3974 = vmatpush3.bf16.msra.mxu1 %v4154_v0 }
0x1119   :  { %3975 = vmatprep.subr.bf16.mxu1 %v4741_v39 }
0x111c   :  { %3976 = vmatpush3.bf16.msra.mxu1 %v4155_v61 }
0x111d   :  { %3977 = vmatprep.subr.bf16.mxu1 %v4741_v39 }
0x1120   :  { %3978 = vmatpush3.bf16.msra.mxu1 %v4156_v26 }
0x1121   :  { %3979 = vmatprep.subr.bf16.mxu1 %v4741_v39  ;;  %v3941_v39 = vld [vmem:[%s6687_s14] ss:$0 sm:$0xff] }
0x1124   :  { %3980 = vmatpush3.bf16.msra.mxu1 %v4157_v44 }
0x11da   :  { %v3415_v57 = vpop.f32.mrb[100].mxu0  ;;  %v3456_v19 = vpop.f32.mrb[92].mxu1 }
0x11db   :  { %v3416_v60 = vadd.f32 %v3415_v57, %v6582_v7  ;;  %v3457_v12 = vadd.f32 %v3456_v19, %v6584_v9  ;;  %v3417_v10 = vpop.f32.mrb[101].mxu0  ;;  %v3458_v55 = vpop.f32.mrb[93].mxu1 }
0x11dc   :  { %v3418_v51 = vadd.f32 %v3417_v10, %v6586_v33  ;;  %v3459_v41 = vadd.f32 %v3458_v55, %v6588_v42  ;;  %v3419_v18 = vpop.f32.mrb[102].mxu0  ;;  %v3460_v25 = vpop.f32.mrb[94].mxu1 }
0x11dd   :  { %v3463_v23 = vadd.f32 %v3416_v60, %v5286_v13  ;;  %v3465_v56 = vadd.f32 %v3457_v12, %v5290_v20  ;;  %v3420_v53 = vpop.f32.mrb[103].mxu0  ;;  %v3461_v28 = vpop.f32.mrb[95].mxu1 }
0x11de   :  { %v3464_v43 = vadd.f32 %v3418_v51, %v5294_v24  ;;  %v3466_v9 = vadd.f32 %v3459_v41, %v5305_v46 }
0x11df   :  { %v3926_v32 = vmul.f32 -1.442695, %v3463_v23  ;;  %v3928_v7 = vmul.f32 -1.442695, %v3465_v56 }
0x11e0   :  { %v3927_v17 = vmul.f32 -1.442695, %v3464_v43  ;;  %v3929_v22 = vmul.f32 -1.442695, %v3466_v9 }
0x11e1   :  { %4430 = vpow2.f32 %v3926_v32 }
0x11e2   :  { %4432 = vpow2.f32 %v3928_v7  ;;  %v3561_v62 = vpop.f32.mrb[104].mxu0 }
0x11e3   :  { %4434 = vpow2.f32 %v3927_v17  ;;  %v3963_v29 = vpop.f32.mrb[105].mxu0 }
0x11e4   :  { %v3564_v14 = vpop.f32.mrb[106].mxu0 }
0x11e5   :  { %v3964_v15 = vpop.f32.mrb[107].mxu0 }
0x11eb   :  { %v4431_v33 = vpop.eup %4430 }
0x11ec   :  { %v4433_v42 = vpop.eup %4432  ;;  %v3479_v8 = vadd.f32 1.0, %v4431_v33 }
0x11ed   :  { %v4435_v63 = vpop.eup %4434  ;;  %v3481_v31 = vadd.f32 1.0, %v4433_v42 }
0x11ee   :  { %v3480_v13 = vadd.f32 1.0, %v4435_v63 }
0x11ef   :  { %4436 = vrcp.f32 %v3481_v31 }
0x11f0   :  { %4438 = vpow2.f32 %v3929_v22 }
0x11f1   :  { %4440 = vrcp.f32 %v3480_v13 }
0x11f2   :  { %4442 = vrcp.f32 %v3479_v8 }
0x11f9   :  { %v4437_v20 = vpop.eup %4436 }
0x11fa   :  { %v4439_v24 = vpop.eup %4438  ;;  %v3491_v59 = vmul.f32 2.0, %v4437_v20 }
0x11fb   :  { %v4441_v54 = vpop.eup %4440  ;;  %v3482_v4 = vadd.f32 1.0, %v4439_v24 }
0x11fc   :  { %v3930_v40 = vadd.f32 -1.0, %v3491_v59  ;;  %v4443_v2 = vpop.eup %4442  ;;  %v3493_v46 = vmul.f32 %v4441_v54, %v6511_v34  ;;  %v4159_v34 = vld [vmem:[%s6686_s13 + $0x8] sm:$0xff]   ;;  %s4744_s13 = smov [#allocation8]  }
0x11fd   :  { %4444 = vrcp.f32 %v3482_v4  ;;  %3988 = vmatpush3.bf16.msra.mxu0 %v4159_v34  ;;  %s3740_s17 = sshll.u32 %s4744_s13, 4  ;;  %s3741_s17 = int_to_ptr.vmem [resolvable:$true] %s3740_s17 }
0x11fe   :  { %v3494_v50 = vmul.f32 %v4443_v2, %v3930_v40  ;;  %s4706_s12 = scalar_lea.vmem %s3741_s17, 32  ;;  %p4711_p11 = scmp.lt.s32.totalorder %s3741_s17, %s3741_s17 }
0x11ff   :  { %p4707_p10 = scmp.ne.s32.totalorder %s3741_s17, %s4706_s12  ;;  %p4712_p12 = scmp.lt.s32.totalorder %s4706_s12, %s4706_s12 }
0x1200   :  { %v3495_v21 = vadd.f32 %v3494_v50, %v3493_v46 }
0x1201   :  { %p4713_p13 = por %p4712_p12, %p4711_p11 }
0x1202   :  { %4446 = vtanh.f32 %v3495_v21 }
0x1203   :  { %p4714_p0 = pnand %p4713_p13, %p4707_p10 }
0x1207   :  { %v4445_v38 = vpop.eup %4444 }
0x120c   :  { %v4447_v35 = vpop.eup %4446 }
0x120d   :  { %v3497_v1 = vmul.f32 %v4447_v35, %v4445_v38 }
0x120f   :  { %v3498_v11 = vpack.c.bf16 %v3497_v1, %v3497_v1 }
0x1211   :  { %3982 = vmatmul.mubr.bf16.vlgmr.msra.gmra.mrb[96].mxu1 %v3498_v11 }
0x12e4   :  { %v3649_v36 = vpop.f32.mrb[96].mxu1 }
0x12e5   :  { %v3650_v58 = vadd.f32 %v3649_v36, %v3561_v62  ;;  %v3983_v37 = vpop.f32.mrb[97].mxu1 }
0x12e6   :  { %v3652_v49 = vpop.f32.mrb[98].mxu1 }
0x12e7   :  { %v3662_v45 = vadd.f32 %v3940_v52, %v3650_v58  ;;  %v3984_v3 = vpop.f32.mrb[99].mxu1 }
0x12e9   :  { %v3663_v6 = vmax.f32 %v3662_v45, 0.0 }
0x12eb   :  { %v3664_v0 = vpack.c.bf16 %v3663_v6, %v3663_v6 }
0x12ed   :  { %3990 = vmatmul.mubr.msk.bf16.vlgmr.msra.gmra.mrb[108].mxu0 %vm3688_vm5, %v3664_v0 }
0x13c0   :  { %v3726_v30 = vpop.f32.mrb[108].mxu0 }
0x13c1   :  { %v3727_v27 = vadd.f32 %v3941_v39, %v3726_v30  ;;  %v3991_v47 = vpop.f32.mrb[109].mxu0 }
0x13c2   :  { %v3729_v16 = vpop.f32.mrb[110].mxu0 }
0x13c3   :  { %v3992_v61 = vpop.f32.mrb[111].mxu0  ;;  %3733 = vst.msk [vmem:[#allocation8] sm:$0x3] %vm3732_vm6, %v3727_v27 }
0x13c4   :  { %4717 = shalt.err (!%p4714_p0)
}
0x13c5   :  { %s4718_s14 = scalar_lea.hbm %s6688_s15, 32 }
0x13c6   :  { %p4719_p1 = scmp.ne.s32.totalorder %s6688_s15, %s4718_s14  ;;  %p4722_p2 = scmp.lt.u32.totalorder %s4718_s14, %s6688_s15 }
0x13c8   :  { %p4724_p3 = pnand %p4722_p2, %p4719_p1 }
0x13ca   :  { %4727 = shalt.err (!%p4724_p3)
}
0x13cb   :  { %3743 = dma.vmem_to_hbm [thread:$0]  %s3741_s17, 32, %s6688_s15, [#allocation4]  }
0x13cc   :  { %4732 = dma.done.wait [#allocation4], 32  }
0x13cd   :  { %4733 = vsyncadd [#allocation4], 4294967264 }
0x13ce   :  { %3747 = vsyncpa [#allocation3], 1 }
0x13cf   :  { %3748 = vsyncpa [#allocation6], 1 }
0x13d0   :  { %3749 = vsyncpa [#allocation4], 1 }

</bundles_post_ra>
